<compile_context>
chip_gen: v5e
topology: v5e:2x2
jax: 0.10.0
libtpu: 0.0.40
codegen_flags: <defaults>
</compile_context>

<pallas_src>
import math

import jax
import jax.numpy as jnp
from jax.experimental import pallas as pl
from jax.experimental.pallas import tpu as pltpu

_LANE = 128


def _resolve_act(act_fn):
    """Mirror getattr(torch, act_fn); fall back to jax.nn for names not in jnp."""
    if hasattr(jnp, act_fn):
        return getattr(jnp, act_fn)
    return getattr(jax.nn, act_fn)


def _pad2(a, rows, cols):
    """Zero-pad a 2-D array up to (rows, cols)."""
    pr = rows - a.shape[0]
    pc = cols - a.shape[1]
    if pr or pc:
        a = jnp.pad(a, ((0, pr), (0, pc)))
    return a


def _round_up(n, m):
    return pl.cdiv(n, m) * m


def _make_kernel(n_hidden, act):
    """Fused forward: phase-shifted-cos RFF encode + hidden layers + final linear."""

    def kernel(x_ref, brff_ref, phase_ref, w1_ref, b1_ref, *refs):
        # refs = [W2, b2, ..., W_{n_hidden}, b_{n_hidden}, W_last, b_last, out_ref]
        #        (only out_ref when n_hidden == 0)
        out_ref = refs[-1]
        wrefs = refs[:-1]

        x = x_ref[...]

        # --- Gaussian RFF encoding, concat folded away via a phase shift ---------
        # u = 2*pi * x @ [B^T, B^T] + [0.., -pi/2..]  =>  cos(u) == [cos(v), sin(v)]
        # K = D_in is tiny, so this dot is mostly MXU padding; it is cheap either way
        # (a VPU broadcast-FMA variant is possible but not worth the layout risk here).
        u = (jnp.dot(x.astype(brff_ref.dtype), brff_ref[...],
                     preferred_element_type=jnp.float32)
             + phase_ref[...])
        enc = jnp.cos(u)                      # padded lanes -> cos(0)=1 (inert: zero W rows)

        # --- first post-encoding linear: ONE dot (was cos-dot + sin-dot + add) ---
        y = (jnp.dot(enc.astype(w1_ref.dtype), w1_ref[...],
                     preferred_element_type=jnp.float32)
             + b1_ref[...])

        if n_hidden >= 1:
            y = act(y)
            # remaining hidden layers (weights pre-transposed to (in, out), padded)
            for ii in range(n_hidden - 1):
                w = wrefs[2 * ii]
                b = wrefs[2 * ii + 1]
                y = act(jnp.dot(y.astype(w.dtype), w[...],
                                preferred_element_type=jnp.float32) + b[...])
            # final layer: Linear(H, D_out), no activation
            w_last = wrefs[-2]
            b_last = wrefs[-1]
            y = (jnp.dot(y.astype(w_last.dtype), w_last[...],
                         preferred_element_type=jnp.float32) + b_last[...])
        # if n_hidden == 0, the layer above *is* the final layer (no activation)

        out_ref[...] = y.astype(out_ref.dtype)

    return kernel


def init_params(key, D_in, H, D_out, CNN_dev, rff_dev, N_Layers):
    """Deterministic parameter init mirroring MultiLayerNet.__init__ (PyTorch layout)."""
    keys = jax.random.split(key, N_Layers + 1)
    # GaussianEncoding: b ~ Normal(0, sigma^2), shape (encoded_size, input_size)
    b_rff = rff_dev * jax.random.normal(keys[0], (H // 2, D_in), dtype=jnp.float32)

    linears = []
    for ii in range(N_Layers):
        if ii == 0:
            shape = (H, D_in)      # created but unused in forward
        elif ii == N_Layers - 1:
            shape = (D_out, H)
        else:
            shape = (H, H)
        w = CNN_dev * jax.random.normal(keys[ii + 1], shape, dtype=jnp.float32)
        b = jnp.zeros((shape[0],), dtype=jnp.float32)
        linears.append((w, b))
    return {"b_rff": b_rff, "linears": linears}


def multilayer_net_forward(x, params, N_Layers, act_fn, *, tm=None,
                           mxu_dtype=None, return_padded=False):
    """Pallas-backed equivalent of MultiLayerNet.forward(x, N_Layers, act_fn)."""
    B, D_in = x.shape
    b_rff = params["b_rff"]                 # (E, D_in), E = H//2
    linears = params["linears"]             # PyTorch layout: (out_features, in_features)
    n_hidden = N_Layers - 2
    D_out = linears[-1][0].shape[0]
    E = b_rff.shape[0]
    H = 2 * E

    # Lane-dense padded feature dims (128-multiples).
    Hp = _round_up(H, _LANE)
    Dp = _round_up(D_out, _LANE)

    # Batch tile: biggest tile up to 512 rows (single-TC v5e/v6e amortization), but keep
    # >= 2 grid steps when possible so both v7x TensorCores get work.  Pass tm=B on a
    # single-TC chip if you want a 1-step grid.
    if tm is None:
        tm = min(B, 512)
        if B // tm < 2 and B % 16 == 0:
            tm = B // 2
    assert B % tm == 0, "batch must be a multiple of the batch tile"

    # MXU operand dtype (weights + pre-dot activation casts). Accum / elementwise stay f32.
    wdt = jnp.float32 if mxu_dtype is None else mxu_dtype

    # --- wrapper-side (one-time) parameter re-layout --------------------------------
    # RFF projection, 2*pi folded in, columns duplicated for the phase-shifted cosine.
    brff_t = (2.0 * math.pi) * b_rff.T                              # (D_in, E)
    brff_dup = _pad2(jnp.concatenate([brff_t, brff_t], axis=1),     # (D_in, 2E) -> (D_in, Hp)
                     D_in, Hp).astype(wdt)
    phase = _pad2(jnp.concatenate(                                  # (1, 2E) -> (1, Hp)
        [jnp.zeros((1, E), jnp.float32),
         jnp.full((1, E), -0.5 * math.pi, jnp.float32)], axis=1), 1, Hp)

    # First linear after the encoding (or the final layer if N_Layers == 2).
    if n_hidden >= 1:
        w1, b1 = linears[1]                 # (H, H)
        first_out = Hp
    else:
        w1, b1 = linears[-1]                # (D_out, H)
        first_out = Dp
    w1t = _pad2(w1.T, Hp, first_out).astype(wdt)          # padded rows are zero (inert lanes)
    b1p = _pad2(b1.reshape(1, -1), 1, first_out)

    flat_args = [brff_dup, phase, w1t, b1p]
    # NOTE: weight/bias blocks are grid-invariant (index (0,0)); for very wide/deep nets
    # on v7x (64 MiB VMEM) consider single-buffering them (pl.Buffered(1)) or streaming
    # stacked layer weights from HBM (pl.ANY + make_async_copy) and raising
    # vmem_limit_bytes.  Irrelevant at H=64.
    in_specs = [
        pl.BlockSpec((tm, D_in), lambda i: (i, 0)),            # x : tiled over batch
        pl.BlockSpec(brff_dup.shape, lambda i: (0, 0)),        # duplicated RFF projection
        pl.BlockSpec(phase.shape, lambda i: (0, 0)),           # phase bias (0 / -pi/2)
        pl.BlockSpec(w1t.shape, lambda i: (0, 0)),
        pl.BlockSpec(b1p.shape, lambda i: (0, 0)),
    ]

    if n_hidden >= 1:
        # Remaining hidden layers (linears[2 .. N_Layers-2]).
        for (w, b) in linears[2:N_Layers - 1]:
            wt = _pad2(w.T, Hp, Hp).astype(wdt)
            bp = _pad2(b.reshape(1, -1), 1, Hp)
            flat_args += [wt, bp]
            in_specs += [pl.BlockSpec(wt.shape, lambda i: (0, 0)),
                         pl.BlockSpec(bp.shape, lambda i: (0, 0))]
        # Final layer Linear(H, D_out), padded to a lane-dense output.
        w_last, b_last = linears[-1]
        wlt = _pad2(w_last.T, Hp, Dp).astype(wdt)
        blp = _pad2(b_last.reshape(1, -1), 1, Dp)
        flat_args += [wlt, blp]
        in_specs += [pl.BlockSpec(wlt.shape, lambda i: (0, 0)),
                     pl.BlockSpec(blp.shape, lambda i: (0, 0))]

    kernel = _make_kernel(n_hidden, _resolve_act(act_fn))

    out_padded = pl.pallas_call(
        kernel,
        out_shape=jax.ShapeDtypeStruct((B, Dp), x.dtype),
        grid=(B // tm,),
        in_specs=in_specs,
        out_specs=pl.BlockSpec((tm, Dp), lambda i: (i, 0)),    # lane-dense store
        compiler_params=pltpu.CompilerParams(
            dimension_semantics=("parallel",)),
    )(x, *flat_args)

    if return_padded:
        # Fused consumers can take the lane-dense (B, Dp) slab directly and avoid the
        # extra slice read/write below (padded-output HBM-traffic feedback item).
        return out_padded
    return out_padded[:, :D_out]


def multilayer_net_reference(x, params, N_Layers, act_fn):
    """Pure-JAX reference mirroring the PyTorch forward exactly."""
    act = _resolve_act(act_fn)
    v = 2.0 * math.pi * x @ params["b_rff"].T
    y = jnp.concatenate([jnp.cos(v), jnp.sin(v)], axis=-1)
    for ii in range(1, N_Layers - 1):
        w, b = params["linears"][ii]
        y = act(y @ w.T + b)
    w, b = params["linears"][-1]
    return y @ w.T + b


if __name__ == "__main__":
    # Coordinate-in / field-out MLP: small, TPU-friendly shapes.
    D_in, H, D_out = 3, 64, 3
    N_Layers = 4
    act_fn = "tanh"
    CNN_dev = 0.1
    rff_dev = 1.0
    B = 256           # batch; default tm logic -> tm=128, grid=(2,) (both v7x TCs busy)

    key = jax.random.PRNGKey(0)
    kx, kp = jax.random.split(key)
    x = jax.random.normal(kx, (B, D_in), dtype=jnp.float32)
    params = init_params(kp, D_in, H, D_out, CNN_dev, rff_dev, N_Layers)

    out = multilayer_net_forward(x, params, N_Layers, act_fn)
    out = jax.block_until_ready(out)

    ref = multilayer_net_reference(x, params, N_Layers, act_fn)
    assert out.shape == (B, D_out)
    assert jnp.allclose(out, ref, rtol=1e-4, atol=1e-4), float(jnp.max(jnp.abs(out - ref)))

    print("KERNEL_OK")
</pallas_src>

<mosaic_0001>
module attributes {stable_mosaic.version = 11 : i64} {
  func.func @kernel(%arg0: i32, %arg1: memref<128x3xf32, #tpu.memory_space<vmem>>, %arg2: memref<3x128xf32, #tpu.memory_space<vmem>>, %arg3: memref<1x128xf32, #tpu.memory_space<vmem>>, %arg4: memref<128x128xf32, #tpu.memory_space<vmem>>, %arg5: memref<1x128xf32, #tpu.memory_space<vmem>>, %arg6: memref<128x128xf32, #tpu.memory_space<vmem>>, %arg7: memref<1x128xf32, #tpu.memory_space<vmem>>, %arg8: memref<128x128xf32, #tpu.memory_space<vmem>>, %arg9: memref<1x128xf32, #tpu.memory_space<vmem>>, %arg10: memref<128x128xf32, #tpu.memory_space<vmem>>) attributes {dimension_semantics = [#tpu.dimension_semantics<parallel>], iteration_bounds = array<i64: 2>, scalar_prefetch = 0 : i64, scratch_operands = 0 : i64, tpu.core_type = #tpu.core_type<tc>, window_params = [{transform_indices = @transform_0, window_bounds = array<i64: 128, 3>}, {pipeline_mode = #tpu.pipeline_mode<synchronous>, transform_indices = @transform_1, window_bounds = array<i64: 3, 128>}, {pipeline_mode = #tpu.pipeline_mode<synchronous>, transform_indices = @transform_2, window_bounds = array<i64: 1, 128>}, {pipeline_mode = #tpu.pipeline_mode<synchronous>, transform_indices = @transform_3, window_bounds = array<i64: 128, 128>}, {pipeline_mode = #tpu.pipeline_mode<synchronous>, transform_indices = @transform_4, window_bounds = array<i64: 1, 128>}, {pipeline_mode = #tpu.pipeline_mode<synchronous>, transform_indices = @transform_5, window_bounds = array<i64: 128, 128>}, {pipeline_mode = #tpu.pipeline_mode<synchronous>, transform_indices = @transform_6, window_bounds = array<i64: 1, 128>}, {pipeline_mode = #tpu.pipeline_mode<synchronous>, transform_indices = @transform_7, window_bounds = array<i64: 128, 128>}, {pipeline_mode = #tpu.pipeline_mode<synchronous>, transform_indices = @transform_8, window_bounds = array<i64: 1, 128>}, {transform_indices = @transform_9, window_bounds = array<i64: 128, 128>}]} {
    %c0 = arith.constant 0 : index
    %c0_0 = arith.constant 0 : index
    %0 = vector.load %arg1[%c0, %c0_0] : memref<128x3xf32, #tpu.memory_space<vmem>>, vector<128x3xf32>
    %c0_1 = arith.constant 0 : index
    %c0_2 = arith.constant 0 : index
    %1 = vector.load %arg2[%c0_1, %c0_2] : memref<3x128xf32, #tpu.memory_space<vmem>>, vector<3x128xf32>
    %cst = arith.constant dense<0.000000e+00> : vector<128x128xf32>
    %2 = tpu.matmul %0, %1, %cst {dimension_numbers = #tpu.dot_dimension_numbers<[1], [0], [0], [1], [0, 0, 1, 1], [], []>} : vector<128x3xf32>, vector<3x128xf32>, vector<128x128xf32> -> vector<128x128xf32>
    %c0_3 = arith.constant 0 : index
    %c0_4 = arith.constant 0 : index
    %3 = vector.load %arg3[%c0_3, %c0_4] : memref<1x128xf32, #tpu.memory_space<vmem>>, vector<1x128xf32>
    %4 = vector.broadcast %3 : vector<1x128xf32> to vector<128x128xf32>
    %5 = arith.addf %2, %4 : vector<128x128xf32>
    %6 = math.cos %5 : vector<128x128xf32>
    %c0_5 = arith.constant 0 : index
    %c0_6 = arith.constant 0 : index
    %7 = vector.load %arg4[%c0_5, %c0_6] : memref<128x128xf32, #tpu.memory_space<vmem>>, vector<128x128xf32>
    %cst_7 = arith.constant dense<0.000000e+00> : vector<128x128xf32>
    %8 = tpu.matmul %6, %7, %cst_7 {dimension_numbers = #tpu.dot_dimension_numbers<[1], [0], [0], [1], [0, 0, 1, 1], [], []>} : vector<128x128xf32>, vector<128x128xf32>, vector<128x128xf32> -> vector<128x128xf32>
    %c0_8 = arith.constant 0 : index
    %c0_9 = arith.constant 0 : index
    %9 = vector.load %arg5[%c0_8, %c0_9] : memref<1x128xf32, #tpu.memory_space<vmem>>, vector<1x128xf32>
    %10 = vector.broadcast %9 : vector<1x128xf32> to vector<128x128xf32>
    %11 = arith.addf %8, %10 : vector<128x128xf32>
    %12 = math.tanh %11 : vector<128x128xf32>
    %c0_10 = arith.constant 0 : index
    %c0_11 = arith.constant 0 : index
    %13 = vector.load %arg6[%c0_10, %c0_11] : memref<128x128xf32, #tpu.memory_space<vmem>>, vector<128x128xf32>
    %cst_12 = arith.constant dense<0.000000e+00> : vector<128x128xf32>
    %14 = tpu.matmul %12, %13, %cst_12 {dimension_numbers = #tpu.dot_dimension_numbers<[1], [0], [0], [1], [0, 0, 1, 1], [], []>} : vector<128x128xf32>, vector<128x128xf32>, vector<128x128xf32> -> vector<128x128xf32>
    %c0_13 = arith.constant 0 : index
    %c0_14 = arith.constant 0 : index
    %15 = vector.load %arg7[%c0_13, %c0_14] : memref<1x128xf32, #tpu.memory_space<vmem>>, vector<1x128xf32>
    %16 = vector.broadcast %15 : vector<1x128xf32> to vector<128x128xf32>
    %17 = arith.addf %14, %16 : vector<128x128xf32>
    %18 = math.tanh %17 : vector<128x128xf32>
    %c0_15 = arith.constant 0 : index
    %c0_16 = arith.constant 0 : index
    %19 = vector.load %arg8[%c0_15, %c0_16] : memref<128x128xf32, #tpu.memory_space<vmem>>, vector<128x128xf32>
    %cst_17 = arith.constant dense<0.000000e+00> : vector<128x128xf32>
    %20 = tpu.matmul %18, %19, %cst_17 {dimension_numbers = #tpu.dot_dimension_numbers<[1], [0], [0], [1], [0, 0, 1, 1], [], []>} : vector<128x128xf32>, vector<128x128xf32>, vector<128x128xf32> -> vector<128x128xf32>
    %c0_18 = arith.constant 0 : index
    %c0_19 = arith.constant 0 : index
    %21 = vector.load %arg9[%c0_18, %c0_19] : memref<1x128xf32, #tpu.memory_space<vmem>>, vector<1x128xf32>
    %22 = vector.broadcast %21 : vector<1x128xf32> to vector<128x128xf32>
    %23 = arith.addf %20, %22 : vector<128x128xf32>
    %c0_20 = arith.constant 0 : index
    %c0_21 = arith.constant 0 : index
    %24 = vector.load %arg10[%c0_20, %c0_21] : memref<128x128xf32, #tpu.memory_space<vmem>>, vector<128x128xf32>
    tpu.vector_store %arg10[%c0_20, %c0_21], %23 {strides = array<i32>} : memref<128x128xf32, #tpu.memory_space<vmem>>, vector<128x128xf32>,
    return
  }
  func.func @transform_0(%arg0: i32) -> (i32, i32) {
    %c0_i32 = arith.constant 0 : i32
    %c0_i32_0 = arith.constant 0 : i32
    return %arg0, %c0_i32 : i32, i32
  }
  func.func @transform_1(%arg0: i32) -> (i32, i32) {
    %c0_i32 = arith.constant 0 : i32
    %c0_i32_0 = arith.constant 0 : i32
    %c0_i32_1 = arith.constant 0 : i32
    return %c0_i32, %c0_i32_0 : i32, i32
  }
  func.func @transform_2(%arg0: i32) -> (i32, i32) {
    %c0_i32 = arith.constant 0 : i32
    %c0_i32_0 = arith.constant 0 : i32
    %c0_i32_1 = arith.constant 0 : i32
    return %c0_i32, %c0_i32_0 : i32, i32
  }
  func.func @transform_3(%arg0: i32) -> (i32, i32) {
    %c0_i32 = arith.constant 0 : i32
    %c0_i32_0 = arith.constant 0 : i32
    %c0_i32_1 = arith.constant 0 : i32
    return %c0_i32, %c0_i32_0 : i32, i32
  }
  func.func @transform_4(%arg0: i32) -> (i32, i32) {
    %c0_i32 = arith.constant 0 : i32
    %c0_i32_0 = arith.constant 0 : i32
    %c0_i32_1 = arith.constant 0 : i32
    return %c0_i32, %c0_i32_0 : i32, i32
  }
  func.func @transform_5(%arg0: i32) -> (i32, i32) {
    %c0_i32 = arith.constant 0 : i32
    %c0_i32_0 = arith.constant 0 : i32
    %c0_i32_1 = arith.constant 0 : i32
    return %c0_i32, %c0_i32_0 : i32, i32
  }
  func.func @transform_6(%arg0: i32) -> (i32, i32) {
    %c0_i32 = arith.constant 0 : i32
    %c0_i32_0 = arith.constant 0 : i32
    %c0_i32_1 = arith.constant 0 : i32
    return %c0_i32, %c0_i32_0 : i32, i32
  }
  func.func @transform_7(%arg0: i32) -> (i32, i32) {
    %c0_i32 = arith.constant 0 : i32
    %c0_i32_0 = arith.constant 0 : i32
    %c0_i32_1 = arith.constant 0 : i32
    return %c0_i32, %c0_i32_0 : i32, i32
  }
  func.func @transform_8(%arg0: i32) -> (i32, i32) {
    %c0_i32 = arith.constant 0 : i32
    %c0_i32_0 = arith.constant 0 : i32
    %c0_i32_1 = arith.constant 0 : i32
    return %c0_i32, %c0_i32_0 : i32, i32
  }
  func.func @transform_9(%arg0: i32) -> (i32, i32) {
    %c0_i32 = arith.constant 0 : i32
    %c0_i32_0 = arith.constant 0 : i32
    return %arg0, %c0_i32 : i32, i32
  }
}

</mosaic_0001>

<bundles_post_ra>
// kernel: tpu_custom_call.1
= control target key start
LH: loop header
LB: loop body
LE: loop exit
PB: predicated region body
PF: predicated region fallthrough
CT: control target
= control target key end

     0   :  { %14 = vsyncpa [#allocation3], 0  ;;  %s6454_s0 = inlined_call_operand.vmem [shape: f32[256,3], index: 0, kind: input, shape index: {}]   ;;  %s6455_s1 = inlined_call_operand.vmem [shape: f32[3,128], index: 1, kind: input, shape index: {}]   ;;  %s6456_s2 = inlined_call_operand.vmem [shape: f32[1,128], index: 2, kind: input, shape index: {}]   ;;  %s6457_s3 = inlined_call_operand.vmem [shape: f32[128,128], index: 3, kind: input, shape index: {}]   ;;  %s6458_s4 = inlined_call_operand.vmem [shape: f32[1,128], index: 4, kind: input, shape index: {}]   ;;  %s6459_s5 = inlined_call_operand.vmem [shape: f32[128,128], index: 5, kind: input, shape index: {}]   ;;  %s6460_s6 = inlined_call_operand.vmem [shape: f32[1,128], index: 6, kind: input, shape index: {}]   ;;  %s6461_s7 = inlined_call_operand.hbm [shape: f32[128,128], index: 7, kind: input, shape index: {}]   ;;  %s6462_s8 = inlined_call_operand.vmem [shape: f32[1,128], index: 8, kind: input, shape index: {}]   ;;  %s6463_s9 = inlined_call_operand.hbm [shape: f32[256,128], index: 9, kind: output, shape index: {}]  }
   0x1   :  { %15 = vsyncpa [#allocation4], 0 }
   0x2   :  { %17 = vsyncpa [#allocation4 + $0x1], 0  ;;  %s3734_s30 = smov 0   ;;  %s3736_s10 = smov 0  }
   0x3   :  { %s3738_s11 = smov 0   ;;  %s3740_s12 = smov 0  }
   0x4 LB: > { %s3755_s13 = sadd.s32 4294967295, %s3670_s12   ;;  %s3347_s14 = sadd.s32 4294967294, %s3670_s12   ;;  %s3670_s12 = sphi %s3740_s12, %s6743_s12   ;;  %s3666_s11 = sphi %s3738_s11, %s6742_s11   ;;  %s3662_s10 = sphi %s3736_s10, %s6741_s10   ;;  %s3658_s30 = sphi %s3734_s30, %s6740_s30  }
   0x5   : > { %s3759_s15 = sadd.s32 1, %s3670_s12   ;;  %s224_s16 = sadd.s32 1, %s3666_s11 }
   0x6   : > { %s221_s17 = ssub.s32 %s3670_s12, %s3759_s15  ;;  %p234_p0 = scmp.ne.s32.totalorder %s3666_s11, %s3662_s10 }
   0x7   : > { %p222_p1 = scmp.eq.s32.totalorder %s221_s17, 0  ;;  %p235_p2 = scmp.eq.s32.totalorder %s3755_s13, 1 }
   0x8   : > { %p240_p3 = scmp.ne.s32.totalorder %s3662_s10, %s3658_s30  ;;  %p241_p4 = scmp.eq.s32.totalorder %s3347_s14, 1 }
   0x9   : > { %s3770_s18 = scalar_select %p222_p1, %s3666_s11, %s224_s16  }
   0xa   : > { %p3772_p5 = por %p235_p2, %p234_p0  ;;  %p3776_p6 = por %p241_p4, %p240_p3 }
   0xb   : > { %p3348_p7 = scmp.ge.s32.totalorder %s3670_s12, 1  ;;  %p248_p8 = scmp.lt.s32.totalorder %s3670_s12, 3 }
   0xc   : > { %p3457_p9 = scmp.eq.s32.totalorder %s3755_s13, 0  ;;  %s277_s23 = sshll.u32 %s6461_s7, 4  ;;  %s278_s23 = int_to_ptr.hbm [resolvable:$true] %s277_s23 }
   0xd   : > { %p249_p10 = pnand %p3348_p7, %p248_p8  ;;  %s3672_s24 = smov [#allocation2]  }
   0xe   : > { %s279_s25 = sshll.u32 %s3672_s24, 4  ;;  %s3673_s26 = smov 128   ;;  %s280_s25 = int_to_ptr.vmem [resolvable:$true] %s279_s25 }
   0xf   : > { %p3449_p11 = pneg %p249_p10  ;;  %s3674_s27 = smov 8  }
  0x10   : > { %307 = sbr.rel (%p249_p10) target bundleno = 1216 (0x4c0), region = 56 }
  0x11   : > { %p3450_p12 = pnand %p3457_p9, %p3449_p11 }
  0x13   : > { %3452 = dma.hbm_to_vmem [thread:$0]  (!%p3450_p12), %s278_s23, 2048, %s280_s25, [#allocation3], %s3673_s26, %s3673_s26, %s3674_s27  }
  0x15   : > { %3649 = dma.done.wait (%p3457_p9), [#allocation3], 2048  }
  0x16   : > { %3651 = vsyncadd (%p3457_p9), [#allocation3], 4294965248  ;;  %s3354_s28 = sshll.u32 %s3755_s13, 4  ;;  %vm421_vm0 = vcmask 1042432   ;;  %vm372_vm1 = vcmask 23552   ;;  %v2969_v10 = vld [vmem:[%s6457_s3 + $0x78] sm:$0xff] }
  0x17   : > { %p345_p13 = scmp.lt.s32.totalorder %s3354_s28, 31  ;;  %v367_v0 = vld [vmem:[%s6455_s1] sm:$0x7]  ;;  %3427 = vmatpush.msra.mxu1 %v2969_v10  ;;  %v2968_v12 = vld [vmem:[%s6457_s3 + $0x70] sm:$0xff]  ;;  %v2967_v14 = vld [vmem:[%s6457_s3 + $0x68] sm:$0xff]  ;;  %s3426_s14 = sshll.u32 %s3755_s13, 7 }
  0x18   : > { %3356 = vmatpush.msk.msra.mxu0 %vm421_vm0, %v367_v0  ;;  %v2966_v16 = vld [vmem:[%s6457_s3 + $0x60] sm:$0xff]  ;;  %v2965_v20 = vld [vmem:[%s6457_s3 + $0x58] sm:$0xff]  ;;  %v2964_v23 = vld [vmem:[%s6457_s3 + $0x50] sm:$0xff]  ;;  %v6470_v38 = vmov 1326507024   ;;  %s3269_s22 = scalar_lea.hbm %s6463_s9, %s3426_s14  ;;  %s3624_s14 = scalar_lea.hbm %s6463_s9, 256 }
  0x19   : > { %s6745_s28 = smov (!%p345_p13, %s3354_s28), 31  ;;  %3428 = vmatpush.msra.mxu1 %v2968_v12  ;;  %v3851_v22 = vld [vmem:[%s6456_s2] ss:$0 sm:$0xff]  ;;  %v2963_v28 = vld [vmem:[%s6457_s3 + $0x48] sm:$0xff]  ;;  %v6476_v41 = vmov 920167782  }
  0x1a   : > { %s3355_s29 = sshll.u32 %s6745_s28, 3  ;;  %2974 = vmatpush.msrb.mxu0 %v2969_v10  ;;  %v2962_v35 = vld [vmem:[%s6457_s3 + $0x40] sm:$0xff]  ;;  %v6486_v46 = vmov 2131351028   ;;  %v6482_v48 = vmov 2102212464  }
  0x1b   : > { %s3796_s17 = scalar_lea.vmem %s6454_s0, %s3355_s29  ;;  %3429 = vmatpush.msra.mxu1 %v2967_v14  ;;  %v6484_v53 = vmov 2475754826   ;;  %v2961_v57 = vld [vmem:[%s6457_s3 + $0x38] sm:$0xff]  ;;  %s3272_s24 = sshll.u32 %s3269_s22, 4  ;;  %s3273_s24 = int_to_ptr.hbm [resolvable:$true] %s3272_s24 }
  0x1c   : > { %v351_v1 = vld [vmem:[%s3796_s17] sm:$0xff]  ;;  %v352_v2 = vld [vmem:[%s3796_s17 + $0x8] sm:$0xff]  ;;  %v353_v3 = vld [vmem:[%s3796_s17 + $0x10] sm:$0xff]  ;;  %2975 = vmatpush.msrb.mxu0 %v2968_v12 }
  0x1d   : > { %3357 = vmatmul.msk.f32.vlgmr.msra.gmra.mxu0 %vm372_vm1, %v351_v1  ;;  %v354_v4 = vld [vmem:[%s3796_s17 + $0x18] sm:$0xff]  ;;  %v355_v5 = vld [vmem:[%s3796_s17 + $0x20] sm:$0xff]  ;;  %v356_v6 = vld [vmem:[%s3796_s17 + $0x28] sm:$0xff]  ;;  %3430 = vmatpush.msra.mxu1 %v2966_v16 }
  0x1e   : > { %v357_v7 = vld [vmem:[%s3796_s17 + $0x30] sm:$0xff]  ;;  %v358_v8 = vld [vmem:[%s3796_s17 + $0x38] sm:$0xff]  ;;  %v359_v9 = vld [vmem:[%s3796_s17 + $0x40] sm:$0xff]  ;;  %2976 = vmatpush.msrb.mxu0 %v2967_v14 }
  0x1f   : > { %v360_v11 = vld [vmem:[%s3796_s17 + $0x48] sm:$0xff]  ;;  %v361_v13 = vld [vmem:[%s3796_s17 + $0x50] sm:$0xff]  ;;  %v362_v15 = vld [vmem:[%s3796_s17 + $0x58] sm:$0xff]  ;;  %3431 = vmatpush.msra.mxu1 %v2965_v20 }
  0x20   : > { %2977 = vmatpush.msrb.mxu0 %v2966_v16  ;;  %v363_v17 = vld [vmem:[%s3796_s17 + $0x60] sm:$0xff]  ;;  %v364_v18 = vld [vmem:[%s3796_s17 + $0x68] sm:$0xff]  ;;  %v365_v19 = vld [vmem:[%s3796_s17 + $0x70] sm:$0xff] }
  0x21   : > { %v366_v21 = vld [vmem:[%s3796_s17 + $0x78] sm:$0xff]  ;;  %3432 = vmatpush.msra.mxu1 %v2964_v23  ;;  %s341_s17 = sand.u32 1, %s3662_s10  }
  0x22   : > { %2978 = vmatpush.msrb.mxu0 %v2965_v20  ;;  %s3353_s26 = sshll.u32 %s341_s17, 7  ;;  %s3258_s25 = scalar_lea.sflag [#allocation4], %s341_s17 }
  0x23   : > { %3433 = vmatpush.msra.mxu1 %v2963_v28  ;;  %s6401_s29 = scalar_lea.vmem [#allocation5], %s3353_s26  ;;  %s3618_s26 = sshra.s32 %s3273_s24, 4  ;;  %s3619_s26 = int_to_ptr.hbm [resolvable:$true] %s3618_s26 }
  0x24   : > { %2979 = vmatpush.msrb.mxu0 %v2964_v23  ;;  %s3270_s23 = sshll.u32 %s6401_s29, 4  ;;  %s3620_s27 = scalar_lea.hbm %s3619_s26, 128  ;;  %s3271_s23 = int_to_ptr.vmem [resolvable:$true] %s3270_s23 }
  0x25   : > { %3358 = vmatmul.msk.f32.gmra.mxu0 %vm372_vm1, %v352_v2  ;;  %3434 = vmatpush.msra.mxu1 %v2962_v35  ;;  %v6467_v2 = vmov 683565275   ;;  %p3621_p0 = scmp.ne.s32.totalorder %s3619_s26, %s3620_s27  ;;  %p3625_p3 = scmp.lt.s32.totalorder %s3619_s26, %s6463_s9 }
  0x26   : > { %2980 = vmatpush.msrb.mxu0 %v2963_v28  ;;  %p3626_p4 = scmp.lt.s32.totalorder %s3624_s14, %s3620_s27 }
  0x27   : > { %3435 = vmatpush.msra.mxu1 %v2961_v57  ;;  %p3622_p1 = pnand %p3621_p0, %p3772_p5 }
  0x28   : > { %2981 = vmatpush.msrb.mxu0 %v2962_v35  ;;  %v2959_v35 = vld [vmem:[%s6457_s3 + $0x28] sm:$0xff]  ;;  %p3627_p7 = por %p3626_p4, %p3625_p3 }
  0x29   : > { %p3623_p2 = pneg %p3622_p1 }
  0x2a   : > { %2982 = vmatpush.msrb.mxu0 %v2961_v57 }
  0x2b   : > { %p3628_p8 = pnand %p3627_p7, %p3623_p2 }
  0x2d   : > { %3359 = vmatmul.msk.f32.gmra.mxu0 %vm372_vm1, %v353_v3 }
  0x35   : > { %3360 = vmatmul.msk.f32.gmra.mxu0 %vm372_vm1, %v354_v4 }
  0x3d   : > { %3361 = vmatmul.msk.f32.gmra.mxu0 %vm372_vm1, %v355_v5 }
  0x45   : > { %3362 = vmatmul.msk.f32.gmra.mxu0 %vm372_vm1, %v356_v6 }
  0x4d   : > { %3363 = vmatmul.msk.f32.gmra.mxu0 %vm372_vm1, %v357_v7 }
  0x55   : > { %3364 = vmatmul.msk.f32.gmra.mxu0 %vm372_vm1, %v358_v8 }
  0x5d   : > { %3365 = vmatmul.msk.f32.gmra.mxu0 %vm372_vm1, %v359_v9 }
  0x65   : > { %3366 = vmatmul.msk.f32.gmra.mxu0 %vm372_vm1, %v360_v11 }
  0x6d   : > { %3367 = vmatmul.msk.f32.gmra.mxu0 %vm372_vm1, %v361_v13  ;;  %v2960_v13 = vld [vmem:[%s6457_s3 + $0x30] sm:$0xff] }
  0x6e   : > { %2983 = vmatpush.msrb.mxu0 %v2960_v13  ;;  %3436 = vmatpush.msra.mxu1 %v2960_v13 }
  0x70   : > { %2984 = vmatpush.msrb.mxu0 %v2959_v35  ;;  %3437 = vmatpush.msra.mxu1 %v2959_v35 }
  0x75   : > { %3368 = vmatmul.msk.f32.gmra.mxu0 %vm372_vm1, %v362_v15 }
  0x7d   : > { %3369 = vmatmul.msk.f32.gmra.mxu0 %vm372_vm1, %v363_v17 }
  0x85   : > { %3370 = vmatmul.msk.f32.gmra.mxu0 %vm372_vm1, %v364_v18 }
  0x8d   : > { %3371 = vmatmul.msk.f32.gmra.mxu0 %vm372_vm1, %v365_v19 }
  0x95   : > { %3372 = vmatmul.msk.f32.gmra.mxu0 %vm372_vm1, %v366_v21 }
  0x9a   : > { %v442_v24 = vpop.f32.mrf.mxu0 }
  0x9b   : > { %v3857_v25 = vadd.f32 %v3851_v22, %v442_v24 }
  0x9d   : > { %v493_v26 = vand.u32 2139095040, %v3857_v25  ;;  %v6469_v34 = vand.u32 2147483647, %v3857_v25 }
  0x9f   : > { %v494_v27 = vshrl.u32 %v493_v26, 23  ;;  %v497_v40 = vand.u32 8388607, %v6469_v34 }
  0xa1   : > { %v3373_v29 = vadd.s32 4294967169, %v494_v27  ;;  %v498_v52 = vor.u32 8388608, %v497_v40 }
  0xa2   : > { %v445_v30 = vpop.f32.mrf.mxu0 }
  0xa3   : > { %v500_v31 = vadd.s32 1, %v3373_v29  ;;  %v3875_v43 = vadd.f32 %v3851_v22, %v445_v30  ;;  %v3901_v0 = vshll.u32 %v498_v52, 8 }
  0xa5   : > { %vm501_vm2 = vcmp.gt.s32.totalorder %v500_v31, 0  ;;  %v647_v56 = vand.u32 2139095040, %v3875_v43  ;;  %v539_v9 = vand.u32 65535, %v3901_v0  ;;  %v540_v27 = vshrl.u32 %v3901_v0, 16 }
  0xa6   : > { %v502_v32 = vsel %vm501_vm2, %v500_v31, 0 }
  0xa7   : > { %v504_v33 = vand.u32 31, %v502_v32  ;;  %v3877_v44 = vshrl.u32 %v502_v32, 5  ;;  %v648_v1 = vshrl.u32 %v647_v56, 23 }
  0xa9   : > { %v3867_v36 = vsub.s32 32, %v504_v33  ;;  %v519_v42 = vshll.u32 %v6476_v41, %v504_v33  ;;  %v516_v51 = vshll.u32 %v6482_v48, %v504_v33  ;;  %v510_v54 = vshll.u32 %v6484_v53, %v504_v33 }
  0xaa   : > { %v448_v37 = vpop.f32.mrf.mxu0  ;;  %v513_v55 = vshll.u32 %v6486_v46, %v504_v33  ;;  %vm525_vm3 = vcmp.lt.s32.totalorder %v3877_v44, 4  ;;  %v507_v3 = vshll.u32 %v6467_v2, %v504_v33  ;;  %vm522_vm4 = vcmp.lt.s32.totalorder %v3877_v44, 1 }
  0xab   : > { %v520_v39 = vshrl.u32 %v6470_v38, %v3867_v36  ;;  %v517_v45 = vshrl.u32 %v6476_v41, %v3867_v36  ;;  %v511_v47 = vshrl.u32 %v6486_v46, %v3867_v36  ;;  %v514_v49 = vshrl.u32 %v6482_v48, %v3867_v36 }
  0xac   : > { %v508_v63 = vshrl.u32 %v6484_v53, %v3867_v36  ;;  %vm524_vm5 = vcmp.lt.s32.totalorder %v3877_v44, 3  ;;  %v3907_v4 = vadd.f32 %v3851_v22, %v448_v37  ;;  %vm523_vm6 = vcmp.lt.s32.totalorder %v3877_v44, 2 }
  0xad   : > { %v521_v50 = vor.u32 %v520_v39, %v519_v42  ;;  %v518_v58 = vor.u32 %v517_v45, %v516_v51  ;;  %v3893_v59 = vor.u32 %v511_v47, %v510_v54  ;;  %v3895_v60 = vor.u32 %v514_v49, %v513_v55 }
  0xae   : > { %v3918_v8 = vor.u32 %v508_v63, %v507_v3  ;;  %v3376_v11 = vadd.s32 4294967169, %v648_v1  ;;  %v801_v15 = vand.u32 2139095040, %v3907_v4  ;;  %v6465_v54 = vmov 0  }
  0xaf   : > { %v535_v61 = vsel %vm525_vm3, %v521_v50, 1326507024  ;;  %v534_v5 = vsel %vm522_vm4, %v3893_v59, %v3895_v60  ;;  %v531_v10 = vsel %vm525_vm3, %v518_v58, 920167782 }
  0xb0   : > { %v536_v6 = vsel %vm524_vm5, %v518_v58, %v535_v61  ;;  %v530_v19 = vsel %vm522_vm4, %v3918_v8, %v3893_v59  ;;  %v532_v20 = vsel %vm524_vm5, %v3895_v60, %v531_v10  ;;  %v654_v23 = vadd.s32 1, %v3376_v11  ;;  %v2958_v10 = vld [vmem:[%s6457_s3 + $0x20] sm:$0xff] }
  0xb1   : > { %v537_v7 = vsel %vm523_vm6, %v534_v5, %v536_v6  ;;  %v802_v26 = vshrl.u32 %v801_v15, 23  ;;  %v533_v29 = vsel %vm523_vm6, %v530_v19, %v532_v20  ;;  %2985 = vmatpush.msrb.mxu0 %v2958_v10  ;;  %3438 = vmatpush.msra.mxu1 %v2958_v10 }
  0xb2   : > { %v451_v62 = vpop.f32.mrf.mxu0  ;;  %v542_v14 = vshrl.u32 %v537_v7, 16  ;;  %v541_v21 = vand.u32 65535, %v537_v7  ;;  %vm655_vm7 = vcmp.gt.s32.totalorder %v654_v23, 0  ;;  %v564_v40 = vshrl.u32 %v533_v29, 16 }
  0xb3   : > { %v3924_v12 = vadd.f32 %v3851_v22, %v451_v62  ;;  %v3379_v37 = vadd.s32 4294967169, %v802_v26  ;;  %v563_v45 = vand.u32 65535, %v533_v29  ;;  %v656_v47 = vsel %vm655_vm7, %v654_v23, 0 }
  0xb4   : > { %v3930_v17 = vmul.u32 %v542_v14, %v539_v9  ;;  %v543_v31 = vmul.u32 %v541_v21, %v539_v9  ;;  %v3948_v32 = vmul.u32 %v541_v21, %v540_v27  ;;  %v566_v56 = vmul.u32 %v564_v40, %v539_v9 }
  0xb5   : > { %v955_v24 = vand.u32 2139095040, %v3924_v12  ;;  %v808_v57 = vadd.s32 1, %v3379_v37  ;;  %v546_v58 = vmul.u32 %v542_v14, %v540_v27  ;;  %v3958_v61 = vand.u32 31, %v656_v47 }
  0xb6   : > { %v547_v28 = vshll.u32 %v3930_v17, 16  ;;  %v549_v50 = vshll.u32 %v3948_v32, 16  ;;  %v565_v62 = vmul.u32 %v563_v45, %v539_v9  ;;  %v569_v63 = vshll.u32 %v566_v56, 16 }
  0xb7   : > { %v956_v33 = vshrl.u32 %v955_v24, 23  ;;  %v567_v5 = vmul.u32 %v563_v45, %v540_v27  ;;  %vm809_vm11 = vcmp.gt.s32.totalorder %v808_v57, 0  ;;  %v3966_v13 = vsub.s32 32, %v3958_v61  ;;  %v2957_v45 = vld [vmem:[%s6457_s3 + $0x18] sm:$0xff] }
  0xb8   : > { %vm551_vm8 = vc.u32 %v543_v31, %v547_v28  ;;  %v553_v39 = vadd.s32 %v547_v28, %v543_v31  ;;  %vm573_vm10 = vc.u32 %v565_v62, %v569_v63  ;;  %v568_v14 = vmul.u32 %v564_v40, %v540_v27  ;;  %2986 = vmatpush.msrb.mxu0 %v2957_v45 }
  0xb9   : > { %v3382_v51 = vadd.s32 4294967169, %v956_v33  ;;  %v552_v55 = vsel %vm551_vm8, 1, %v6465_v54  ;;  %v574_v15 = vsel %vm573_vm10, 1, %v6465_v54  ;;  %v571_v20 = vshll.u32 %v567_v5, 16  ;;  %3439 = vmatpush.msra.mxu1 %v2957_v45 }
  0xba   : > { %v454_v16 = vpop.f32.mrf.mxu0  ;;  %vm555_vm9 = vc.u32 %v553_v39, %v549_v50  ;;  %v554_v3 = vadd.s32 %v552_v55, %v546_v58  ;;  %v575_v21 = vadd.s32 %v569_v63, %v565_v62  ;;  %v810_v23 = vsel %vm809_vm11, %v808_v57, 0 }
  0xbb   : > { %v3933_v18 = vadd.f32 %v3851_v22, %v454_v16  ;;  %v962_v6 = vadd.s32 1, %v3382_v51  ;;  %v556_v11 = vsel %vm555_vm9, 1, %v6465_v54  ;;  %v576_v26 = vadd.s32 %v574_v15, %v568_v14 }
  0xbc   : > { %v558_v19 = vadd.s32 %v556_v11, %v554_v3  ;;  %v548_v29 = vshrl.u32 %v3930_v17, 16  ;;  %vm577_vm13 = vc.u32 %v575_v21, %v571_v20  ;;  %v3974_v31 = vshrl.u32 %v656_v47, 5 }
  0xbd   : > { %v1109_v30 = vand.u32 2139095040, %v3933_v18  ;;  %vm963_vm12 = vcmp.gt.s32.totalorder %v962_v6, 0  ;;  %v506_v27 = vshrl.u32 %v6467_v2, %v3867_v36  ;;  %v527_v33 = vsel %vm525_vm3, %v3895_v60, 2102212464 }
  0xbe   : > { %v578_v35 = vsel %vm577_vm13, 1, %v6465_v54  ;;  %v3982_v37 = vand.u32 31, %v810_v23  ;;  %v964_v39 = vsel %vm963_vm12, %v962_v6, 0  ;;  %v559_v40 = vadd.s32 %v558_v19, %v548_v29  ;;  %v2956_v29 = vld [vmem:[%s6457_s3 + $0x10] sm:$0xff] }
  0xbf   : > { %v1110_v49 = vshrl.u32 %v1109_v30, 23  ;;  %v6464_v30 = vand.u32 2147483647, %v3875_v43  ;;  %v671_v17 = vshrl.u32 %v6476_v41, %v3966_v13  ;;  %v526_v36 = vsel %vm522_vm4, %v506_v27, %v3918_v8  ;;  %2987 = vmatpush.msrb.mxu0 %v2956_v29  ;;  %3440 = vmatpush.msra.mxu1 %v2956_v29 }
  0xc0   : > { %v580_v60 = vadd.s32 %v578_v35, %v576_v26  ;;  %v670_v47 = vshll.u32 %v6482_v48, %v3958_v61  ;;  %v550_v50 = vshrl.u32 %v3948_v32, 16  ;;  %v570_v51 = vshrl.u32 %v566_v56, 16 }
  0xc1   : > { %v3385_v1 = vadd.s32 4294967169, %v1110_v49  ;;  %v674_v55 = vshrl.u32 %v6470_v38, %v3966_v13  ;;  %v3998_v57 = vand.u32 31, %v964_v39  ;;  %v528_v8 = vsel %vm524_vm5, %v3893_v59, %v527_v33 }
  0xc2   : > { %v457_v42 = vpop.f32.mrf.mxu0  ;;  %v4004_v63 = vsub.s32 32, %v3982_v37  ;;  %v572_v3 = vshrl.u32 %v567_v5, 16  ;;  %v581_v32 = vadd.s32 %v580_v60, %v570_v51  ;;  %v4008_v56 = vor.u32 %v671_v17, %v670_v47 }
  0xc3   : > { %v3955_v52 = vadd.f32 %v3851_v22, %v457_v42  ;;  %v1116_v16 = vadd.s32 1, %v3385_v1  ;;  %v4006_v1 = vadd.s32 %v559_v40, %v550_v50  ;;  %v673_v6 = vshll.u32 %v6476_v41, %v3958_v61 }
  0xc4   : > { %v4014_v10 = vand.u32 8388607, %v6464_v30  ;;  %v582_v14 = vadd.s32 %v581_v32, %v572_v3  ;;  %vm679_vm15 = vcmp.lt.s32.totalorder %v3974_v31, 4  ;;  %v4022_v5 = vsub.s32 32, %v3998_v57  ;;  %v2954_v3 = vld [vmem:[%s6457_s3] sm:$0xff] }
  0xc5   : > { %6568 = vst [vmem:[#allocation8_spill] sm:$0xff] %v3955_v52  ;;  %v1263_v7 = vand.u32 2139095040, %v3955_v52  ;;  %vm1117_vm14 = vcmp.gt.s32.totalorder %v1116_v16, 0  ;;  %v675_v15 = vor.u32 %v674_v55, %v673_v6  ;;  %v825_v19 = vshrl.u32 %v6476_v41, %v4004_v63 }
  0xc6   : > { %v1118_v58 = vsel %vm1117_vm14, %v1116_v16, 0  ;;  %v529_v16 = vsel %vm523_vm6, %v526_v36, %v528_v8  ;;  %v4038_v26 = vshrl.u32 %v810_v23, 5  ;;  %v828_v44 = vshrl.u32 %v6470_v38, %v4004_v63  ;;  %v2955_v36 = vld [vmem:[%s6457_s3 + $0x8] sm:$0xff] }
  0xc7   : > { %v1264_v24 = vshrl.u32 %v1263_v7, 23  ;;  %v4016_v11 = vand.u32 31, %v1118_v58  ;;  %v824_v27 = vshll.u32 %v6482_v48, %v3982_v37  ;;  %v583_v40 = vmul.u32 %v3901_v0, %v529_v16  ;;  %2988 = vmatpush.msrb.mxu0 %v2955_v36  ;;  %3441 = vmatpush.msra.mxu1 %v2955_v36 }
  0xc8   : > { %v827_v23 = vshll.u32 %v6476_v41, %v3982_v37  ;;  %v979_v17 = vshrl.u32 %v6476_v41, %v4022_v5  ;;  %v4066_v55 = vshrl.u32 %v964_v39, 5  ;;  %v981_v8 = vshll.u32 %v6476_v41, %v3998_v57 }
  0xc9   : > { %v3388_v42 = vadd.s32 4294967169, %v1264_v24  ;;  %v4048_v33 = vsub.s32 32, %v4016_v11  ;;  %v4063_v0 = vor.u32 %v825_v19, %v824_v27  ;;  %2989 = vmatpush.msrb.mxu0 %v2954_v3  ;;  %3442 = vmatpush.msra.mxu1 %v2954_v3  ;;  %vm833_vm2 = vcmp.lt.s32.totalorder %v4038_v26, 4 }
  0xca   : > { %v460_v9 = vpop.f32.mrf.mxu0  ;;  %v829_v51 = vor.u32 %v828_v44, %v827_v23  ;;  %v1132_v44 = vshll.u32 %v6482_v48, %v4016_v11  ;;  %vm987_vm3 = vcmp.lt.s32.totalorder %v4066_v55, 4  ;;  %v668_v34 = vshrl.u32 %v6482_v48, %v3966_v13 }
  0xcb   : > { %v3970_v28 = vadd.f32 %v3851_v22, %v460_v9  ;;  %v1270_v7 = vadd.s32 1, %v3388_v42  ;;  %v4018_v9 = vadd.s32 %v575_v21, %v571_v20  ;;  %v586_v20 = vadd.s32 1, %v582_v14 }
  0xcc   : > { %v4036_v21 = vsel %vm679_vm15, %v4008_v56, 920167782  ;;  %v982_v42 = vshrl.u32 %v6470_v38, %v4022_v5  ;;  %v1133_v32 = vshrl.u32 %v6476_v41, %v4048_v33  ;;  %v4096_v27 = vsel %vm833_vm2, %v4063_v0, 920167782 }
  0xcd   : > { %6569 = vst [vmem:[#allocation9_spill] sm:$0xff] %v3970_v28  ;;  %v1417_v49 = vand.u32 2139095040, %v3970_v28  ;;  %vm585_vm0 = vc.u32 %v4006_v1, %v4018_v9  ;;  %vm1271_vm1 = vcmp.gt.s32.totalorder %v1270_v7, 0  ;;  %vm676_vm9 = vcmp.lt.s32.totalorder %v3974_v31, 1 }
  0xce   : > { %v587_v60 = vsel %vm585_vm0, %v586_v20, %v582_v14  ;;  %v1272_v47 = vsel %vm1271_vm1, %v1270_v7, 0  ;;  %v983_v16 = vor.u32 %v982_v42, %v981_v8  ;;  %v4089_v20 = vshrl.u32 %v1118_v58, 5 }
  0xcf   : > { %v1418_v59 = vshrl.u32 %v1417_v49, 23  ;;  %v588_v50 = vadd.s32 %v587_v60, %v583_v40  ;;  %v4086_v19 = vand.u32 31, %v1272_v47  ;;  %v4107_v58 = vor.u32 %v1133_v32, %v1132_v44 }
  0xd0   : > { %v4117_v42 = vsel %vm987_vm3, %v983_v16, 1326507024  ;;  %vm1141_vm5 = vcmp.lt.s32.totalorder %v4089_v20, 4  ;;  %v660_v32 = vshrl.u32 %v6467_v2, %v3966_v13  ;;  %v4141_v54 = vshrl.u32 %v1272_v47, 5 }
  0xd1   : > { %v3391_v35 = vadd.s32 4294967169, %v1418_v59  ;;  %v589_v39 = vadd.s32 536870912, %v588_v50  ;;  %v4082_v59 = vsel %vm679_vm15, %v675_v15, 1326507024  ;;  %6572 = vst [vmem:[#allocation12_spill] sm:$0xff] %v4086_v19  ;;  %v4122_v36 = vsub.s32 32, %v4086_v19 }
  0xd2   : > { %v463_v62 = vpop.f32.mrf.mxu0  ;;  %v4100_v15 = vsel %vm833_vm2, %v829_v51, 1326507024  ;;  %6573 = vst [vmem:[#allocation13_spill] sm:$0xff] %v4107_v58  ;;  %v4134_v16 = vsel %vm1141_vm5, %v4107_v58, 920167782  ;;  %v1289_v47 = vshll.u32 %v6476_v41, %v4086_v19  ;;  %vm1295_vm8 = vcmp.lt.s32.totalorder %v4141_v54, 4 }
  0xd3   : > { %v4029_v24 = vadd.f32 %v3851_v22, %v463_v62  ;;  %v978_v62 = vshll.u32 %v6482_v48, %v3998_v57  ;;  %v1424_v6 = vadd.s32 1, %v3391_v35  ;;  %v1136_v35 = vshrl.u32 %v6470_v38, %v4048_v33  ;;  %6574 = vst [vmem:[#allocation14_spill] sm:$0xff] %v4122_v36 }
  0xd4   : > { %v4104_v40 = vshrl.u32 %v589_v39, 30  ;;  %v661_v39 = vshll.u32 %v6467_v2, %v3958_v61  ;;  %6576 = vst [vmem:[#allocation16_spill] sm:$0xff] %v4141_v54  ;;  %v1286_v2 = vshll.u32 %v6482_v48, %v4086_v19  ;;  %v667_v19 = vshll.u32 %v6486_v46, %v3958_v61 }
  0xd5   : > { %6570 = vst [vmem:[#allocation10_spill] sm:$0xff] %v4029_v24  ;;  %v1571_v49 = vand.u32 2139095040, %v4029_v24  ;;  %v4084_v14 = vor.u32 %v979_v17, %v978_v62  ;;  %vm1425_vm4 = vcmp.gt.s32.totalorder %v1424_v6, 0  ;;  %vm678_vm10 = vcmp.lt.s32.totalorder %v3974_v31, 3 }
  0xd6   : > { %v591_v51 = vshll.u32 %v4104_v40, 30  ;;  %v1426_v3 = vsel %vm1425_vm4, %v1424_v6, 0  ;;  %v1287_v6 = vshrl.u32 %v6476_v41, %v4122_v36  ;;  %vm492_vm14 = vcmp.lt.s32.totalorder %v3857_v25, 0 }
  0xd7   : > { %v1572_v29 = vshrl.u32 %v1571_v49, 23  ;;  %v4113_v17 = vsel %vm987_vm3, %v4084_v14, 920167782  ;;  %vm677_vm0 = vcmp.lt.s32.totalorder %v3974_v31, 2 }
  0xd8   : > { %v4139_v30 = vsub.s32 %v588_v50, %v591_v51  ;;  %v665_v51 = vshrl.u32 %v6486_v46, %v3966_v13  ;;  %v4168_v24 = vor.u32 %v1287_v6, %v1286_v2  ;;  %v669_v2 = vor.u32 %v668_v34, %v667_v19 }
  0xd9   : > { %v3394_v49 = vadd.s32 4294967169, %v1572_v29  ;;  %v4179_v6 = vshrl.u32 %v1426_v3, 5  ;;  %v6586_v19 = vmov 1326507024  }
  0xda   : > { %v466_v45 = vpop.f32.mrf.mxu0  ;;  %vm593_vm6 = vcmp.lt.s32.totalorder %v4139_v30, 0  ;;  %v594_v50 = vsub.s32 0, %v4139_v30  ;;  %6579 = vst [vmem:[#allocation19_spill] sm:$0xff] %v4168_v24 }
  0xdb   : > { %v4078_v7 = vadd.f32 %v3851_v22, %v466_v45  ;;  %v1135_v45 = vshll.u32 %v6476_v41, %v4016_v11  ;;  %6581 = vst [vmem:[#allocation21_spill] sm:$0xff] %v4179_v6  ;;  %vm1449_vm13 = vcmp.lt.s32.totalorder %v4179_v6, 4 }
  0xdc   : > { %v595_v28 = vsel %vm593_vm6, %v594_v50, %v4139_v30 }
  0xdd   : > { %6571 = vst [vmem:[#allocation11_spill] sm:$0xff] %v4078_v7  ;;  %v1725_v23 = vand.u32 2139095040, %v4078_v7  ;;  %v1137_v8 = vor.u32 %v1136_v35, %v1135_v45  ;;  %v1290_v35 = vshrl.u32 %v6470_v38, %v4122_v36  ;;  %v662_v45 = vshrl.u32 %v6484_v53, %v3966_v13 }
  0xde   : > { %v664_v7 = vshll.u32 %v6484_v53, %v3958_v61  ;;  %v4184_v61 = vsel %vm1295_vm8, %v4168_v24, 920167782 }
  0xdf   : > { %v1726_v44 = vshrl.u32 %v1725_v23, 23  ;;  %v4151_v23 = vand.u32 31, %v1426_v3  ;;  %v4163_v62 = vsel %vm1141_vm5, %v1137_v8, 1326507024  ;;  %v1291_v41 = vor.u32 %v1290_v35, %v1289_v47  ;;  %6582 = vst [vmem:[#allocation22_spill] sm:$0xff] %v4184_v61 }
  0xe0   : > { %6578 = vst [vmem:[#allocation18_spill] sm:$0xff] %v4163_v62  ;;  %v584_v8 = vadd.s32 %v4018_v9, %v4006_v1  ;;  %v663_v48 = vor.u32 %v662_v45, %v661_v39  ;;  %v666_v53 = vor.u32 %v665_v51, %v664_v7  ;;  %v6584_v1 = vmov 2102212464  }
  0xe1   : > { %6577 = vst [vmem:[#allocation17_spill] sm:$0xff] %v4151_v23  ;;  %v3397_v38 = vadd.s32 4294967169, %v1726_v44  ;;  %v4174_v13 = vsub.s32 32, %v4151_v23  ;;  %v596_v44 = vclz %v595_v28  ;;  %v4188_v46 = vsel %vm1295_vm8, %v1291_v41, 1326507024 }
  0xe2   : > { %v469_v60 = vpop.f32.mrf.mxu0  ;;  %6583 = vst [vmem:[#allocation23_spill] sm:$0xff] %v4188_v46  ;;  %v1440_v34 = vshll.u32 %v6584_v1, %v4151_v23  ;;  %v6585_v9 = vmov 920167782   ;;  %v688_v41 = vsel %vm676_vm9, %v666_v53, %v669_v2  ;;  %v690_v39 = vsel %vm678_vm10, %v4008_v56, %v4082_v59 }
  0xe3   : > { %v4137_v29 = vadd.f32 %v3851_v22, %v469_v60  ;;  %v1578_v60 = vadd.s32 1, %v3394_v49  ;;  %6580 = vst [vmem:[#allocation20_spill] sm:$0xff] %v4174_v13  ;;  %v1732_v35 = vadd.s32 1, %v3397_v38  ;;  %v3374_v50 = vadd.s32 4294967294, %v596_v44 }
  0xe4   : > { %v1441_v38 = vshrl.u32 %v6585_v9, %v4174_v13  ;;  %v1443_v7 = vshll.u32 %v6585_v9, %v4151_v23  ;;  %v1444_v3 = vshrl.u32 %v6586_v19, %v4174_v13  ;;  %v680_v44 = vsel %vm676_vm9, %v660_v32, %v663_v48 }
  0xe5   : > { %6575 = vst [vmem:[#allocation15_spill] sm:$0xff] %v4137_v29  ;;  %v1879_v49 = vand.u32 2139095040, %v4137_v29  ;;  %vm1579_vm7 = vcmp.gt.s32.totalorder %v1578_v60, 0  ;;  %vm3375_vm11 = vcmp.lt.s32.totalorder %v3374_v50, 0  ;;  %vm1733_vm12 = vcmp.gt.s32.totalorder %v1732_v35, 0 }
  0xe6   : > { %v1580_v28 = vsel %vm1579_vm7, %v1578_v60, 0  ;;  %v681_v29 = vsel %vm679_vm15, %v669_v2, 2102212464  ;;  %v4215_v13 = vor.u32 %v1441_v38, %v1440_v34  ;;  %v684_v59 = vsel %vm676_vm9, %v663_v48, %v666_v53 }
  0xe7   : > { %v1880_v47 = vshrl.u32 %v1879_v49, 23  ;;  %v4206_v45 = vand.u32 31, %v1580_v28  ;;  %v599_v49 = vsel %vm3375_vm11, 0, %v3374_v50  ;;  %v1734_v50 = vsel %vm1733_vm12, %v1732_v35, 0 }
  0xe8   : > { %6588 = vst [vmem:[#allocation25_spill] sm:$0xff] %v4215_v13  ;;  %v600_v56 = vsub.s32 32, %v599_v49  ;;  %v604_v61 = vsub.s32 4294967266, %v599_v49  ;;  %v6590_v32 = vor.u32 8388608, %v4014_v10  ;;  %v1445_v46 = vor.u32 %v1444_v3, %v1443_v7 }
  0xe9   : > { %6587 = vst [vmem:[#allocation24_spill] sm:$0xff] %v4206_v45  ;;  %v3400_v60 = vadd.s32 4294967169, %v1880_v47  ;;  %v4221_v47 = vsel %vm677_vm0, %v688_v41, %v690_v39  ;;  %v4231_v34 = vsub.s32 32, %v4206_v45  ;;  %v6592_v48 = vand.u32 2147483647, %v3857_v25 }
  0xea   : > { %v472_v51 = vpop.f32.mrf.mxu0  ;;  %v4228_v24 = vshll.u32 %v6590_v32, 8  ;;  %v602_v54 = vshrl.u32 %v584_v8, %v600_v56  ;;  %v601_v35 = vshll.u32 %v4139_v30, %v599_v49  ;;  %v605_v39 = vadd.s32 127, %v604_v61 }
  0xeb   : > { %v4224_v23 = vadd.f32 %v3851_v22, %v472_v51  ;;  %6591 = vst [vmem:[#allocation27_spill] sm:$0xff] %v4231_v34  ;;  %v1886_v38 = vadd.s32 1, %v3400_v60  ;;  %vm4235_vm15 = vcmp.le.f32.partialorder %v6592_v48, 0.7853982  ;;  %v682_v10 = vsel %vm678_vm10, %v666_v53, %v681_v29 }
  0xec   : > { %v6502_v51 = vshrl.u32 %v4221_v47, 16  ;;  %v4246_v7 = vsel %vm1449_vm13, %v4215_v13, 920167782  ;;  %v4248_v8 = vand.u32 31, %v1734_v50  ;;  %v614_v3 = vsub.s32 4, %v4104_v40 }
  0xed   : > { %6589 = vst [vmem:[#allocation26_spill] sm:$0xff] %v4224_v23  ;;  %v686_v60 = vsel %vm678_vm10, %v669_v2, %v4036_v21  ;;  %v2033_v30 = vand.u32 2139095040, %v4224_v23  ;;  %v603_v61 = vor.u32 %v602_v54, %v601_v35  ;;  %v606_v49 = vshll.u32 %v605_v39, 23 }
  0xee   : > { %6595 = vst [vmem:[#allocation28_spill] sm:$0xff] %v4246_v7  ;;  %v4256_v53 = vand.u32 65535, %v4228_v24  ;;  %v4260_v29 = vsel %vm1449_vm13, %v1445_v46, 1326507024  ;;  %v4262_v56 = vshrl.u32 %v1580_v28, 5  ;;  %v1595_v32 = vshrl.u32 %v6585_v9, %v4231_v34 }
  0xef   : > { %6596 = vst [vmem:[#allocation29_spill] sm:$0xff] %v4248_v8  ;;  %vm1887_vm1 = vcmp.gt.s32.totalorder %v1886_v38, 0  ;;  %v1594_v21 = vshll.u32 %v6584_v1, %v4206_v45  ;;  %v1598_v54 = vshrl.u32 %v6586_v19, %v4231_v34  ;;  %v607_v2 = vor.u32 4788187, %v606_v49 }
  0xf0   : > { %6597 = vst [vmem:[#allocation30_spill] sm:$0xff] %v4260_v29  ;;  %v4273_v48 = vmul.u32 %v6502_v51, %v4256_v53  ;;  %v1597_v46 = vshll.u32 %v6585_v9, %v4206_v45  ;;  %v4278_v28 = vsub.s32 32, %v4248_v8  ;;  %v615_v35 = vsel %vm492_vm14, %v614_v3, %v4104_v40 }
  0xf1   : > { %6598 = vst [vmem:[#allocation31_spill] sm:$0xff] %v4262_v56  ;;  %v695_v39 = vand.u32 65535, %v4221_v47  ;;  %v1888_v23 = vsel %vm1887_vm1, %v1886_v38, 0  ;;  %v2034_v34 = vshrl.u32 %v2033_v30, 23  ;;  %v608_v49 = vand.u32 2147483647, %v607_v2 }
  0xf2   : > { %6599 = vst [vmem:[#allocation32_spill] sm:$0xff] %v4278_v28  ;;  %v610_v7 = vcvt.s32.f32 %v603_v61  ;;  %v4284_v13 = vor.u32 %v1595_v32, %v1594_v21  ;;  %vm1603_vm4 = vcmp.lt.s32.totalorder %v4262_v56, 4  ;;  %v4289_v51 = vsel %vm677_vm0, %v680_v44, %v682_v10  ;;  %v475_v31 = vpop.f32.mrf.mxu0 }
  0xf3   : > { %v4293_v45 = vsel %vm677_vm0, %v684_v59, %v686_v60  ;;  %v1599_v29 = vor.u32 %v1598_v54, %v1597_v46  ;;  %v694_v3 = vshrl.u32 %v4228_v24, 16  ;;  %v701_v38 = vshll.u32 %v4273_v48, 16 }
  0xf4   : > { %6600 = vst [vmem:[#allocation33_spill] sm:$0xff] %v4284_v13  ;;  %v611_v40 = vmul.f32 %v610_v7, %v608_v49  ;;  %v1749_v30 = vshrl.u32 %v6585_v9, %v4278_v28  ;;  %v4299_v61 = vand.u32 31, %v1888_v23  ;;  %v617_v32 = vsel %vm4235_vm15, 0, %v615_v35 }
  0xf5   : > { %v697_v44 = vmul.u32 %v695_v39, %v4256_v53  ;;  %v3403_v10 = vadd.s32 4294967169, %v2034_v34  ;;  %v4304_v60 = vmul.u32 %v695_v39, %v694_v3  ;;  %v718_v7 = vshrl.u32 %v4293_v45, 16 }
  0xf6   : > { %v612_v59 = vxor.u32 2147483648, %v611_v40  ;;  %v4310_v21 = vsel %vm1603_vm4, %v4284_v13, 920167782  ;;  %v4312_v54 = vshrl.u32 %v1734_v50, 5  ;;  %v1748_v2 = vshll.u32 %v6584_v1, %v4248_v8 }
  0xf7   : > { %6601 = vst [vmem:[#allocation34_spill] sm:$0xff] %v4310_v21  ;;  %v1752_v46 = vshrl.u32 %v6586_v19, %v4278_v28  ;;  %v4320_v34 = vsel %vm1603_vm4, %v1599_v29, 1326507024  ;;  %v1751_v35 = vshll.u32 %v6585_v9, %v4248_v8  ;;  %vm705_vm6 = vc.u32 %v697_v44, %v701_v38 }
  0xf8   : > { %6602 = vst [vmem:[#allocation35_spill] sm:$0xff] %v4312_v54  ;;  %v707_v39 = vadd.s32 %v701_v38, %v697_v44  ;;  %v4324_v49 = vor.u32 %v1749_v30, %v1748_v2  ;;  %v4327_v50 = vsub.s32 32, %v4299_v61  ;;  %v4330_v21 = vadd.f32 %v3851_v22, %v475_v31 }
  0xf9   : > { %6603 = vst [vmem:[#allocation36_spill] sm:$0xff] %v4320_v34  ;;  %v613_v28 = vsel %vm492_vm14, %v612_v59, %v611_v40  ;;  %v2040_v13 = vadd.s32 1, %v3403_v10  ;;  %v703_v8 = vshll.u32 %v4304_v60, 16  ;;  %v4341_v38 = vmul.u32 %v718_v7, %v4256_v53 }
  0xfa   : > { %6604 = vst [vmem:[#allocation37_spill] sm:$0xff] %v4324_v49  ;;  %v4337_v29 = vsel %vm4235_vm15, %v3857_v25, %v613_v28  ;;  %v1753_v30 = vor.u32 %v1752_v46, %v1751_v35  ;;  %v6606_v31 = vmov 0   ;;  %v717_v34 = vand.u32 65535, %v4293_v45 }
  0xfb   : > { %6605 = vst [vmem:[#allocation38_spill] sm:$0xff] %v4330_v21  ;;  %v618_v44 = vmul.f32 %v4337_v29, %v4337_v29  ;;  %v706_v2 = vsel %vm705_vm6, 1, %v6606_v31  ;;  %vm1757_vm7 = vcmp.lt.s32.totalorder %v4312_v54, 4  ;;  %v4348_v40 = vand.u32 3, %v617_v32 }
  0xfc   : > { %v6607_v41 = vshrl.u32 %v4221_v47, 16  ;;  %vm709_vm9 = vc.u32 %v707_v39, %v703_v8  ;;  %v1903_v10 = vshrl.u32 %v6585_v9, %v4327_v50  ;;  %v2187_v59 = vand.u32 2139095040, %v4330_v21 }
  0xfd   : > { %v619_v46 = vmul.f32 -0.001358992, %v618_v44  ;;  %v626_v35 = vmul.f32 -0.00019511016, %v618_v44  ;;  %v4358_v56 = vsel %vm1757_vm7, %v4324_v49, 920167782  ;;  %v1902_v8 = vshll.u32 %v6584_v1, %v4299_v61 }
  0xfe   : > { %v700_v28 = vmul.u32 %v6607_v41, %v694_v3  ;;  %6608 = vst [vmem:[#allocation39_spill] sm:$0xff] %v4358_v56  ;;  %vm2041_vm10 = vcmp.gt.s32.totalorder %v2040_v13, 0  ;;  %v723_v32 = vshll.u32 %v4341_v38, 16  ;;  %v4363_v47 = vsel %vm1757_vm7, %v1753_v30, 1326507024 }
  0xff   : > { %6609 = vst [vmem:[#allocation40_spill] sm:$0xff] %v4363_v47  ;;  %v710_v39 = vsel %vm709_vm9, 1, %v6606_v31  ;;  %v721_v41 = vmul.u32 %v717_v34, %v694_v3  ;;  %v4368_v21 = vshrl.u32 %v1888_v23, 5  ;;  %v620_v6 = vadd.f32 0.041655596, %v619_v46 }
 0x100   : > { %v708_v45 = vadd.s32 %v706_v2, %v700_v28  ;;  %v627_v36 = vadd.f32 0.008332121, %v626_v35  ;;  %v719_v56 = vmul.u32 %v717_v34, %v4256_v53  ;;  %v4371_v49 = vor.u32 %v1903_v10, %v1902_v8 }
 0x101   : > { %v4375_v2 = vshrl.u32 %v6586_v19, %v4327_v50  ;;  %v2042_v30 = vsel %vm2041_vm10, %v2040_v13, 0  ;;  %v2188_v28 = vshrl.u32 %v2187_v59, 23  ;;  %v621_v47 = vmul.f32 %v620_v6, %v618_v44  ;;  %v478_v6 = vpop.f32.mrf.mxu0 }
 0x102   : > { %6610 = vst [vmem:[#allocation41_spill] sm:$0xff] %v4371_v49  ;;  %v628_v54 = vmul.f32 %v627_v36, %v618_v44  ;;  %v712_v52 = vadd.s32 %v710_v39, %v708_v45  ;;  %vm727_vm11 = vc.u32 %v719_v56, %v723_v32  ;;  %v722_v58 = vmul.u32 %v718_v7, %v694_v3 }
 0x103   : > { %v725_v62 = vshll.u32 %v721_v41, 16  ;;  %v728_v23 = vsel %vm727_vm11, 1, %v6606_v31  ;;  %v729_v46 = vadd.s32 %v723_v32, %v719_v56  ;;  %v4378_v35 = vand.u32 31, %v2042_v30 }
 0x104   : > { %v622_v53 = vadd.f32 -0.4999988, %v621_v47  ;;  %v629_v34 = vadd.f32 -0.16666654, %v628_v54  ;;  %v702_v10 = vshrl.u32 %v4273_v48, 16  ;;  %v4383_v8 = vshll.u32 %v6585_v9, %v4299_v61 }
 0x105   : > { %6611 = vst [vmem:[#allocation42_spill] sm:$0xff] %v4378_v35  ;;  %v3406_v13 = vadd.s32 4294967169, %v2188_v28  ;;  %vm636_vm12 = vcmp.eq.s32.totalorder %v4348_v40, 0  ;;  %vm639_vm14 = vcmp.eq.s32.totalorder %v4348_v40, 2  ;;  %v730_v36 = vadd.s32 %v728_v23, %v722_v58 }
 0x106   : > { %vm731_vm0 = vc.u32 %v729_v46, %v725_v62  ;;  %vm6551_vm15 = vcmp.lt.s32.totalorder %v4368_v21, 4  ;;  %v623_v56 = vmul.f32 %v622_v53, %v618_v44  ;;  %v630_v3 = vmul.f32 %v629_v34, %v618_v44 }
 0x107   : > { %vm635_vm1 = vcmp.lt.s32.totalorder %v4348_v40, 2  ;;  %v713_v7 = vadd.s32 %v712_v52, %v702_v10  ;;  %v1907_v48 = vor.u32 %v4375_v2, %v4383_v8  ;;  %v4394_v54 = vsel %vm6551_vm15, %v4371_v49, 920167782 }
 0x108   : > { %6612 = vst [vmem:[#allocation43_spill] sm:$0xff] %v4394_v54  ;;  %v4396_v59 = vshrl.u32 %v2042_v30, 5  ;;  %vm633_vm6 = vweird.f32 %v3857_v25  ;;  %v732_v58 = vsel %vm731_vm0, 1, %v6606_v31  ;;  %v4401_v45 = vsub.s32 32, %v4378_v35 }
 0x109   : > { %v624_v44 = vadd.f32 1.0, %v623_v56  ;;  %v631_v32 = vadd.f32 1.0, %v630_v3  ;;  %v704_v52 = vshrl.u32 %v4304_v60, 16  ;;  %v2194_v47 = vadd.s32 1, %v3406_v13 }
 0x10a   : > { %6613 = vst [vmem:[#allocation44_spill] sm:$0xff] %v4396_v59  ;;  %v4405_v39 = vadd.f32 %v3851_v22, %v478_v6  ;;  %v724_v28 = vshrl.u32 %v4341_v38, 16  ;;  %v734_v23 = vadd.s32 %v732_v58, %v730_v36  ;;  %v2056_v30 = vshll.u32 %v6584_v1, %v4378_v35 }
 0x10b   : > { %6614 = vst [vmem:[#allocation45_spill] sm:$0xff] %v4401_v45  ;;  %v632_v53 = vmul.f32 %v631_v32, %v4337_v29  ;;  %v640_v34 = vxor.u32 2147483648, %v624_v44  ;;  %v4411_v10 = vadd.s32 %v713_v7, %v704_v52  ;;  %v2059_v56 = vshll.u32 %v6585_v9, %v4378_v35 }
 0x10c   : > { %6615 = vst [vmem:[#allocation46_spill] sm:$0xff] %v4405_v39  ;;  %v726_v3 = vshrl.u32 %v721_v41, 16  ;;  %v735_v60 = vadd.s32 %v734_v23, %v724_v28  ;;  %v6524_v13 = vand.u32 2147483647, %v3907_v4  ;;  %v2057_v22 = vshrl.u32 %v6585_v9, %v4401_v45 }
 0x10d   : > { %v2060_v38 = vshrl.u32 %v6586_v19, %v4401_v45  ;;  %v637_v36 = vxor.u32 2147483648, %v632_v53  ;;  %v4420_v6 = vadd.s32 %v729_v46, %v725_v62  ;;  %vm2195_vm9 = vcmp.gt.s32.totalorder %v2194_v47, 0 }
 0x10e   : > { %v2341_v29 = vand.u32 2139095040, %v4405_v39  ;;  %v736_v7 = vadd.s32 %v735_v60, %v726_v3  ;;  %v805_v58 = vand.u32 8388607, %v6524_v13  ;;  %v641_v32 = vsel %vm639_vm14, %v640_v34, %v632_v53 }
 0x10f   : > { %v638_v41 = vsel %vm636_vm12, %v624_v44, %v637_v36  ;;  %vm739_vm10 = vc.u32 %v4411_v10, %v4420_v6  ;;  %v6616_v52 = vmov 683565275   ;;  %v6617_v3 = vmov 2475754826  }
 0x110   : > { %v815_v62 = vshll.u32 %v6616_v52, %v3982_v37  ;;  %v642_v46 = vsel %vm635_vm1, %v638_v41, %v641_v32  ;;  %v740_v28 = vadd.s32 1, %v736_v7  ;;  %v806_v23 = vor.u32 8388608, %v805_v58 }
 0x111   : > { %v816_v60 = vshrl.u32 %v6617_v3, %v4004_v63  ;;  %v643_v44 = vsel %vm633_vm6, nan, %v642_v46  ;;  %v737_v53 = vmul.u32 %v4228_v24, %v4289_v51  ;;  %v818_v34 = vshll.u32 %v6617_v3, %v3982_v37 }
 0x112   : > { %v6618_v36 = vmov 2131351028   ;;  %2990 = vmatmul.f32.vlgmr.msrb.gmra.mxu0 %v643_v44  ;;  %v741_v40 = vsel %vm739_vm10, %v740_v28, %v736_v7  ;;  %v822_v25 = vshrl.u32 %v6584_v1, %v4004_v63  ;;  %v2196_v32 = vsel %vm2195_vm9, %v2194_v47, 0 }
 0x113   : > { %v819_v13 = vshrl.u32 %v6618_v36, %v4004_v63  ;;  %v4445_v41 = vor.u32 %v816_v60, %v815_v62  ;;  %v821_v58 = vshll.u32 %v6618_v36, %v3982_v37  ;;  %v742_v46 = vadd.s32 %v741_v40, %v737_v53 }
 0x114   : > { %vm832_vm11 = vcmp.lt.s32.totalorder %v4038_v26, 3  ;;  %vm830_vm12 = vcmp.lt.s32.totalorder %v4038_v26, 1  ;;  %v4460_v62 = vshll.u32 %v806_v23, 8  ;;  %v4462_v37 = vor.u32 %v2057_v22, %v2056_v30 }
 0x115   : > { %v4452_v24 = vor.u32 %v819_v13, %v818_v34  ;;  %v823_v51 = vor.u32 %v822_v25, %v821_v58  ;;  %v844_v7 = vsel %vm832_vm11, %v4063_v0, %v4100_v15  ;;  %v2061_v28 = vor.u32 %v2060_v38, %v2059_v56 }
 0x116   : > { %6619 = vst [vmem:[#allocation47_spill] sm:$0xff] %v4462_v37  ;;  %v743_v60 = vadd.s32 536870912, %v742_v46  ;;  %v2342_v13 = vshrl.u32 %v2341_v29, 23  ;;  %vm831_vm14 = vcmp.lt.s32.totalorder %v4038_v26, 2  ;;  %v4475_v15 = vand.u32 31, %v2196_v32 }
 0x117   : > { %v838_v47 = vsel %vm830_vm12, %v4445_v41, %v4452_v24  ;;  %v840_v44 = vsel %vm832_vm11, %v823_v51, %v4096_v27  ;;  %v842_v0 = vsel %vm830_vm12, %v4452_v24, %v823_v51  ;;  %v847_v38 = vand.u32 65535, %v4460_v62 }
 0x118   : > { %6620 = vst [vmem:[#allocation48_spill] sm:$0xff] %v4475_v15  ;;  %v4477_v30 = vshrl.u32 %v743_v60, 30  ;;  %v841_v56 = vsel %vm831_vm14, %v838_v47, %v840_v44  ;;  %v845_v22 = vsel %vm831_vm14, %v842_v0, %v844_v7  ;;  %v848_v29 = vshrl.u32 %v4460_v62, 16 }
 0x119   : > { %v849_v23 = vand.u32 65535, %v845_v22  ;;  %v850_v27 = vshrl.u32 %v845_v22, 16  ;;  %v4490_v53 = vsel %vm6551_vm15, %v1907_v48, 1326507024  ;;  %vm6548_vm0 = vcmp.lt.s32.totalorder %v4396_v59, 4 }
 0x11a   : > { %v745_v34 = vshll.u32 %v4477_v30, 30  ;;  %v872_v40 = vshrl.u32 %v841_v56, 16  ;;  %v4497_v58 = vsel %vm6548_vm0, %v4462_v37, 920167782  ;;  %v871_v60 = vand.u32 65535, %v841_v56 }
 0x11b   : > { %6621 = vst [vmem:[#allocation49_spill] sm:$0xff] %v4497_v58  ;;  %v852_v25 = vmul.u32 %v850_v27, %v847_v38  ;;  %v853_v7 = vmul.u32 %v849_v23, %v848_v29  ;;  %v4501_v2 = vsel %vm6548_vm0, %v2061_v28, 1326507024  ;;  %v4503_v8 = vshrl.u32 %v2196_v32, 5 }
 0x11c   : > { %6622 = vst [vmem:[#allocation50_spill] sm:$0xff] %v4501_v2  ;;  %v3409_v48 = vadd.s32 4294967169, %v2342_v13  ;;  %v746_v47 = vsub.s32 %v742_v46, %v745_v34  ;;  %v4506_v44 = vsub.s32 32, %v4475_v15  ;;  %v851_v0 = vmul.u32 %v849_v23, %v847_v38 }
 0x11d   : > { %6623 = vst [vmem:[#allocation51_spill] sm:$0xff] %v4503_v8  ;;  %v855_v22 = vshll.u32 %v852_v25, 16  ;;  %v874_v39 = vmul.u32 %v872_v40, %v847_v38  ;;  %v4510_v58 = vshll.u32 %v6584_v1, %v4475_v15  ;;  %v738_v56 = vadd.s32 %v4420_v6, %v4411_v10 }
 0x11e   : > { %6624 = vst [vmem:[#allocation52_spill] sm:$0xff] %v4506_v44  ;;  %vm747_vm1 = vcmp.lt.s32.totalorder %v746_v47, 0  ;;  %v748_v28 = vsub.s32 0, %v746_v47  ;;  %v857_v37 = vshll.u32 %v853_v7, 16  ;;  %v875_v13 = vmul.u32 %v871_v60, %v848_v29 }
 0x11f   : > { %vm859_vm6 = vc.u32 %v851_v0, %v855_v22  ;;  %v861_v32 = vadd.s32 %v855_v22, %v851_v0  ;;  %v814_v34 = vshrl.u32 %v6616_v52, %v4004_v63  ;;  %v854_v23 = vmul.u32 %v850_v27, %v848_v29 }
 0x120   : > { %v749_v46 = vsel %vm747_vm1, %v748_v28, %v746_v47  ;;  %v873_v2 = vmul.u32 %v871_v60, %v847_v38  ;;  %v860_v45 = vsel %vm859_vm6, 1, %v6606_v31  ;;  %v877_v35 = vshll.u32 %v874_v39, 16  ;;  %v481_v60 = vpop.f32.mrf.mxu0 }
 0x121   : > { %v750_v59 = vclz %v749_v46  ;;  %vm863_vm9 = vc.u32 %v861_v32, %v857_v37  ;;  %v835_v10 = vsel %vm833_vm2, %v823_v51, 2102212464  ;;  %v862_v6 = vadd.s32 %v860_v45, %v854_v23 }
 0x122   : > { %v864_v54 = vsel %vm863_vm9, 1, %v6606_v31  ;;  %v876_v49 = vmul.u32 %v872_v40, %v848_v29  ;;  %v879_v22 = vshll.u32 %v875_v13, 16  ;;  %vm881_vm10 = vc.u32 %v873_v2, %v877_v35 }
 0x123   : > { %v3377_v0 = vadd.s32 4294967294, %v750_v59  ;;  %v883_v28 = vadd.s32 %v877_v35, %v873_v2  ;;  %v834_v63 = vsel %vm830_vm12, %v814_v34, %v4445_v41  ;;  %v856_v38 = vshrl.u32 %v852_v25, 16 }
 0x124   : > { %v866_v27 = vadd.s32 %v864_v54, %v862_v6  ;;  %v882_v37 = vsel %vm881_vm10, 1, %v6606_v31  ;;  %v836_v45 = vsel %vm832_vm11, %v4452_v24, %v835_v10  ;;  %v858_v59 = vshrl.u32 %v853_v7, 16 }
 0x125   : > { %vm3378_vm1 = vcmp.lt.s32.totalorder %v3377_v0, 0  ;;  %v884_v51 = vadd.s32 %v882_v37, %v876_v49  ;;  %vm885_vm2 = vc.u32 %v883_v28, %v879_v22  ;;  %v878_v41 = vshrl.u32 %v874_v39, 16 }
 0x126   : > { %v753_v29 = vsel %vm3378_vm1, 0, %v3377_v0  ;;  %v867_v40 = vadd.s32 %v866_v27, %v856_v38  ;;  %v886_v35 = vsel %vm885_vm2, 1, %v6606_v31  ;;  %v2348_v54 = vadd.s32 1, %v3409_v48  ;;  %v4537_v0 = vld [vmem:[%s6456_s2] ss:$0 sm:$0xff] }
 0x127   : > { %v754_v2 = vsub.s32 32, %v753_v29  ;;  %v758_v32 = vsub.s32 4294967266, %v753_v29  ;;  %v888_v25 = vadd.s32 %v886_v35, %v884_v51  ;;  %v880_v34 = vshrl.u32 %v875_v13, 16 }
 0x128   : > { %v4528_v46 = vadd.s32 %v867_v40, %v858_v59  ;;  %v4530_v23 = vadd.s32 %v883_v28, %v879_v22  ;;  %v755_v6 = vshll.u32 %v746_v47, %v753_v29  ;;  %v2211_v7 = vshrl.u32 %v6585_v9, %v4506_v44 }
 0x129   : > { %v756_v24 = vshrl.u32 %v738_v56, %v754_v2  ;;  %v759_v49 = vadd.s32 127, %v758_v32  ;;  %v889_v10 = vadd.s32 %v888_v25, %v878_v41  ;;  %v4540_v39 = vadd.f32 %v4537_v0, %v481_v60 }
 0x12a   : > { %v837_v48 = vsel %vm831_vm14, %v834_v63, %v836_v45  ;;  %v6535_v13 = vand.u32 2147483647, %v3924_v12  ;;  %vm893_vm11 = vc.u32 %v4528_v46, %v4530_v23  ;;  %vm646_vm12 = vcmp.lt.s32.totalorder %v3875_v43, 0 }
 0x12b   : > { %6625 = vst [vmem:[#allocation53_spill] sm:$0xff] %v4540_v39  ;;  %v757_v47 = vor.u32 %v756_v24, %v755_v6  ;;  %v760_v56 = vshll.u32 %v759_v49, 23  ;;  %v890_v22 = vadd.s32 %v889_v10, %v880_v34  ;;  %v972_v28 = vshll.u32 %v6617_v3, %v3998_v57 }
 0x12c   : > { %v973_v38 = vshrl.u32 %v6618_v36, %v4022_v5  ;;  %v975_v26 = vshll.u32 %v6618_v36, %v3998_v57  ;;  %v976_v63 = vshrl.u32 %v6584_v1, %v4022_v5  ;;  %v2213_v27 = vshll.u32 %v6585_v9, %v4475_v15 }
 0x12d   : > { %vm2349_vm14 = vcmp.gt.s32.totalorder %v2348_v54, 0  ;;  %v6626_v37 = vand.u32 2147483647, %v3875_v43  ;;  %v761_v51 = vor.u32 4788187, %v760_v56  ;;  %v894_v29 = vadd.s32 1, %v890_v22 }
 0x12e   : > { %v891_v59 = vmul.u32 %v4460_v62, %v837_v48  ;;  %v959_v40 = vand.u32 8388607, %v6535_v13  ;;  %v4567_v35 = vor.u32 %v973_v38, %v972_v28  ;;  %v4569_v60 = vor.u32 %v976_v63, %v975_v26 }
 0x12f   : > { %vm4560_vm6 = vcmp.le.f32.partialorder %v6626_v37, 0.7853982  ;;  %v2214_v2 = vshrl.u32 %v6586_v19, %v4506_v44  ;;  %v762_v32 = vand.u32 2147483647, %v761_v51  ;;  %v764_v41 = vcvt.s32.f32 %v757_v47 }
 0x130   : > { %v895_v25 = vsel %vm893_vm11, %v894_v29, %v890_v22  ;;  %v4577_v34 = vor.u32 %v2211_v7, %v4510_v58  ;;  %v2350_v62 = vsel %vm2349_vm14, %v2348_v54, 0  ;;  %v2495_v6 = vand.u32 2139095040, %v4540_v39 }
 0x131   : > { %v896_v24 = vadd.s32 %v895_v25, %v891_v59  ;;  %v765_v49 = vmul.f32 %v764_v41, %v762_v32  ;;  %v970_v10 = vshrl.u32 %v6617_v3, %v4022_v5  ;;  %vm984_vm9 = vcmp.lt.s32.totalorder %v4066_v55, 1 }
 0x132   : > { %6629 = vst [vmem:[#allocation54_spill] sm:$0xff] %v4577_v34  ;;  %vm986_vm10 = vcmp.lt.s32.totalorder %v4066_v55, 3  ;;  %v960_v47 = vor.u32 8388608, %v959_v40  ;;  %v996_v58 = vsel %vm984_vm9, %v4567_v35, %v4569_v60  ;;  %v2215_v7 = vor.u32 %v2214_v2, %v2213_v27 }
 0x133   : > { %v897_v48 = vadd.s32 536870912, %v896_v24  ;;  %v998_v54 = vsel %vm986_vm10, %v4084_v14, %v4117_v42  ;;  %v4592_v56 = vand.u32 31, %v2350_v62  ;;  %v766_v22 = vxor.u32 2147483648, %v765_v49 }
 0x134   : > { %v969_v28 = vshll.u32 %v6616_v52, %v3998_v57  ;;  %v2496_v38 = vshrl.u32 %v2495_v6, 23  ;;  %v768_v26 = vsub.s32 4, %v4477_v30  ;;  %vm985_vm1 = vcmp.lt.s32.totalorder %v4066_v55, 2 }
 0x135   : > { %6630 = vst [vmem:[#allocation55_spill] sm:$0xff] %v4592_v56  ;;  %v4597_v63 = vshrl.u32 %v897_v48, 30  ;;  %vm6547_vm2 = vcmp.lt.s32.totalorder %v4503_v8, 4  ;;  %v767_v37 = vsel %vm646_vm12, %v766_v22, %v765_v49  ;;  %v999_v42 = vsel %vm985_vm1, %v996_v58, %v998_v54 }
 0x136   : > { %v4603_v14 = vor.u32 %v970_v10, %v969_v28  ;;  %v4607_v27 = vshrl.u32 %v2350_v62, 5  ;;  %v770_v57 = vsel %vm4560_vm6, %v3875_v43, %v767_v37  ;;  %v4613_v29 = vshll.u32 %v960_v47, 8 }
 0x137   : > { %v899_v51 = vshll.u32 %v4597_v63, 30  ;;  %v4618_v59 = vsel %vm6547_vm2, %v4577_v34, 920167782  ;;  %v4622_v40 = vsel %vm6547_vm2, %v2215_v7, 1326507024  ;;  %v4625_v2 = vsub.s32 32, %v4592_v56 }
 0x138   : > { %6631 = vst [vmem:[#allocation56_spill] sm:$0xff] %v4618_v59  ;;  %v772_v32 = vmul.f32 %v770_v57, %v770_v57  ;;  %v3412_v41 = vadd.s32 4294967169, %v2496_v38  ;;  %v769_v25 = vsel %vm646_vm12, %v768_v26, %v4477_v30  ;;  %v1004_v6 = vshrl.u32 %v999_v42, 16 }
 0x139   : > { %6632 = vst [vmem:[#allocation57_spill] sm:$0xff] %v4622_v40  ;;  %v4630_v62 = vsub.s32 %v896_v24, %v899_v51  ;;  %v992_v48 = vsel %vm984_vm9, %v4603_v14, %v4567_v35  ;;  %v994_v47 = vsel %vm986_vm10, %v4569_v60, %v4113_v17  ;;  %v4643_v30 = vand.u32 65535, %v4613_v29 }
 0x13a   : > { %6633 = vst [vmem:[#allocation58_spill] sm:$0xff] %v4625_v2  ;;  %v773_v49 = vmul.f32 -0.001358992, %v772_v32  ;;  %v780_v10 = vmul.f32 -0.00019511016, %v772_v32  ;;  %v1003_v24 = vand.u32 65535, %v999_v42  ;;  %v2364_v54 = vshll.u32 %v6584_v1, %v4592_v56 }
 0x13b   : > { %vm901_vm11 = vcmp.lt.s32.totalorder %v4630_v62, 0  ;;  %v902_v58 = vsub.s32 0, %v4630_v62  ;;  %v2365_v7 = vshrl.u32 %v6585_v9, %v4625_v2  ;;  %v771_v38 = vsel %vm4560_vm6, 0, %v769_v25 }
 0x13c   : > { %v774_v22 = vadd.f32 0.041655596, %v773_v49  ;;  %v781_v28 = vadd.f32 0.008332121, %v780_v10  ;;  %v1002_v26 = vshrl.u32 %v4613_v29, 16  ;;  %v4654_v37 = vmul.u32 %v1004_v6, %v4643_v30 }
 0x13d   : > { %v903_v17 = vsel %vm901_vm11, %v902_v58, %v4630_v62  ;;  %v4658_v42 = vshll.u32 %v6585_v9, %v4592_v56  ;;  %v995_v49 = vsel %vm985_vm1, %v992_v48, %v994_v47  ;;  %v4664_v45 = vshrl.u32 %v6586_v19, %v4625_v2 }
 0x13e   : > { %v775_v51 = vmul.f32 %v774_v22, %v772_v32  ;;  %v782_v13 = vmul.f32 %v781_v28, %v772_v32  ;;  %v4666_v25 = vadd.s32 1, %v3412_v41  ;;  %v904_v10 = vclz %v903_v17 }
 0x13f   : > { %v4668_v58 = vmul.u32 %v1003_v24, %v1002_v26  ;;  %v4670_v39 = vor.u32 %v2365_v7, %v2364_v54  ;;  %v788_v56 = vand.u32 3, %v771_v38  ;;  %v1005_v22 = vmul.u32 %v1003_v24, %v4643_v30 }
 0x140   : > { %v776_v59 = vadd.f32 -0.4999988, %v775_v51  ;;  %v783_v34 = vadd.f32 -0.16666654, %v782_v13  ;;  %v3380_v40 = vadd.s32 4294967294, %v904_v10  ;;  %v1009_v28 = vshll.u32 %v4654_v37, 16 }
 0x141   : > { %v1025_v48 = vand.u32 65535, %v995_v49  ;;  %v1008_v2 = vmul.u32 %v1004_v6, %v1002_v26  ;;  %v1026_v15 = vshrl.u32 %v995_v49, 16  ;;  %v1011_v41 = vshll.u32 %v4668_v58, 16 }
 0x142   : > { %v777_v47 = vmul.f32 %v776_v59, %v772_v32  ;;  %v784_v8 = vmul.f32 %v783_v34, %v772_v32  ;;  %vm3381_vm12 = vcmp.lt.s32.totalorder %v3380_v40, 0  ;;  %vm1013_vm14 = vc.u32 %v1005_v22, %v1009_v28 }
 0x143   : > { %v1015_v17 = vadd.s32 %v1009_v28, %v1005_v22  ;;  %vm2503_vm6 = vcmp.gt.s32.totalorder %v4666_v25, 0  ;;  %v907_v7 = vsel %vm3381_vm12, 0, %v3380_v40  ;;  %v1014_v38 = vsel %vm1013_vm14, 1, %v6606_v31 }
 0x144   : > { %v778_v54 = vadd.f32 1.0, %v777_v47  ;;  %v785_v13 = vadd.f32 1.0, %v784_v8  ;;  %vm2373_vm11 = vcmp.lt.s32.totalorder %v4607_v27, 4  ;;  %v892_v59 = vadd.s32 %v4530_v23, %v4528_v46 }
 0x145   : > { %v908_v34 = vsub.s32 32, %v907_v7  ;;  %v909_v32 = vshll.u32 %v4630_v62, %v907_v7  ;;  %v912_v6 = vsub.s32 4294967266, %v907_v7  ;;  %v1016_v49 = vadd.s32 %v1014_v38, %v1008_v2 }
 0x146   : > { %v786_v24 = vmul.f32 %v785_v13, %v770_v57  ;;  %v794_v51 = vxor.u32 2147483648, %v778_v54  ;;  %vm1017_vm2 = vc.u32 %v1015_v17, %v1011_v41  ;;  %v1028_v40 = vmul.u32 %v1026_v15, %v4643_v30 }
 0x147   : > { %v910_v10 = vshrl.u32 %v892_v59, %v908_v34  ;;  %v913_v22 = vadd.s32 127, %v912_v6  ;;  %v1018_v8 = vsel %vm1017_vm2, 1, %v6606_v31  ;;  %vm789_vm12 = vcmp.lt.s32.totalorder %v788_v56, 2 }
 0x148   : > { %vm790_vm14 = vcmp.eq.s32.totalorder %v788_v56, 0  ;;  %v791_v28 = vxor.u32 2147483648, %v786_v24  ;;  %v1029_v47 = vmul.u32 %v1025_v48, %v1002_v26  ;;  %vm793_vm0 = vcmp.eq.s32.totalorder %v788_v56, 2 }
 0x149   : > { %v911_v46 = vor.u32 %v910_v10, %v909_v32  ;;  %v914_v23 = vshll.u32 %v913_v22, 23  ;;  %v1031_v44 = vshll.u32 %v1028_v40, 16  ;;  %v795_v7 = vsel %vm793_vm0, %v794_v51, %v786_v24 }
 0x14a   : > { %v792_v62 = vsel %vm790_vm14, %v778_v54, %v791_v28  ;;  %v1020_v57 = vadd.s32 %v1018_v8, %v1016_v49  ;;  %v1027_v2 = vmul.u32 %v1025_v48, %v4643_v30  ;;  %vm787_vm15 = vweird.f32 %v3875_v43 }
 0x14b   : > { %v796_v41 = vsel %vm789_vm12, %v792_v62, %v795_v7  ;;  %v915_v17 = vor.u32 4788187, %v914_v23  ;;  %v1010_v13 = vshrl.u32 %v4654_v37, 16  ;;  %v1030_v59 = vmul.u32 %v1026_v15, %v1002_v26 }
 0x14c   : > { %v797_v38 = vsel %vm787_vm15, nan, %v796_v41  ;;  %v1033_v34 = vshll.u32 %v1029_v47, 16  ;;  %vm1035_vm2 = vc.u32 %v1027_v2, %v1031_v44  ;;  %v918_v32 = vcvt.s32.f32 %v911_v46 }
 0x14d   : > { %2993 = vmatmul.f32.vlgmr.msra.gmra.mxu1 %v797_v38  ;;  %v916_v56 = vand.u32 2147483647, %v915_v17  ;;  %v1036_v6 = vsel %vm1035_vm2, 1, %v6606_v31  ;;  %v1037_v54 = vadd.s32 %v1031_v44, %v1027_v2  ;;  %v2369_v24 = vor.u32 %v4664_v45, %v4658_v42 }
 0x14e   : > { %v4692_v43 = vsel %vm2373_vm11, %v4670_v39, 920167782  ;;  %v1021_v30 = vadd.s32 %v1020_v57, %v1010_v13  ;;  %v1038_v37 = vadd.s32 %v1036_v6, %v1030_v59  ;;  %v2504_v15 = vsel %vm2503_vm6, %v4666_v25, 0 }
 0x14f   : > { %v919_v26 = vmul.f32 %v918_v32, %v916_v56  ;;  %v989_v48 = vsel %vm987_vm3, %v4569_v60, 2102212464  ;;  %vm1039_vm15 = vc.u32 %v1037_v54, %v1033_v34  ;;  %vm800_vm0 = vcmp.lt.s32.totalorder %v3907_v4, 0 }
 0x150   : > { %v968_v44 = vshrl.u32 %v6616_v52, %v4022_v5  ;;  %v1012_v42 = vshrl.u32 %v4668_v58, 16  ;;  %v1040_v45 = vsel %vm1039_vm15, 1, %v6606_v31  ;;  %v6634_v51 = vand.u32 2147483647, %v3907_v4 }
 0x151   : > { %v920_v25 = vxor.u32 2147483648, %v919_v26  ;;  %v1032_v10 = vshrl.u32 %v1028_v40, 16  ;;  %v1042_v22 = vadd.s32 %v1040_v45, %v1038_v37  ;;  %v922_v60 = vsub.s32 4, %v4597_v63 }
 0x152   : > { %vm4707_vm12 = vcmp.le.f32.partialorder %v6634_v51, 0.7853982  ;;  %v988_v8 = vsel %vm984_vm9, %v968_v44, %v4603_v14  ;;  %v990_v5 = vsel %vm986_vm10, %v4567_v35, %v989_v48  ;;  %v4718_v58 = vadd.s32 %v1021_v30, %v1012_v42 }
 0x153   : > { %v921_v28 = vsel %vm800_vm0, %v920_v25, %v919_v26  ;;  %v1034_v46 = vshrl.u32 %v1029_v47, 16  ;;  %v1043_v23 = vadd.s32 %v1042_v22, %v1032_v10  ;;  %v1106_v40 = vand.u32 2147483647, %v3933_v18 }
 0x154   : > { %v4725_v62 = vsel %vm2373_vm11, %v2369_v24, 1326507024  ;;  %v4727_v7 = vshrl.u32 %v2504_v15, 5  ;;  %v4729_v14 = vand.u32 31, %v2504_v15  ;;  %v924_v35 = vsel %vm4707_vm12, %v3907_v4, %v921_v28 }
 0x155   : > { %v926_v57 = vmul.f32 %v924_v35, %v924_v35  ;;  %v991_v2 = vsel %vm985_vm1, %v988_v8, %v990_v5  ;;  %v4736_v47 = vadd.s32 %v1037_v54, %v1033_v34  ;;  %v1044_v41 = vadd.s32 %v1043_v23, %v1034_v46 }
 0x156   : > { %6637 = vst [vmem:[#allocation59_spill] sm:$0xff] %v4727_v7  ;;  %v923_v17 = vsel %vm800_vm0, %v922_v60, %v4597_v63  ;;  %v1124_v13 = vshrl.u32 %v6617_v3, %v4048_v33  ;;  %v1127_v38 = vshrl.u32 %v6618_v36, %v4048_v33  ;;  %v1130_v59 = vshrl.u32 %v6584_v1, %v4048_v33 }
 0x157   : > { %v927_v56 = vmul.f32 -0.001358992, %v926_v57  ;;  %v934_v32 = vmul.f32 -0.00019511016, %v926_v57  ;;  %vm1047_vm3 = vc.u32 %v4718_v58, %v4736_v47  ;;  %v1113_v55 = vand.u32 8388607, %v1106_v40 }
 0x158   : > { %v1048_v34 = vadd.s32 1, %v1044_v41  ;;  %v1123_v63 = vshll.u32 %v6616_v52, %v4016_v11  ;;  %v1126_v6 = vshll.u32 %v6617_v3, %v4016_v11  ;;  %v1129_v54 = vshll.u32 %v6618_v36, %v4016_v11 }
 0x159   : > { %v925_v24 = vsel %vm4707_vm12, 0, %v923_v17  ;;  %v928_v30 = vadd.f32 0.041655596, %v927_v56  ;;  %v935_v37 = vadd.f32 0.008332121, %v934_v32  ;;  %v1045_v15 = vmul.u32 %v4613_v29, %v991_v2  ;;  %v484_v17 = vpop.f32.mrf.mxu0  ;;  %v6639_v56 = vld [vmem:[#allocation13_spill] sm:$0xff] }
 0x15a   : > { %v1049_v26 = vsel %vm1047_vm3, %v1048_v34, %v1044_v41  ;;  %v4760_v48 = vor.u32 %v1124_v13, %v1123_v63  ;;  %v4762_v44 = vor.u32 %v1127_v38, %v1126_v6  ;;  %v1131_v42 = vor.u32 %v1130_v59, %v1129_v54 }
 0x15b   : > { %v4765_v45 = vsub.s32 32, %v4729_v14  ;;  %v4769_v51 = vshll.u32 %v6584_v1, %v4729_v14  ;;  %v929_v11 = vmul.f32 %v928_v30, %v926_v57  ;;  %v936_v49 = vmul.f32 %v935_v37, %v926_v57 }
 0x15c   : > { %v4773_v25 = vshll.u32 %v6585_v9, %v4729_v14  ;;  %v942_v29 = vand.u32 3, %v925_v24  ;;  %v1050_v10 = vadd.s32 %v1049_v26, %v1045_v15  ;;  %v1114_v22 = vor.u32 8388608, %v1113_v55 }
 0x15d   : > { %v930_v60 = vadd.f32 -0.4999988, %v929_v11  ;;  %v937_v8 = vadd.f32 -0.16666654, %v936_v49  ;;  %vm1138_vm9 = vcmp.lt.s32.totalorder %v4089_v20, 1  ;;  %vm1140_vm10 = vcmp.lt.s32.totalorder %v4089_v20, 3 }
 0x15e   : > { %v1051_v5 = vadd.s32 536870912, %v1050_v10  ;;  %v1146_v28 = vsel %vm1138_vm9, %v4760_v48, %v4762_v44  ;;  %v1148_v46 = vsel %vm1140_vm10, %v1131_v42, %v4134_v16  ;;  %v1150_v23 = vsel %vm1138_vm9, %v4762_v44, %v1131_v42  ;;  %v6638_v16 = vld [vmem:[#allocation18_spill] sm:$0xff] }
 0x15f   : > { %v4789_v2 = vshrl.u32 %v6585_v9, %v4765_v45  ;;  %v4793_v41 = vshrl.u32 %v6586_v19, %v4765_v45  ;;  %v931_v13 = vmul.f32 %v930_v60, %v926_v57  ;;  %v938_v38 = vmul.f32 %v937_v8, %v926_v57 }
 0x160   : > { %v4795_v59 = vshrl.u32 %v1051_v5, 30  ;;  %vm1139_vm1 = vcmp.lt.s32.totalorder %v4089_v20, 2  ;;  %v1152_v32 = vsel %vm1140_vm10, %v6639_v56, %v6638_v16  ;;  %v4802_v55 = vshll.u32 %v1114_v22, 8 }
 0x161   : > { %v932_v34 = vadd.f32 1.0, %v931_v13  ;;  %v939_v63 = vadd.f32 1.0, %v938_v38  ;;  %v1149_v6 = vsel %vm1139_vm1, %v1146_v28, %v1148_v46  ;;  %v1153_v54 = vsel %vm1139_vm1, %v1150_v23, %v1152_v32 }
 0x162   : > { %v4809_v57 = vadd.f32 %v4537_v0, %v484_v17  ;;  %vm941_vm6 = vweird.f32 %v3907_v4  ;;  %vm943_vm14 = vcmp.lt.s32.totalorder %v942_v29, 2  ;;  %v1053_v24 = vshll.u32 %v4795_v59, 30 }
 0x163   : > { %v940_v30 = vmul.f32 %v939_v63, %v924_v35  ;;  %v948_v37 = vxor.u32 2147483648, %v932_v34  ;;  %v1157_v15 = vand.u32 65535, %v1153_v54  ;;  %v1158_v26 = vshrl.u32 %v1153_v54, 16 }
 0x164   : > { %6640 = vst [vmem:[#allocation18_spill] sm:$0xff] %v4809_v57  ;;  %vm944_vm2 = vcmp.eq.s32.totalorder %v942_v29, 0  ;;  %v1054_v11 = vsub.s32 %v1050_v10, %v1053_v24  ;;  %v1155_v49 = vand.u32 65535, %v4802_v55  ;;  %v1180_v22 = vshrl.u32 %v1149_v6, 16 }
 0x165   : > { %v945_v60 = vxor.u32 2147483648, %v940_v30  ;;  %vm947_vm15 = vcmp.eq.s32.totalorder %v942_v29, 2  ;;  %v1046_v0 = vadd.s32 %v4736_v47, %v4718_v58  ;;  %v1156_v8 = vshrl.u32 %v4802_v55, 16 }
 0x166   : > { %vm1055_vm0 = vcmp.lt.s32.totalorder %v1054_v11, 0  ;;  %v1056_v5 = vsub.s32 0, %v1054_v11  ;;  %v1160_v28 = vmul.u32 %v1158_v26, %v1155_v49  ;;  %v1179_v46 = vand.u32 65535, %v1149_v6 }
 0x167   : > { %v946_v35 = vsel %vm944_vm2, %v932_v34, %v945_v60  ;;  %v949_v23 = vsel %vm947_vm15, %v948_v37, %v940_v30  ;;  %v1143_v17 = vsel %vm1141_vm5, %v1131_v42, 2102212464  ;;  %v1161_v10 = vmul.u32 %v1157_v15, %v1156_v8 }
 0x168   : > { %v950_v13 = vsel %vm943_vm14, %v946_v35, %v949_v23  ;;  %v1057_v38 = vsel %vm1055_vm0, %v1056_v5, %v1054_v11  ;;  %v1122_v16 = vshrl.u32 %v6616_v52, %v4048_v33  ;;  %v1182_v56 = vmul.u32 %v1180_v22, %v1155_v49 }
 0x169   : > { %v951_v58 = vsel %vm941_vm6, nan, %v950_v13  ;;  %v1058_v47 = vclz %v1057_v38  ;;  %v1159_v32 = vmul.u32 %v1157_v15, %v1155_v49  ;;  %v1163_v63 = vshll.u32 %v1160_v28, 16 }
 0x16a   : > { %2996 = vmatmul.f32.gmra.mxu1 %v951_v58  ;;  %v1142_v34 = vsel %vm1138_vm9, %v1122_v16, %v4760_v48  ;;  %v1144_v42 = vsel %vm1140_vm10, %v4762_v44, %v1143_v17  ;;  %v1162_v29 = vmul.u32 %v1158_v26, %v1156_v8  ;;  %v1183_v6 = vmul.u32 %v1179_v46, %v1156_v8 }
 0x16b   : > { %v3383_v54 = vadd.s32 4294967294, %v1058_v47  ;;  %v1165_v33 = vshll.u32 %v1161_v10, 16  ;;  %vm1167_vm5 = vc.u32 %v1159_v32, %v1163_v63  ;;  %v1169_v24 = vadd.s32 %v1163_v63, %v1159_v32 }
 0x16c   : > { %v1164_v4 = vshrl.u32 %v1160_v28, 16  ;;  %v1168_v30 = vsel %vm1167_vm5, 1, %v6606_v31  ;;  %v1181_v37 = vmul.u32 %v1179_v46, %v1155_v49  ;;  %v1185_v15 = vshll.u32 %v1182_v56, 16 }
 0x16d   : > { %vm3384_vm12 = vcmp.lt.s32.totalorder %v3383_v54, 0  ;;  %v1170_v60 = vadd.s32 %v1168_v30, %v1162_v29  ;;  %vm1171_vm3 = vc.u32 %v1169_v24, %v1165_v33  ;;  %v1187_v5 = vshll.u32 %v1183_v6, 16  ;;  %v6641_v29 = vld [vmem:[#allocation8_spill] sm:$0xff] }
 0x16e   : > { %v1061_v48 = vsel %vm3384_vm12, 0, %v3383_v54  ;;  %v1172_v35 = vsel %vm1171_vm3, 1, %v6606_v31  ;;  %vm1189_vm9 = vc.u32 %v1181_v37, %v1185_v15  ;;  %v1191_v44 = vadd.s32 %v1185_v15, %v1181_v37 }
 0x16f   : > { %v1062_v26 = vsub.s32 32, %v1061_v48  ;;  %v1066_v23 = vsub.s32 4294967266, %v1061_v48  ;;  %v1174_v17 = vadd.s32 %v1172_v35, %v1170_v60  ;;  %v1184_v13 = vmul.u32 %v1180_v22, %v1156_v8 }
 0x170   : > { %v1063_v38 = vshll.u32 %v1054_v11, %v1061_v48  ;;  %v1076_v28 = vsub.s32 4, %v4795_v59  ;;  %v1190_v16 = vsel %vm1189_vm9, 1, %v6606_v31  ;;  %vm1193_vm10 = vc.u32 %v1191_v44, %v1187_v5 }
 0x171   : > { %v1064_v49 = vshrl.u32 %v1046_v0, %v1062_v26  ;;  %v1067_v46 = vadd.s32 127, %v1066_v23  ;;  %v1175_v58 = vadd.s32 %v1174_v17, %v1164_v4  ;;  %v1192_v47 = vadd.s32 %v1190_v16, %v1184_v13  ;;  %v6645_v17 = vld [vmem:[#allocation14_spill] sm:$0xff]  ;;  %v6646_v13 = vld [vmem:[#allocation12_spill] sm:$0xff] }
 0x172   : > { %vm954_vm6 = vcmp.lt.s32.totalorder %v3924_v12, 0  ;;  %v1166_v32 = vshrl.u32 %v1161_v10, 16  ;;  %v1194_v63 = vsel %vm1193_vm10, 1, %v6606_v31  ;;  %v6552_v54 = vand.u32 2147483647, %v6641_v29 }
 0x173   : > { %v1065_v33 = vor.u32 %v1064_v49, %v1063_v38  ;;  %v1068_v24 = vshll.u32 %v1067_v46, 23  ;;  %v1186_v22 = vshrl.u32 %v1182_v56, 16  ;;  %v1196_v11 = vadd.s32 %v1194_v63, %v1192_v47  ;;  %v6647_v46 = vld [vmem:[#allocation16_spill] sm:$0xff]  ;;  %v6648_v63 = vld [vmem:[#allocation23_spill] sm:$0xff] }
 0x174   : > { %v2649_v8 = vand.u32 2139095040, %v4809_v57  ;;  %v6642_v30 = vand.u32 2147483647, %v3924_v12  ;;  %v1145_v4 = vsel %vm1139_vm1, %v1142_v34, %v1144_v42  ;;  %v4846_v10 = vadd.s32 %v1175_v58, %v1166_v32 }
 0x175   : > { %v1267_v37 = vand.u32 8388607, %v6552_v54  ;;  %v1069_v15 = vor.u32 4788187, %v1068_v24  ;;  %v1077_v56 = vsel %vm954_vm6, %v1076_v28, %v4795_v59  ;;  %v1188_v60 = vshrl.u32 %v1183_v6, 16 }
 0x176   : > { %vm4840_vm14 = vcmp.le.f32.partialorder %v6642_v30, 0.7853982  ;;  %v1197_v48 = vadd.s32 %v1196_v11, %v1186_v22  ;;  %v1072_v35 = vcvt.s32.f32 %v1065_v33  ;;  %v4853_v26 = vadd.s32 %v1191_v44, %v1187_v5  ;;  %v6649_v33 = vld [vmem:[#allocation19_spill] sm:$0xff] }
 0x177   : > { %v1268_v23 = vor.u32 8388608, %v1267_v37  ;;  %v1278_v20 = vshrl.u32 %v6617_v3, %v6645_v17  ;;  %v1070_v34 = vand.u32 2147483647, %v1069_v15  ;;  %v1280_v38 = vshll.u32 %v6617_v3, %v6646_v13 }
 0x178   : > { %v1198_v42 = vadd.s32 %v1197_v48, %v1188_v60  ;;  %v1281_v16 = vshrl.u32 %v6618_v36, %v6645_v17  ;;  %vm1201_vm1 = vc.u32 %v4846_v10, %v4853_v26  ;;  %v1277_v59 = vshll.u32 %v6616_v52, %v6646_v13 }
 0x179   : > { %v1283_v6 = vshll.u32 %v6618_v36, %v6646_v13  ;;  %v1284_v5 = vshrl.u32 %v6584_v1, %v6645_v17  ;;  %v1073_v44 = vmul.f32 %v1072_v35, %v1070_v34  ;;  %vm1294_vm2 = vcmp.lt.s32.totalorder %v6647_v46, 3 }
 0x17a   : > { %v1202_v28 = vadd.s32 1, %v1198_v42  ;;  %v4869_v49 = vor.u32 %v1281_v16, %v1280_v38  ;;  %v1199_v58 = vmul.u32 %v4802_v55, %v1145_v4  ;;  %v1279_v47 = vor.u32 %v1278_v20, %v1277_v59 }
 0x17b   : > { %v1285_v32 = vor.u32 %v1284_v5, %v1283_v6  ;;  %v1306_v24 = vsel %vm1294_vm2, %v6649_v33, %v6648_v63  ;;  %v1074_v22 = vxor.u32 2147483648, %v1073_v44  ;;  %vm1292_vm15 = vcmp.lt.s32.totalorder %v6647_v46, 1 }
 0x17c   : > { %v1203_v11 = vsel %vm1201_vm1, %v1202_v28, %v1198_v42  ;;  %v4878_v30 = vshll.u32 %v1268_v23, 8  ;;  %v2650_v37 = vshrl.u32 %v2649_v8, 23  ;;  %vm1293_vm0 = vcmp.lt.s32.totalorder %v6647_v46, 2 }
 0x17d   : > { %v1204_v15 = vadd.s32 %v1203_v11, %v1199_v58  ;;  %v1304_v55 = vsel %vm1292_vm15, %v4869_v49, %v1285_v32  ;;  %v4886_v4 = vor.u32 %v4789_v2, %v4769_v51  ;;  %v1075_v60 = vsel %vm954_vm6, %v1074_v22, %v1073_v44  ;;  %v6651_v2 = vld [vmem:[#allocation22_spill] sm:$0xff] }
 0x17e   : > { %v1079_v48 = vsel %vm4840_vm14, 0, %v1077_v56  ;;  %v1307_v8 = vsel %vm1293_vm0, %v1304_v55, %v1306_v24  ;;  %v4897_v35 = vsel %vm4840_vm14, %v3924_v12, %v1075_v60  ;;  %v1300_v51 = vsel %vm1292_vm15, %v1279_v47, %v4869_v49 }
 0x17f   : > { %6650 = vst [vmem:[#allocation13_spill] sm:$0xff] %v4886_v4  ;;  %v1205_v23 = vadd.s32 536870912, %v1204_v15  ;;  %v1302_v20 = vsel %vm1294_vm2, %v1285_v32, %v6651_v2  ;;  %v1080_v56 = vmul.f32 %v4897_v35, %v4897_v35  ;;  %v1309_v34 = vand.u32 65535, %v4878_v30 }
 0x180   : > { %v1311_v42 = vand.u32 65535, %v1307_v8  ;;  %v1312_v13 = vshrl.u32 %v1307_v8, 16  ;;  %v4910_v38 = vadd.s32 4294967169, %v2650_v37  ;;  %v4915_v59 = vshrl.u32 %v4878_v30, 16 }
 0x181   : > { %v4912_v16 = vshrl.u32 %v1205_v23, 30  ;;  %v1081_v6 = vmul.f32 -0.001358992, %v1080_v56  ;;  %v1088_v5 = vmul.f32 -0.00019511016, %v1080_v56  ;;  %v1303_v44 = vsel %vm1293_vm0, %v1300_v51, %v1302_v20 }
 0x182   : > { %v1314_v28 = vmul.u32 %v1312_v13, %v1309_v34  ;;  %v4919_v58 = vand.u32 3, %v1079_v48  ;;  %v1276_v33 = vshrl.u32 %v6616_v52, %v6645_v17  ;;  %v4925_v24 = vmul.u32 %v1311_v42, %v4915_v59 }
 0x183   : > { %v1207_v63 = vshll.u32 %v4912_v16, 30  ;;  %v1082_v22 = vadd.f32 0.041655596, %v1081_v6  ;;  %v1089_v11 = vadd.f32 0.008332121, %v1088_v5  ;;  %v1313_v37 = vmul.u32 %v1311_v42, %v1309_v34 }
 0x184   : > { %v1317_v55 = vshll.u32 %v1314_v28, 16  ;;  %v1297_v8 = vsel %vm1295_vm8, %v1285_v32, 2102212464  ;;  %v1333_v23 = vand.u32 65535, %v1303_v44  ;;  %v1334_v48 = vshrl.u32 %v1303_v44, 16 }
 0x185   : > { %v4927_v60 = vsub.s32 %v1204_v15, %v1207_v63  ;;  %v1083_v51 = vmul.f32 %v1082_v22, %v1080_v56  ;;  %v1090_v2 = vmul.f32 %v1089_v11, %v1080_v56  ;;  %v1316_v20 = vmul.u32 %v1312_v13, %v4915_v59 }
 0x186   : > { %vm1321_vm5 = vc.u32 %v1313_v37, %v1317_v55  ;;  %v1319_v6 = vshll.u32 %v4925_v24, 16  ;;  %v1323_v63 = vadd.s32 %v1317_v55, %v1313_v37  ;;  %vm1098_vm8 = vcmp.eq.s32.totalorder %v4919_v58, 0 }
 0x187   : > { %vm1209_vm12 = vcmp.lt.s32.totalorder %v4927_v60, 0  ;;  %v1210_v17 = vsub.s32 0, %v4927_v60  ;;  %v1322_v42 = vsel %vm1321_vm5, 1, %v6606_v31  ;;  %v1084_v15 = vadd.f32 -0.4999988, %v1083_v51 }
 0x188   : > { %v1091_v5 = vadd.f32 -0.16666654, %v1090_v2  ;;  %v1324_v54 = vadd.s32 %v1322_v42, %v1316_v20  ;;  %vm1101_vm3 = vcmp.eq.s32.totalorder %v4919_v58, 2  ;;  %v1200_v32 = vadd.s32 %v4853_v26, %v4846_v10 }
 0x189   : > { %v1211_v13 = vsel %vm1209_vm12, %v1210_v17, %v4927_v60  ;;  %v1296_v44 = vsel %vm1292_vm15, %v1276_v33, %v1279_v47  ;;  %v1085_v22 = vmul.f32 %v1084_v15, %v1080_v56  ;;  %vm1097_vm9 = vcmp.lt.s32.totalorder %v4919_v58, 2 }
 0x18a   : > { %v1092_v11 = vmul.f32 %v1091_v5, %v1080_v56  ;;  %v1212_v51 = vclz %v1211_v13  ;;  %vm1325_vm10 = vc.u32 %v1323_v63, %v1319_v6  ;;  %vm1095_vm6 = vweird.f32 %v3924_v12  ;;  %v6653_v12 = vld [vmem:[#allocation17_spill] sm:$0xff] }
 0x18b   : > { %v1298_v37 = vsel %vm1294_vm2, %v4869_v49, %v1297_v8  ;;  %v1326_v55 = vsel %vm1325_vm10, 1, %v6606_v31  ;;  %v1336_v10 = vmul.u32 %v1334_v48, %v1309_v34  ;;  %v1337_v26 = vmul.u32 %v1333_v23, %v4915_v59 }
 0x18c   : > { %v1086_v2 = vadd.f32 1.0, %v1085_v22  ;;  %v1093_v20 = vadd.f32 1.0, %v1092_v11  ;;  %v3386_v47 = vadd.s32 4294967294, %v1212_v51  ;;  %v1328_v33 = vadd.s32 %v1326_v55, %v1324_v54 }
 0x18d   : > { %v1318_v56 = vshrl.u32 %v1314_v28, 16  ;;  %v1320_v17 = vshrl.u32 %v4925_v24, 16  ;;  %v1335_v42 = vmul.u32 %v1333_v23, %v1309_v34  ;;  %v1339_v6 = vshll.u32 %v1336_v10, 16 }
 0x18e   : > { %v1094_v15 = vmul.f32 %v1093_v20, %v4897_v35  ;;  %v1102_v5 = vxor.u32 2147483648, %v1086_v2  ;;  %vm3387_vm14 = vcmp.lt.s32.totalorder %v3386_v47, 0  ;;  %v1341_v63 = vshll.u32 %v1337_v26, 16 }
 0x18f   : > { %v1215_v49 = vsel %vm3387_vm14, 0, %v3386_v47  ;;  %v1329_v8 = vadd.s32 %v1328_v33, %v1318_v56  ;;  %vm1343_vm1 = vc.u32 %v1335_v42, %v1339_v6  ;;  %v1345_v13 = vadd.s32 %v1339_v6, %v1335_v42 }
 0x190   : > { %v1099_v0 = vxor.u32 2147483648, %v1094_v15  ;;  %v1103_v22 = vsel %vm1101_vm3, %v1102_v5, %v1094_v15  ;;  %v1216_v11 = vsub.s32 32, %v1215_v49  ;;  %v1338_v54 = vmul.u32 %v1334_v48, %v4915_v59  ;;  %v6652_v59 = vld [vmem:[#allocation9_spill] sm:$0xff] }
 0x191   : > { %v1217_v28 = vshll.u32 %v4927_v60, %v1215_v49  ;;  %v1220_v34 = vsub.s32 4294967266, %v1215_v49  ;;  %v1344_v24 = vsel %vm1343_vm1, 1, %v6606_v31  ;;  %vm1347_vm2 = vc.u32 %v1345_v13, %v1341_v63 }
 0x192   : > { %v1100_v35 = vsel %vm1098_vm8, %v1086_v2, %v1099_v0  ;;  %v1218_v23 = vshrl.u32 %v1200_v32, %v1216_v11  ;;  %v1346_v51 = vadd.s32 %v1344_v24, %v1338_v54  ;;  %v1348_v55 = vsel %vm1347_vm2, 1, %v6606_v31 }
 0x193   : > { %v1104_v20 = vsel %vm1097_vm9, %v1100_v35, %v1103_v22  ;;  %v1221_v47 = vadd.s32 127, %v1220_v34  ;;  %v4962_v33 = vadd.s32 %v1329_v8, %v1320_v17  ;;  %v6554_v48 = vand.u32 2147483647, %v6652_v59  ;;  %v6654_v8 = vld [vmem:[#allocation20_spill] sm:$0xff] }
 0x194   : > { %v4966_v60 = vadd.s32 1, %v4910_v38  ;;  %v1105_v56 = vsel %vm1095_vm6, nan, %v1104_v20  ;;  %v1340_v42 = vshrl.u32 %v1336_v10, 16  ;;  %v1350_v0 = vadd.s32 %v1348_v55, %v1346_v51  ;;  %v6657_v20 = vld [vmem:[#allocation21_spill] sm:$0xff] }
 0x195   : > { %2999 = vmatmul.f32.gmra.mxu1 %v1105_v56  ;;  %v1219_v32 = vor.u32 %v1218_v23, %v1217_v28  ;;  %v1222_v2 = vshll.u32 %v1221_v47, 23  ;;  %v1299_v58 = vsel %vm1293_vm0, %v1296_v44, %v1298_v37  ;;  %v4972_v6 = vadd.s32 %v1345_v13, %v1341_v63  ;;  %v6658_v47 = vld [vmem:[#allocation30_spill] sm:$0xff]  ;;  %v6659_v56 = vld [vmem:[#allocation25_spill] sm:$0xff] }
 0x196   : > { %v1230_v17 = vsub.s32 4, %v4912_v16  ;;  %v1342_v15 = vshrl.u32 %v1337_v26, 16  ;;  %v1351_v5 = vadd.s32 %v1350_v0, %v1340_v42  ;;  %v1421_v38 = vand.u32 8388607, %v6554_v48 }
 0x197   : > { %v1223_v49 = vor.u32 4788187, %v1222_v2  ;;  %vm1355_vm15 = vc.u32 %v4962_v33, %v4972_v6  ;;  %v1431_v10 = vshll.u32 %v6616_v52, %v6653_v12  ;;  %v1432_v46 = vshrl.u32 %v6617_v3, %v6654_v8 }
 0x198   : > { %vm2657_vm0 = vcmp.gt.s32.totalorder %v4966_v60, 0  ;;  %v1352_v44 = vadd.s32 %v1351_v5, %v1342_v15  ;;  %v1422_v37 = vor.u32 8388608, %v1421_v38  ;;  %v1434_v26 = vshll.u32 %v6617_v3, %v6653_v12  ;;  %v6660_v15 = vld [vmem:[#allocation28_spill] sm:$0xff] }
 0x199   : > { %v1435_v63 = vshrl.u32 %v6618_v36, %v6654_v8  ;;  %vm2527_vm5 = vcmp.lt.s32.totalorder %v4727_v7, 4  ;;  %v1224_v13 = vand.u32 2147483647, %v1223_v49  ;;  %v1226_v22 = vcvt.s32.f32 %v1219_v32 }
 0x19a   : > { %v1437_v11 = vshll.u32 %v6618_v36, %v6653_v12  ;;  %v1438_v54 = vshrl.u32 %v6584_v1, %v6654_v8  ;;  %vm4995_vm12 = vcmp.le.f32.partialorder %v1106_v40, 0.7853982  ;;  %v1356_v34 = vadd.s32 1, %v1352_v44 }
 0x19b   : > { %v4999_v24 = vor.u32 %v1432_v46, %v1431_v10  ;;  %v5001_v35 = vor.u32 %v1435_v63, %v1434_v26  ;;  %v1227_v23 = vmul.f32 %v1226_v22, %v1224_v13  ;;  %v1353_v51 = vmul.u32 %v4878_v30, %v1299_v58 }
 0x19c   : > { %v1439_v55 = vor.u32 %v1438_v54, %v1437_v11  ;;  %vm1448_vm8 = vcmp.lt.s32.totalorder %v6657_v20, 3  ;;  %vm1108_vm3 = vcmp.lt.s32.totalorder %v3933_v18, 0  ;;  %v1357_v40 = vsel %vm1355_vm15, %v1356_v34, %v1352_v44 }
 0x19d   : > { %v1460_v42 = vsel %vm1448_vm8, %v6659_v56, %v6658_v47  ;;  %v5013_v0 = vshll.u32 %v1422_v37, 8  ;;  %v1228_v32 = vxor.u32 2147483648, %v1227_v23  ;;  %v1231_v2 = vsel %vm1108_vm3, %v1230_v17, %v4912_v16 }
 0x19e   : > { %v1358_v30 = vadd.s32 %v1357_v40, %v1353_v51  ;;  %vm1446_vm9 = vcmp.lt.s32.totalorder %v6657_v20, 1  ;;  %vm1447_vm10 = vcmp.lt.s32.totalorder %v6657_v20, 2  ;;  %v1456_v5 = vsel %vm1448_vm8, %v1439_v55, %v6660_v15 }
 0x19f   : > { %v1454_v58 = vsel %vm1446_vm9, %v4999_v24, %v5001_v35  ;;  %v1458_v38 = vsel %vm1446_vm9, %v5001_v35, %v1439_v55  ;;  %v1229_v49 = vsel %vm1108_vm3, %v1228_v32, %v1227_v23  ;;  %v1463_v12 = vand.u32 65535, %v5013_v0 }
 0x1a0   : > { %v1359_v16 = vadd.s32 536870912, %v1358_v30  ;;  %v1461_v17 = vsel %vm1447_vm10, %v1458_v38, %v1460_v42  ;;  %v5034_v10 = vsel %vm4995_vm12, %v3933_v18, %v1229_v49  ;;  %v1464_v46 = vshrl.u32 %v5013_v0, 16 }
 0x1a1   : > { %v1465_v44 = vand.u32 65535, %v1461_v17  ;;  %v1466_v37 = vshrl.u32 %v1461_v17, 16  ;;  %v1233_v26 = vsel %vm4995_vm12, 0, %v1231_v2  ;;  %v1234_v63 = vmul.f32 %v5034_v10, %v5034_v10 }
 0x1a2   : > { %v5041_v13 = vshrl.u32 %v1359_v16, 30  ;;  %v1457_v22 = vsel %vm1447_vm10, %v1454_v58, %v1456_v5  ;;  %v5048_v11 = vsel %vm2527_vm5, %v4886_v4, 920167782  ;;  %v6662_v54 = vor.u32 %v4793_v41, %v4773_v25 }
 0x1a3   : > { %6661 = vst [vmem:[#allocation8_spill] sm:$0xff] %v5048_v11  ;;  %v5057_v34 = vmul.u32 %v1466_v37, %v1463_v12  ;;  %v5059_v23 = vmul.u32 %v1465_v44, %v1464_v46  ;;  %v5064_v51 = vsel %vm2657_vm0, %v4966_v60, 0  ;;  %v1235_v40 = vmul.f32 -0.001358992, %v1234_v63 }
 0x1a4   : > { %v5055_v28 = vsel %vm2527_vm5, %v6662_v54, 1326507024  ;;  %v1242_v47 = vmul.f32 -0.00019511016, %v1234_v63  ;;  %v1361_v56 = vshll.u32 %v5041_v13, 30  ;;  %v5067_v42 = vand.u32 3, %v1233_v26 }
 0x1a5   : > { %6663 = vst [vmem:[#allocation14_spill] sm:$0xff] %v5055_v28  ;;  %v1467_v25 = vmul.u32 %v1465_v44, %v1463_v12  ;;  %v1471_v41 = vshll.u32 %v5057_v34, 16  ;;  %v1488_v32 = vshrl.u32 %v1457_v22, 16  ;;  %v1236_v2 = vadd.f32 0.041655596, %v1235_v40 }
 0x1a6   : > { %v1243_v58 = vadd.f32 0.008332121, %v1242_v47  ;;  %v5070_v15 = vsub.s32 %v1358_v30, %v1361_v56  ;;  %v1430_v5 = vshrl.u32 %v6616_v52, %v6654_v8  ;;  %v1470_v38 = vmul.u32 %v1466_v37, %v1464_v46 }
 0x1a7   : > { %v1473_v60 = vshll.u32 %v5059_v23, 16  ;;  %vm1475_vm6 = vc.u32 %v1467_v25, %v1471_v41  ;;  %v1477_v49 = vadd.s32 %v1471_v41, %v1467_v25  ;;  %v1237_v16 = vmul.f32 %v1236_v2, %v1234_v63 }
 0x1a8   : > { %v1244_v17 = vmul.f32 %v1243_v58, %v1234_v63  ;;  %vm1363_vm14 = vcmp.lt.s32.totalorder %v5070_v15, 0  ;;  %v1364_v44 = vsub.s32 0, %v5070_v15  ;;  %v1476_v26 = vsel %vm1475_vm6, 1, %v6606_v31 }
 0x1a9   : > { %vm5078_vm1 = vc.u32 %v1477_v49, %v1473_v60  ;;  %v1487_v30 = vand.u32 65535, %v1457_v22  ;;  %v5082_v40 = vmul.u32 %v1488_v32, %v1463_v12  ;;  %v1238_v8 = vadd.f32 -0.4999988, %v1237_v16 }
 0x1aa   : > { %v1245_v37 = vadd.f32 -0.16666654, %v1244_v17  ;;  %v1365_v47 = vsel %vm1363_vm14, %v1364_v44, %v5070_v15  ;;  %v1478_v56 = vadd.s32 %v1476_v26, %v1470_v38  ;;  %vm1252_vm2 = vcmp.eq.s32.totalorder %v5067_v42, 0 }
 0x1ab   : > { %vm1255_vm15 = vcmp.eq.s32.totalorder %v5067_v42, 2  ;;  %v1354_v25 = vadd.s32 %v4972_v6, %v4962_v33  ;;  %v1366_v41 = vclz %v1365_v47  ;;  %v1451_v2 = vsel %vm1449_vm13, %v1439_v55, 2102212464 }
 0x1ac   : > { %v1239_v58 = vmul.f32 %v1238_v8, %v1234_v63  ;;  %v1246_v22 = vmul.f32 %v1245_v37, %v1234_v63  ;;  %vm1251_vm0 = vcmp.lt.s32.totalorder %v5067_v42, 2  ;;  %v1450_v60 = vsel %vm1446_vm9, %v1430_v5, %v4999_v24 }
 0x1ad   : > { %v1480_v38 = vsel %vm5078_vm1, 1, %v6606_v31  ;;  %vm1249_vm12 = vweird.f32 %v3933_v18  ;;  %v3389_v49 = vadd.s32 4294967294, %v1366_v41  ;;  %v1489_v33 = vmul.u32 %v1487_v30, %v1463_v12 }
 0x1ae   : > { %v1491_v6 = vmul.u32 %v1487_v30, %v1464_v46  ;;  %v1493_v16 = vshll.u32 %v5082_v40, 16  ;;  %v1240_v55 = vadd.f32 1.0, %v1239_v58  ;;  %v1247_v17 = vadd.f32 1.0, %v1246_v22 }
 0x1af   : > { %v1452_v63 = vsel %vm1448_vm8, %v5001_v35, %v1451_v2  ;;  %v1482_v44 = vadd.s32 %v1480_v38, %v1478_v56  ;;  %vm3390_vm13 = vcmp.lt.s32.totalorder %v3389_v49, 0  ;;  %v1472_v24 = vshrl.u32 %v5057_v34, 16  ;;  %v6666_v2 = vld [vmem:[#allocation10_spill] sm:$0xff] }
 0x1b0   : > { %v1492_v5 = vmul.u32 %v1488_v32, %v1464_v46  ;;  %vm1497_vm3 = vc.u32 %v1489_v33, %v1493_v16  ;;  %v1248_v26 = vmul.f32 %v1247_v17, %v5034_v10  ;;  %v1256_v54 = vxor.u32 2147483648, %v1240_v55 }
 0x1b1   : > { %v1369_v8 = vsel %vm3390_vm13, 0, %v3389_v49  ;;  %v1498_v12 = vsel %vm1497_vm3, 1, %v6606_v31  ;;  %v1453_v47 = vsel %vm1447_vm10, %v1450_v60, %v1452_v63  ;;  %v1495_v41 = vshll.u32 %v1491_v6, 16 }
 0x1b2   : > { %v1370_v30 = vsub.s32 32, %v1369_v8  ;;  %v1374_v37 = vsub.s32 4294967266, %v1369_v8  ;;  %v1253_v58 = vxor.u32 2147483648, %v1248_v26  ;;  %vm1262_vm8 = vcmp.lt.s32.totalorder %v6641_v29, 0 }
 0x1b3   : > { %v1483_v35 = vadd.s32 %v1482_v44, %v1472_v24  ;;  %v1499_v56 = vadd.s32 %v1493_v16, %v1489_v33  ;;  %v1500_v34 = vadd.s32 %v1498_v12, %v1492_v5  ;;  %v1371_v46 = vshll.u32 %v5070_v15, %v1369_v8  ;;  %v6667_v8 = vld [vmem:[#allocation27_spill] sm:$0xff] }
 0x1b4   : > { %v1372_v32 = vshrl.u32 %v1354_v25, %v1370_v30  ;;  %v1375_v10 = vadd.s32 127, %v1374_v37  ;;  %v6553_v22 = vand.u32 2147483647, %v6666_v2  ;;  %v1254_v38 = vsel %vm1252_vm2, %v1240_v55, %v1253_v58  ;;  %v6668_v30 = vld [vmem:[#allocation24_spill] sm:$0xff] }
 0x1b5   : > { %v1257_v20 = vsel %vm1255_vm15, %v1256_v54, %v1248_v26  ;;  %v1474_v60 = vshrl.u32 %v5059_v23, 16  ;;  %vm1501_vm9 = vc.u32 %v1499_v56, %v1495_v41  ;;  %v1384_v17 = vsub.s32 4, %v5041_v13 }
 0x1b6   : > { %v1258_v49 = vsel %vm1251_vm0, %v1254_v38, %v1257_v20  ;;  %v1373_v33 = vor.u32 %v1372_v32, %v1371_v46  ;;  %v1376_v16 = vshll.u32 %v1375_v10, 23  ;;  %v1502_v15 = vsel %vm1501_vm9, 1, %v6606_v31 }
 0x1b7   : > { %v1259_v25 = vsel %vm1249_vm12, nan, %v1258_v49  ;;  %v1494_v55 = vshrl.u32 %v5082_v40, 16  ;;  %v1504_v63 = vadd.s32 %v1502_v15, %v1500_v34  ;;  %v5123_v24 = vadd.s32 %v1483_v35, %v1474_v60  ;;  %v6669_v60 = vld [vmem:[#allocation31_spill] sm:$0xff]  ;;  %v6671_v15 = vld [vmem:[#allocation33_spill] sm:$0xff] }
 0x1b8   : > { %3002 = vmatmul.f32.gmra.mxu1 %v1259_v25  ;;  %v1377_v44 = vor.u32 4788187, %v1376_v16  ;;  %v1496_v23 = vshrl.u32 %v1491_v6, 16  ;;  %v1575_v42 = vand.u32 8388607, %v6553_v22  ;;  %v1380_v5 = vcvt.s32.f32 %v1373_v33  ;;  %v6670_v16 = vld [vmem:[#allocation36_spill] sm:$0xff] }
 0x1b9   : > { %v5127_v26 = vadd.s32 %v1499_v56, %v1495_v41  ;;  %v1505_v54 = vadd.s32 %v1504_v63, %v1494_v55  ;;  %v1586_v18 = vshrl.u32 %v6617_v3, %v6667_v8  ;;  %v1585_v40 = vshll.u32 %v6616_v52, %v6668_v30 }
 0x1ba   : > { %v1378_v12 = vand.u32 2147483647, %v1377_v44  ;;  %v1588_v37 = vshll.u32 %v6617_v3, %v6668_v30  ;;  %v1589_v6 = vshrl.u32 %v6618_v36, %v6667_v8  ;;  %v1576_v35 = vor.u32 8388608, %v1575_v42 }
 0x1bb   : > { %v1506_v58 = vadd.s32 %v1505_v54, %v1496_v23  ;;  %v1591_v41 = vshll.u32 %v6618_v36, %v6668_v30  ;;  %v1592_v56 = vshrl.u32 %v6584_v1, %v6667_v8  ;;  %v1385_v46 = vsel %vm1262_vm8, %v1384_v17, %v5041_v13  ;;  %v6675_v54 = vld [vmem:[#allocation34_spill] sm:$0xff] }
 0x1bc   : > { %v1381_v34 = vmul.f32 %v1380_v5, %v1378_v12  ;;  %vm1509_vm10 = vc.u32 %v5123_v24, %v5127_v26  ;;  %v1590_v32 = vor.u32 %v1589_v6, %v1588_v37  ;;  %v1587_v38 = vor.u32 %v1586_v18, %v1585_v40 }
 0x1bd   : > { %v1510_v10 = vadd.s32 1, %v1506_v58  ;;  %v1593_v20 = vor.u32 %v1592_v56, %v1591_v41  ;;  %vm1602_vm6 = vcmp.lt.s32.totalorder %v6669_v60, 3  ;;  %v1507_v33 = vmul.u32 %v5013_v0, %v1453_v47 }
 0x1be   : > { %v1382_v49 = vxor.u32 2147483648, %v1381_v34  ;;  %vm1600_vm14 = vcmp.lt.s32.totalorder %v6669_v60, 1  ;;  %v1614_v25 = vsel %vm1602_vm6, %v6671_v15, %v6670_v16  ;;  %v6672_v13 = vand.u32 2147483647, %v6641_v29 }
 0x1bf   : > { %v1511_v55 = vsel %vm1509_vm10, %v1510_v10, %v1506_v58  ;;  %v1612_v63 = vsel %vm1600_vm14, %v1590_v32, %v1593_v20  ;;  %v5161_v44 = vshll.u32 %v1576_v35, 8  ;;  %vm1601_vm2 = vcmp.lt.s32.totalorder %v6669_v60, 2 }
 0x1c0   : > { %vm5155_vm1 = vcmp.le.f32.partialorder %v6672_v13, 0.7853982  ;;  %v1383_v0 = vsel %vm1262_vm8, %v1382_v49, %v1381_v34  ;;  %v1512_v23 = vadd.s32 %v1511_v55, %v1507_v33  ;;  %v1608_v5 = vsel %vm1600_vm14, %v1587_v38, %v1590_v32 }
 0x1c1   : > { %v1387_v47 = vsel %vm5155_vm1, 0, %v1385_v46  ;;  %v5171_v42 = vsel %vm5155_vm1, %v6641_v29, %v1383_v0  ;;  %v1610_v18 = vsel %vm1602_vm6, %v1593_v20, %v6675_v54  ;;  %v1615_v12 = vsel %vm1601_vm2, %v1612_v63, %v1614_v25 }
 0x1c2   : > { %v1388_v30 = vmul.f32 %v5171_v42, %v5171_v42  ;;  %v1513_v40 = vadd.s32 536870912, %v1512_v23  ;;  %v1584_v37 = vshrl.u32 %v6616_v52, %v6667_v8  ;;  %v1619_v6 = vand.u32 65535, %v1615_v12 }
 0x1c3   : > { %v1605_v58 = vsel %vm1603_vm4, %v1593_v20, 2102212464  ;;  %v1617_v35 = vand.u32 65535, %v5161_v44  ;;  %v1618_v41 = vshrl.u32 %v5161_v44, 16  ;;  %v1620_v56 = vshrl.u32 %v1615_v12, 16 }
 0x1c4   : > { %v1389_v34 = vmul.f32 -0.001358992, %v1388_v30  ;;  %v1396_v46 = vmul.f32 -0.00019511016, %v1388_v30  ;;  %v5188_v10 = vshrl.u32 %v1513_v40, 30  ;;  %v1611_v49 = vsel %vm1601_vm2, %v1608_v5, %v1610_v18 }
 0x1c5   : > { %v5193_v33 = vand.u32 31, %v5064_v51  ;;  %v5195_v8 = vand.u32 3, %v1387_v47  ;;  %v1622_v16 = vmul.u32 %v1620_v56, %v1617_v35  ;;  %v1623_v15 = vmul.u32 %v1619_v6, %v1618_v41 }
 0x1c6   : > { %v1390_v20 = vadd.f32 0.041655596, %v1389_v34  ;;  %v1397_v25 = vadd.f32 0.008332121, %v1396_v46  ;;  %v1515_v13 = vshll.u32 %v5188_v10, 30  ;;  %v1604_v17 = vsel %vm1600_vm14, %v1584_v37, %v1587_v38 }
 0x1c7   : > { %6676 = vst [vmem:[#allocation12_spill] sm:$0xff] %v5193_v33  ;;  %v1606_v55 = vsel %vm1602_vm6, %v1590_v32, %v1605_v58  ;;  %v1621_v63 = vmul.u32 %v1619_v6, %v1617_v35  ;;  %v1625_v0 = vshll.u32 %v1622_v16, 16  ;;  %v1642_v5 = vshrl.u32 %v1611_v49, 16 }
 0x1c8   : > { %v1391_v54 = vmul.f32 %v1390_v20, %v1388_v30  ;;  %v1398_v18 = vmul.f32 %v1397_v25, %v1388_v30  ;;  %v5202_v12 = vsub.s32 %v1512_v23, %v1515_v13  ;;  %v1641_v47 = vand.u32 65535, %v1611_v49 }
 0x1c9   : > { %v1624_v40 = vmul.u32 %v1620_v56, %v1618_v41  ;;  %v1627_v22 = vshll.u32 %v1623_v15, 16  ;;  %vm1629_vm4 = vc.u32 %v1621_v63, %v1625_v0  ;;  %v1631_v34 = vadd.s32 %v1625_v0, %v1621_v63 }
 0x1ca   : > { %v1392_v46 = vadd.f32 -0.4999988, %v1391_v54  ;;  %v1399_v48 = vadd.f32 -0.16666654, %v1398_v18  ;;  %vm1517_vm15 = vcmp.lt.s32.totalorder %v5202_v12, 0  ;;  %v1518_v38 = vsub.s32 0, %v5202_v12 }
 0x1cb   : > { %vm1406_vm0 = vcmp.eq.s32.totalorder %v5195_v8, 0  ;;  %vm1409_vm12 = vcmp.eq.s32.totalorder %v5195_v8, 2  ;;  %v1630_v32 = vsel %vm1629_vm4, 1, %v6606_v31  ;;  %vm1633_vm13 = vc.u32 %v1631_v34, %v1627_v22 }
 0x1cc   : > { %v1644_v23 = vmul.u32 %v1642_v5, %v1617_v35  ;;  %v1393_v37 = vmul.f32 %v1392_v46, %v1388_v30  ;;  %v1400_v6 = vmul.f32 %v1399_v48, %v1388_v30  ;;  %vm1405_vm3 = vcmp.lt.s32.totalorder %v5195_v8, 2 }
 0x1cd   : > { %v1519_v58 = vsel %vm1517_vm15, %v1518_v38, %v5202_v12  ;;  %v1632_v56 = vadd.s32 %v1630_v32, %v1624_v40  ;;  %vm1403_vm8 = vweird.f32 %v6641_v29  ;;  %v1508_v49 = vadd.s32 %v5127_v26, %v5123_v24 }
 0x1ce   : > { %v1520_v20 = vclz %v1519_v58  ;;  %v5216_v25 = vsel %vm1601_vm2, %v1604_v17, %v1606_v55  ;;  %v1643_v13 = vmul.u32 %v1641_v47, %v1617_v35  ;;  %v1394_v22 = vadd.f32 1.0, %v1393_v37 }
 0x1cf   : > { %v1401_v63 = vadd.f32 1.0, %v1400_v6  ;;  %v1634_v48 = vsel %vm1633_vm13, 1, %v6606_v31  ;;  %v1645_v30 = vmul.u32 %v1641_v47, %v1618_v41  ;;  %v1626_v54 = vshrl.u32 %v1622_v16, 16 }
 0x1d0   : > { %v3392_v0 = vadd.s32 4294967294, %v1520_v20  ;;  %v1636_v18 = vadd.s32 %v1634_v48, %v1632_v56  ;;  %v1647_v40 = vshll.u32 %v1644_v23, 16  ;;  %v1410_v46 = vxor.u32 2147483648, %v1394_v22 }
 0x1d1   : > { %v1402_v34 = vmul.f32 %v1401_v63, %v5171_v42  ;;  %v1628_v38 = vshrl.u32 %v1623_v15, 16  ;;  %v1646_v24 = vmul.u32 %v1642_v5, %v1618_v41  ;;  %v1649_v55 = vshll.u32 %v1645_v30, 16 }
 0x1d2   : > { %vm3393_vm9 = vcmp.lt.s32.totalorder %v3392_v0, 0  ;;  %v1637_v26 = vadd.s32 %v1636_v18, %v1626_v54  ;;  %vm1651_vm10 = vc.u32 %v1643_v13, %v1647_v40  ;;  %v1653_v60 = vadd.s32 %v1647_v40, %v1643_v13  ;;  %v6677_v18 = vld [vmem:[#allocation11_spill] sm:$0xff] }
 0x1d3   : > { %v1407_v17 = vxor.u32 2147483648, %v1402_v34  ;;  %v1523_v35 = vsel %vm3393_vm9, 0, %v3392_v0  ;;  %v1652_v32 = vsel %vm1651_vm10, 1, %v6606_v31  ;;  %v1411_v47 = vsel %vm1409_vm12, %v1410_v46, %v1402_v34 }
 0x1d4   : > { %v1524_v16 = vsub.s32 32, %v1523_v35  ;;  %v1525_v37 = vshll.u32 %v5202_v12, %v1523_v35  ;;  %v1528_v6 = vsub.s32 4294967266, %v1523_v35  ;;  %v5226_v41 = vadd.s32 %v1637_v26, %v1628_v38  ;;  %v6680_v26 = vld [vmem:[#allocation32_spill] sm:$0xff] }
 0x1d5   : > { %v1408_v42 = vsel %vm1406_vm0, %v1394_v22, %v1407_v17  ;;  %v1654_v15 = vadd.s32 %v1652_v32, %v1646_v24  ;;  %vm1655_vm6 = vc.u32 %v1653_v60, %v1649_v55  ;;  %v5232_v13 = vshrl.u32 %v5064_v51, 5 }
 0x1d6   : > { %v1412_v5 = vsel %vm1405_vm3, %v1408_v42, %v1411_v47  ;;  %v1526_v58 = vshrl.u32 %v1508_v49, %v1524_v16  ;;  %v1529_v56 = vadd.s32 127, %v1528_v6  ;;  %v1656_v20 = vsel %vm1655_vm6, 1, %v6606_v31 }
 0x1d7   : > { %v1413_v12 = vsel %vm1403_vm8, nan, %v1412_v5  ;;  %v1648_v63 = vshrl.u32 %v1644_v23, 16  ;;  %v1658_v48 = vadd.s32 %v1656_v20, %v1654_v15  ;;  %v5236_v54 = vadd.s32 %v1653_v60, %v1649_v55  ;;  %v6679_v23 = vld [vmem:[#allocation29_spill] sm:$0xff]  ;;  %v6681_v5 = vld [vmem:[#allocation35_spill] sm:$0xff] }
 0x1d8   : > { %3005 = vmatmul.f32.gmra.mxu1 %v1413_v12  ;;  %v1527_v22 = vor.u32 %v1526_v58, %v1525_v37  ;;  %v1530_v0 = vshll.u32 %v1529_v56, 23  ;;  %v6555_v8 = vand.u32 2147483647, %v6677_v18  ;;  %v5240_v49 = vsub.s32 32, %v5193_v33  ;;  %v6685_v12 = vld [vmem:[#allocation40_spill] sm:$0xff] }
 0x1d9   : > { %v1650_v40 = vshrl.u32 %v1645_v30, 16  ;;  %v1659_v34 = vadd.s32 %v1658_v48, %v1648_v63  ;;  %v1661_v51 = vmul.u32 %v5161_v44, %v5216_v25  ;;  %vm1663_vm14 = vc.u32 %v5226_v41, %v5236_v54  ;;  %v6686_v63 = vld [vmem:[#allocation37_spill] sm:$0xff] }
 0x1da   : > { %6678 = vst [vmem:[#allocation16_spill] sm:$0xff] %v5240_v49  ;;  %v1531_v46 = vor.u32 4788187, %v1530_v0  ;;  %v1729_v29 = vand.u32 8388607, %v6555_v8  ;;  %v1739_v38 = vshll.u32 %v6616_v52, %v6679_v23  ;;  %v1740_v60 = vshrl.u32 %v6617_v3, %v6680_v26 }
 0x1db   : > { %v1660_v24 = vadd.s32 %v1659_v34, %v1650_v40  ;;  %v1742_v30 = vshll.u32 %v6617_v3, %v6679_v23  ;;  %v1743_v44 = vshrl.u32 %v6618_v36, %v6680_v26  ;;  %v1534_v17 = vcvt.s32.f32 %v1527_v22  ;;  %v6687_v34 = vld [vmem:[#allocation39_spill] sm:$0xff] }
 0x1dc   : > { %v1532_v25 = vand.u32 2147483647, %v1531_v46  ;;  %v1745_v35 = vshll.u32 %v6618_v36, %v6679_v23  ;;  %v1746_v55 = vshrl.u32 %v6584_v1, %v6680_v26  ;;  %v1730_v47 = vor.u32 8388608, %v1729_v29 }
 0x1dd   : > { %v1664_v32 = vadd.s32 1, %v1660_v24  ;;  %v5260_v16 = vor.u32 %v1740_v60, %v1739_v38  ;;  %v5262_v37 = vor.u32 %v1743_v44, %v1742_v30  ;;  %v1538_v42 = vsub.s32 4, %v5188_v10 }
 0x1de   : > { %v1535_v6 = vmul.f32 %v1534_v17, %v1532_v25  ;;  %v5265_v15 = vor.u32 %v1746_v55, %v1745_v35  ;;  %vm1756_vm1 = vcmp.lt.s32.totalorder %v6681_v5, 3  ;;  %v6682_v58 = vand.u32 2147483647, %v6652_v59  ;;  %v487_v35 = vpop.f32.mrf.mxu0 }
 0x1df   : > { %vm1416_vm4 = vcmp.lt.s32.totalorder %v6652_v59, 0  ;;  %v1665_v20 = vsel %vm1663_vm14, %v1664_v32, %v1660_v24  ;;  %v1768_v48 = vsel %vm1756_vm1, %v6686_v63, %v6685_v12  ;;  %vm1754_vm15 = vcmp.lt.s32.totalorder %v6681_v5, 1 }
 0x1e0   : > { %vm5270_vm2 = vcmp.le.f32.partialorder %v6682_v58, 0.7853982  ;;  %v1536_v22 = vxor.u32 2147483648, %v1535_v6  ;;  %v1666_v0 = vadd.s32 %v1665_v20, %v1661_v51  ;;  %vm1755_vm0 = vcmp.lt.s32.totalorder %v6681_v5, 2 }
 0x1e1   : > { %v1762_v40 = vsel %vm1754_vm15, %v5260_v16, %v5262_v37  ;;  %v1764_v46 = vsel %vm1756_vm1, %v5265_v15, %v6687_v34  ;;  %v1766_v29 = vsel %vm1754_vm15, %v5262_v37, %v5265_v15  ;;  %v5296_v51 = vshll.u32 %v1730_v47, 8 }
 0x1e2   : > { %v1537_v23 = vsel %vm1416_vm4, %v1536_v22, %v1535_v6  ;;  %v1539_v38 = vsel %vm1416_vm4, %v1538_v42, %v5188_v10  ;;  %v1667_v24 = vadd.s32 536870912, %v1666_v0  ;;  %v1769_v60 = vsel %vm1755_vm0, %v1766_v29, %v1768_v48 }
 0x1e3   : > { %v5303_v30 = vshll.u32 %v6584_v1, %v5193_v33  ;;  %v5307_v44 = vshll.u32 %v6585_v9, %v5193_v33  ;;  %v5312_v25 = vsel %vm5270_vm2, %v6652_v59, %v1537_v23  ;;  %v1773_v17 = vand.u32 65535, %v1769_v60 }
 0x1e4   : > { %v1542_v10 = vmul.f32 %v5312_v25, %v5312_v25  ;;  %v5316_v55 = vshrl.u32 %v1667_v24, 30  ;;  %v5320_v32 = vsel %vm1755_vm0, %v1762_v40, %v1764_v46  ;;  %v1774_v47 = vshrl.u32 %v1769_v60, 16  ;;  %v3573_v40 = vld [vmem:[%s6456_s2] ss:$0 sm:$0xff] }
 0x1e5   : > { %v5324_v6 = vshrl.u32 %v6585_v9, %v5240_v49  ;;  %v1541_v42 = vsel %vm5270_vm2, 0, %v1539_v38  ;;  %v1771_v58 = vand.u32 65535, %v5296_v51  ;;  %v1772_v20 = vshrl.u32 %v5296_v51, 16 }
 0x1e6   : > { %v5332_v12 = vshrl.u32 %v6586_v19, %v5240_v49  ;;  %v1543_v63 = vmul.f32 -0.001358992, %v1542_v10  ;;  %v1550_v48 = vmul.f32 -0.00019511016, %v1542_v10  ;;  %v1669_v22 = vshll.u32 %v5316_v55, 30 }
 0x1e7   : > { %v5338_v34 = vadd.f32 %v3573_v40, %v487_v35  ;;  %v1776_v56 = vmul.u32 %v1774_v47, %v1771_v58  ;;  %v5340_v46 = vmul.u32 %v1773_v17, %v1772_v20  ;;  %v1796_v29 = vshrl.u32 %v5320_v32, 16 }
 0x1e8   : > { %v1544_v23 = vadd.f32 0.041655596, %v1543_v63  ;;  %v1551_v38 = vadd.f32 0.008332121, %v1550_v48  ;;  %v5343_v24 = vand.u32 3, %v1541_v42  ;;  %v5345_v60 = vsub.s32 %v1666_v0, %v1669_v22 }
 0x1e9   : > { %v1775_v8 = vmul.u32 %v1773_v17, %v1771_v58  ;;  %v1778_v49 = vmul.u32 %v1774_v47, %v1772_v20  ;;  %v1779_v33 = vshll.u32 %v1776_v56, 16  ;;  %v1795_v57 = vand.u32 65535, %v5320_v32 }
 0x1ea   : > { %v1545_v19 = vmul.f32 %v1544_v23, %v1542_v10  ;;  %v1552_v11 = vmul.f32 %v1551_v38, %v1542_v10  ;;  %vm1671_vm12 = vcmp.lt.s32.totalorder %v5345_v60, 0  ;;  %v1672_v35 = vsub.s32 0, %v5345_v60 }
 0x1eb   : > { %v1781_v40 = vshll.u32 %v5340_v46, 16  ;;  %vm1783_vm13 = vc.u32 %v1775_v8, %v1779_v33  ;;  %v1785_v63 = vadd.s32 %v1779_v33, %v1775_v8  ;;  %v5351_v48 = vmul.u32 %v1796_v29, %v1771_v58 }
 0x1ec   : > { %v1546_v42 = vadd.f32 -0.4999988, %v1545_v19  ;;  %v1553_v0 = vadd.f32 -0.16666654, %v1552_v11  ;;  %v1673_v17 = vsel %vm1671_vm12, %v1672_v35, %v5345_v60  ;;  %v1784_v47 = vsel %vm1783_vm13, 1, %v6606_v31 }
 0x1ed   : > { %vm1560_vm3 = vcmp.eq.s32.totalorder %v5343_v24, 0  ;;  %vm1563_vm8 = vcmp.eq.s32.totalorder %v5343_v24, 2  ;;  %v1662_v32 = vadd.s32 %v5236_v54, %v5226_v41  ;;  %v1674_v22 = vclz %v1673_v17 }
 0x1ee   : > { %v1738_v23 = vshrl.u32 %v6616_v52, %v6680_v26  ;;  %v1759_v19 = vsel %vm1757_vm7, %v5265_v15, 2102212464  ;;  %v1547_v11 = vmul.f32 %v1546_v42, %v1542_v10  ;;  %v1554_v33 = vmul.f32 %v1553_v0, %v1542_v10 }
 0x1ef   : > { %vm1559_vm9 = vcmp.lt.s32.totalorder %v5343_v24, 2  ;;  %v1786_v8 = vadd.s32 %v1784_v47, %v1778_v49  ;;  %vm1787_vm10 = vc.u32 %v1785_v63, %v1781_v40  ;;  %vm1557_vm6 = vweird.f32 %v6652_v59 }
 0x1f0   : > { %v3395_v38 = vadd.s32 4294967294, %v1674_v22  ;;  %v1758_v41 = vsel %vm1754_vm15, %v1738_v23, %v5260_v16  ;;  %v1788_v54 = vsel %vm1787_vm10, 1, %v6606_v31  ;;  %v1799_v26 = vmul.u32 %v1795_v57, %v1772_v20 }
 0x1f1   : > { %v1548_v35 = vadd.f32 1.0, %v1547_v11  ;;  %v1555_v17 = vadd.f32 1.0, %v1554_v33  ;;  %v1790_v4 = vadd.s32 %v1788_v54, %v1786_v8  ;;  %v1801_v15 = vshll.u32 %v5351_v48, 16 }
 0x1f2   : > { %vm3396_vm7 = vcmp.lt.s32.totalorder %v3395_v38, 0  ;;  %v1760_v49 = vsel %vm1756_vm1, %v5262_v37, %v1759_v19  ;;  %v1780_v10 = vshrl.u32 %v1776_v56, 16  ;;  %v1797_v40 = vmul.u32 %v1795_v57, %v1771_v58 }
 0x1f3   : > { %v1556_v63 = vmul.f32 %v1555_v17, %v5312_v25  ;;  %v1564_v42 = vxor.u32 2147483648, %v1548_v35  ;;  %v1677_v0 = vsel %vm3396_vm7, 0, %v3395_v38  ;;  %v1800_v16 = vmul.u32 %v1796_v29, %v1772_v20  ;;  %v6688_v20 = vld [vmem:[#allocation15_spill] sm:$0xff] }
 0x1f4   : > { %v1678_v47 = vsub.s32 32, %v1677_v0  ;;  %v1682_v22 = vsub.s32 4294967266, %v1677_v0  ;;  %v1803_v23 = vshll.u32 %v1799_v26, 16  ;;  %vm1805_vm14 = vc.u32 %v1797_v40, %v1801_v15 }
 0x1f5   : > { %v1561_v11 = vxor.u32 2147483648, %v1556_v63  ;;  %v1679_v33 = vshll.u32 %v5345_v60, %v1677_v0  ;;  %v1791_v8 = vadd.s32 %v1790_v4, %v1780_v10  ;;  %v1806_v54 = vsel %vm1805_vm14, 1, %v6606_v31 }
 0x1f6   : > { %v1680_v28 = vshrl.u32 %v1662_v32, %v1678_v47  ;;  %v1683_v7 = vadd.s32 127, %v1682_v22  ;;  %v1807_v37 = vadd.s32 %v1801_v15, %v1797_v40  ;;  %v1808_v56 = vadd.s32 %v1806_v54, %v1800_v16  ;;  %v6689_v54 = vld [vmem:[#allocation41_spill] sm:$0xff] }
 0x1f7   : > { %v1562_v57 = vsel %vm1560_vm3, %v1548_v35, %v1561_v11  ;;  %v1565_v25 = vsel %vm1563_vm8, %v1564_v42, %v1556_v63  ;;  %v1782_v58 = vshrl.u32 %v5340_v46, 16  ;;  %v1876_v29 = vand.u32 2147483647, %v6688_v20 }
 0x1f8   : > { %v1566_v60 = vsel %vm1559_vm9, %v1562_v57, %v1565_v25  ;;  %v1681_v4 = vor.u32 %v1680_v28, %v1679_v33  ;;  %v1684_v19 = vshll.u32 %v1683_v7, 23  ;;  %vm1809_vm1 = vc.u32 %v1807_v37, %v1803_v23 }
 0x1f9   : > { %v1567_v32 = vsel %vm1557_vm6, nan, %v1566_v60  ;;  %vm1570_vm2 = vcmp.lt.s32.totalorder %v6666_v2, 0  ;;  %v1761_v38 = vsel %vm1755_vm0, %v1758_v41, %v1760_v49  ;;  %v1810_v35 = vsel %vm1809_vm1, 1, %v6606_v31 }
 0x1fa   : > { %3008 = vmatmul.f32.gmra.mxu1 %v1567_v32  ;;  %v1685_v46 = vor.u32 4788187, %v1684_v19  ;;  %v1792_v17 = vadd.s32 %v1791_v8, %v1782_v58  ;;  %v1802_v15 = vshrl.u32 %v5351_v48, 16  ;;  %v1812_v24 = vadd.s32 %v1810_v35, %v1808_v56 }
 0x1fb   : > { %v1692_v28 = vsub.s32 4, %v5316_v55  ;;  %v1804_v7 = vshrl.u32 %v1799_v26, 16  ;;  %v1811_v10 = vadd.s32 %v1807_v37, %v1803_v23  ;;  %v1883_v59 = vand.u32 8388607, %v1876_v29 }
 0x1fc   : > { %v1686_v40 = vand.u32 2147483647, %v1685_v46  ;;  %v1688_v63 = vcvt.s32.f32 %v1681_v4  ;;  %v1813_v42 = vadd.s32 %v1812_v24, %v1802_v15  ;;  %v1894_v5 = vshrl.u32 %v6617_v3, %v4327_v50 }
 0x1fd   : > { %v1896_v41 = vshll.u32 %v6617_v3, %v4299_v61  ;;  %v1897_v48 = vshrl.u32 %v6618_v36, %v4327_v50  ;;  %v1899_v49 = vshll.u32 %v6618_v36, %v4299_v61  ;;  %v1900_v26 = vshrl.u32 %v6584_v1, %v4327_v50 }
 0x1fe   : > { %v1689_v0 = vmul.f32 %v1688_v63, %v1686_v40  ;;  %v1814_v16 = vadd.s32 %v1813_v42, %v1804_v7  ;;  %vm1817_vm4 = vc.u32 %v1792_v17, %v1811_v10  ;;  %v1893_v47 = vshll.u32 %v6616_v52, %v4299_v61  ;;  %v6693_v7 = vld [vmem:[#allocation43_spill] sm:$0xff] }
 0x1ff   : > { %v1884_v22 = vor.u32 8388608, %v1883_v59  ;;  %v5407_v23 = vor.u32 %v1897_v48, %v1896_v41  ;;  %v1901_v11 = vor.u32 %v1900_v26, %v1899_v49  ;;  %vm1910_vm15 = vcmp.lt.s32.totalorder %v4368_v21, 3 }
 0x200   : > { %v1690_v33 = vxor.u32 2147483648, %v1689_v0  ;;  %v1818_v8 = vadd.s32 1, %v1814_v16  ;;  %vm1908_vm0 = vcmp.lt.s32.totalorder %v4368_v21, 1  ;;  %v1922_v37 = vsel %vm1910_vm15, %v6689_v54, %v4490_v53 }
 0x201   : > { %v1693_v56 = vsel %vm1570_vm2, %v1692_v28, %v5316_v55  ;;  %v1815_v61 = vmul.u32 %v5296_v51, %v1761_v38  ;;  %v1895_v57 = vor.u32 %v1894_v5, %v1893_v47  ;;  %v1920_v25 = vsel %vm1908_vm0, %v5407_v23, %v1901_v11 }
 0x202   : > { %v6690_v58 = vand.u32 2147483647, %v6666_v2  ;;  %v1691_v53 = vsel %vm1570_vm2, %v1690_v33, %v1689_v0  ;;  %v1819_v4 = vsel %vm1817_vm4, %v1818_v8, %v1814_v16  ;;  %vm1909_vm13 = vcmp.lt.s32.totalorder %v4368_v21, 2 }
 0x203   : > { %v2803_v51 = vand.u32 2139095040, %v5338_v34  ;;  %v1820_v19 = vadd.s32 %v1819_v4, %v1815_v61  ;;  %v1923_v32 = vsel %vm1909_vm13, %v1920_v25, %v1922_v37  ;;  %v5444_v46 = vshll.u32 %v1884_v22, 8 }
 0x204   : > { %vm5424_vm12 = vcmp.le.f32.partialorder %v6690_v58, 0.7853982  ;;  %v1928_v15 = vshrl.u32 %v1923_v32, 16  ;;  %v1916_v28 = vsel %vm1908_vm0, %v1895_v57, %v5407_v23  ;;  %v1918_v59 = vsel %vm1910_vm15, %v1901_v11, %v6693_v7 }
 0x205   : > { %v5436_v55 = vsel %vm5424_vm12, %v6666_v2, %v1691_v53  ;;  %v1695_v38 = vsel %vm5424_vm12, 0, %v1693_v56  ;;  %v1821_v24 = vadd.s32 536870912, %v1820_v19  ;;  %v1927_v40 = vand.u32 65535, %v1923_v32 }
 0x206   : > { %v1696_v35 = vmul.f32 %v5436_v55, %v5436_v55  ;;  %v5454_v63 = vor.u32 %v5324_v6, %v5303_v30  ;;  %v1925_v41 = vand.u32 65535, %v5444_v46  ;;  %v5457_v48 = vshrl.u32 %v2803_v51, 23 }
 0x207   : > { %v5459_v49 = vand.u32 3, %v1695_v38  ;;  %v5461_v26 = vshrl.u32 %v1821_v24, 30  ;;  %v1926_v0 = vshrl.u32 %v5444_v46, 16  ;;  %v1919_v22 = vsel %vm1909_vm13, %v1916_v28, %v1918_v59 }
 0x208   : > { %v1697_v42 = vmul.f32 -0.001358992, %v1696_v35  ;;  %v1704_v5 = vmul.f32 -0.00019511016, %v1696_v35  ;;  %v1930_v33 = vmul.u32 %v1928_v15, %v1925_v41  ;;  %v5466_v30 = vadd.s32 %v1811_v10, %v1792_v17 }
 0x209   : > { %v1823_v6 = vshll.u32 %v5461_v26, 30  ;;  %v1892_v8 = vshrl.u32 %v6616_v52, %v4327_v50  ;;  %v1931_v54 = vmul.u32 %v1927_v40, %v1926_v0  ;;  %v1929_v61 = vmul.u32 %v1927_v40, %v1925_v41  ;;  %v6695_v40 = vld [vmem:[#allocation26_spill] sm:$0xff] }
 0x20a   : > { %v1698_v16 = vadd.f32 0.041655596, %v1697_v42  ;;  %v1705_v47 = vadd.f32 0.008332121, %v1704_v5  ;;  %v1933_v25 = vshll.u32 %v1930_v33, 16  ;;  %vm6694_vm3 = vcmp.lt.s32.totalorder %v4368_v21, 4 }
 0x20b   : > { %v5471_v58 = vsub.s32 %v1820_v19, %v1823_v6  ;;  %v1913_v60 = vsel %vm6694_vm3, %v1901_v11, 2102212464  ;;  %v1949_v53 = vand.u32 65535, %v1919_v22  ;;  %v1950_v4 = vshrl.u32 %v1919_v22, 16 }
 0x20c   : > { %v1699_v37 = vmul.f32 %v1698_v16, %v1696_v35  ;;  %v1706_v56 = vmul.f32 %v1705_v47, %v1696_v35  ;;  %vm1717_vm8 = vcmp.eq.s32.totalorder %v5459_v49, 2  ;;  %v1932_v10 = vmul.u32 %v1928_v15, %v1926_v0 }
 0x20d   : > { %vm1937_vm9 = vc.u32 %v1929_v61, %v1933_v25  ;;  %vm1714_vm10 = vcmp.eq.s32.totalorder %v5459_v49, 0  ;;  %vm1825_vm6 = vcmp.lt.s32.totalorder %v5471_v58, 0  ;;  %v1826_v50 = vsub.s32 0, %v5471_v58 }
 0x20e   : > { %v1700_v51 = vadd.f32 -0.4999988, %v1699_v37  ;;  %v1707_v17 = vadd.f32 -0.16666654, %v1706_v56  ;;  %v1935_v32 = vshll.u32 %v1931_v54, 16  ;;  %v1938_v19 = vsel %vm1937_vm9, 1, %v6606_v31 }
 0x20f   : > { %vm1713_vm7 = vcmp.lt.s32.totalorder %v5459_v49, 2  ;;  %v1939_v11 = vadd.s32 %v1933_v25, %v1929_v61  ;;  %v1940_v28 = vadd.s32 %v1938_v19, %v1932_v10  ;;  %vm1711_vm14 = vweird.f32 %v6666_v2 }
 0x210   : > { %v1701_v38 = vmul.f32 %v1700_v51, %v1696_v35  ;;  %v1708_v24 = vmul.f32 %v1707_v17, %v1696_v35  ;;  %v1827_v15 = vsel %vm1825_vm6, %v1826_v50, %v5471_v58  ;;  %v1912_v7 = vsel %vm1908_vm0, %v1892_v8, %v1895_v57 }
 0x211   : > { %v1914_v59 = vsel %vm1910_vm15, %v5407_v23, %v1913_v60  ;;  %v2030_v42 = vand.u32 2147483647, %v6695_v40  ;;  %v1828_v35 = vclz %v1827_v15  ;;  %vm1941_vm1 = vc.u32 %v1939_v11, %v1935_v32 }
 0x212   : > { %v1702_v5 = vadd.f32 1.0, %v1701_v38  ;;  %v1709_v16 = vadd.f32 1.0, %v1708_v24  ;;  %v1934_v47 = vshrl.u32 %v1930_v33, 16  ;;  %v1942_v22 = vsel %vm1941_vm1, 1, %v6606_v31 }
 0x213   : > { %v1952_v6 = vmul.u32 %v1950_v4, %v1925_v41  ;;  %v1953_v37 = vmul.u32 %v1949_v53, %v1926_v0  ;;  %v3398_v25 = vadd.s32 4294967294, %v1828_v35  ;;  %v1944_v57 = vadd.s32 %v1942_v22, %v1940_v28 }
 0x214   : > { %v1710_v56 = vmul.f32 %v1709_v16, %v5436_v55  ;;  %v1718_v61 = vxor.u32 2147483648, %v1702_v5  ;;  %v1936_v8 = vshrl.u32 %v1931_v54, 16  ;;  %v1951_v51 = vmul.u32 %v1949_v53, %v1925_v41 }
 0x215   : > { %v1954_v17 = vmul.u32 %v1950_v4, %v1926_v0  ;;  %v1955_v23 = vshll.u32 %v1952_v6, 16  ;;  %vm3399_vm2 = vcmp.lt.s32.totalorder %v3398_v25, 0  ;;  %v1945_v10 = vadd.s32 %v1944_v57, %v1934_v47 }
 0x216   : > { %v1715_v60 = vxor.u32 2147483648, %v1710_v56  ;;  %v1957_v50 = vshll.u32 %v1953_v37, 16  ;;  %v1719_v33 = vsel %vm1717_vm8, %v1718_v61, %v1710_v56  ;;  %v1831_v32 = vsel %vm3399_vm2, 0, %v3398_v25  ;;  %v6696_v25 = vld [vmem:[#allocation42_spill] sm:$0xff] }
 0x217   : > { %vm1959_vm4 = vc.u32 %v1951_v51, %v1955_v23  ;;  %v1961_v19 = vadd.s32 %v1955_v23, %v1951_v51  ;;  %v1832_v38 = vsub.s32 32, %v1831_v32  ;;  %v1833_v24 = vshll.u32 %v5471_v58, %v1831_v32 }
 0x218   : > { %v1716_v55 = vsel %vm1714_vm10, %v1702_v5, %v1715_v60  ;;  %v1836_v54 = vsub.s32 4294967266, %v1831_v32  ;;  %v5498_v0 = vadd.s32 %v1945_v10, %v1936_v8  ;;  %v1960_v53 = vsel %vm1959_vm4, 1, %v6606_v31  ;;  %v6697_v8 = vld [vmem:[#allocation45_spill] sm:$0xff] }
 0x219   : > { %v1720_v41 = vsel %vm1713_vm7, %v1716_v55, %v1719_v33  ;;  %vm1963_vm15 = vc.u32 %v1961_v19, %v1957_v50  ;;  %v1834_v11 = vshrl.u32 %v5466_v30, %v1832_v38  ;;  %v1962_v15 = vadd.s32 %v1960_v53, %v1954_v17 }
 0x21a   : > { %v1721_v4 = vsel %vm1711_vm14, nan, %v1720_v41  ;;  %v1837_v28 = vadd.s32 127, %v1836_v54  ;;  %v3418_v5 = vadd.s32 4294967169, %v5457_v48  ;;  %v1956_v58 = vshrl.u32 %v1952_v6, 16  ;;  %v6700_v54 = vld [vmem:[#allocation47_spill] sm:$0xff] }
 0x21b   : > { %3011 = vmatmul.f32.gmra.mxu1 %v1721_v4  ;;  %v1964_v16 = vsel %vm1963_vm15, 1, %v6606_v31  ;;  %v5506_v49 = vadd.s32 %v1961_v19, %v1957_v50  ;;  %v1835_v35 = vor.u32 %v1834_v11, %v1833_v24  ;;  %v2037_v56 = vand.u32 8388607, %v2030_v42  ;;  %v6698_v19 = vld [vmem:[#allocation44_spill] sm:$0xff]  ;;  %v6699_v24 = vld [vmem:[#allocation50_spill] sm:$0xff] }
 0x21c   : > { %v1838_v47 = vshll.u32 %v1837_v28, 23  ;;  %v1966_v22 = vadd.s32 %v1964_v16, %v1962_v15  ;;  %v1846_v2 = vsub.s32 4, %v5461_v26  ;;  %v1915_v30 = vsel %vm1909_vm13, %v1912_v7, %v1914_v59 }
 0x21d   : > { %v1958_v61 = vshrl.u32 %v1953_v37, 16  ;;  %vm1971_vm0 = vc.u32 %v5498_v0, %v5506_v49  ;;  %v2047_v57 = vshll.u32 %v6616_v52, %v6696_v25  ;;  %v2048_v51 = vshrl.u32 %v6617_v3, %v6697_v8 }
 0x21e   : > { %v1839_v48 = vor.u32 4788187, %v1838_v47  ;;  %v1967_v6 = vadd.s32 %v1966_v22, %v1956_v58  ;;  %v2050_v17 = vshll.u32 %v6617_v3, %v6696_v25  ;;  %v2051_v23 = vshrl.u32 %v6618_v36, %v6697_v8 }
 0x21f   : > { %v2053_v21 = vshll.u32 %v6618_v36, %v6696_v25  ;;  %v2054_v7 = vshrl.u32 %v6584_v1, %v6697_v8  ;;  %v1842_v37 = vcvt.s32.f32 %v1835_v35  ;;  %v2038_v10 = vor.u32 8388608, %v2037_v56 }
 0x220   : > { %v1840_v59 = vand.u32 2147483647, %v1839_v48  ;;  %v1968_v60 = vadd.s32 %v1967_v6, %v1958_v61  ;;  %v2049_v50 = vor.u32 %v2048_v51, %v2047_v57  ;;  %v2052_v33 = vor.u32 %v2051_v23, %v2050_v17 }
 0x221   : > { %v2055_v32 = vor.u32 %v2054_v7, %v2053_v21  ;;  %vm2064_vm12 = vcmp.lt.s32.totalorder %v6698_v19, 3  ;;  %vm2062_vm13 = vcmp.lt.s32.totalorder %v6698_v19, 1  ;;  %v6701_v53 = vand.u32 2147483647, %v6677_v18 }
 0x222   : > { %v1843_v55 = vmul.f32 %v1842_v37, %v1840_v59  ;;  %v1972_v38 = vadd.s32 1, %v1968_v60  ;;  %v2076_v41 = vsel %vm2064_vm12, %v6700_v54, %v6699_v24  ;;  %vm1724_vm8 = vcmp.lt.s32.totalorder %v6677_v18, 0 }
 0x223   : > { %vm5535_vm3 = vcmp.le.f32.partialorder %v6701_v53, 0.7853982  ;;  %v1969_v11 = vmul.u32 %v5444_v46, %v1915_v30  ;;  %v2074_v28 = vsel %vm2062_vm13, %v2052_v33, %v2055_v32  ;;  %v1847_v58 = vsel %vm1724_vm8, %v1846_v2, %v5461_v26  ;;  %v6704_v30 = vld [vmem:[#allocation49_spill] sm:$0xff] }
 0x224   : > { %v1844_v15 = vxor.u32 2147483648, %v1843_v55  ;;  %v1973_v16 = vsel %vm1971_vm0, %v1972_v38, %v1968_v60  ;;  %vm2063_vm9 = vcmp.lt.s32.totalorder %v6698_v19, 2  ;;  %v2070_v47 = vsel %vm2062_vm13, %v2049_v50, %v2052_v33 }
 0x225   : > { %v1974_v35 = vadd.s32 %v1973_v16, %v1969_v11  ;;  %v2077_v22 = vsel %vm2063_vm9, %v2074_v28, %v2076_v41  ;;  %v5552_v46 = vshll.u32 %v2038_v10, 8  ;;  %v2072_v26 = vsel %vm2064_vm12, %v2055_v32, %v6704_v30 }
 0x226   : > { %v1845_v56 = vsel %vm1724_vm8, %v1844_v15, %v1843_v55  ;;  %v2081_v2 = vand.u32 65535, %v2077_v22  ;;  %v2082_v61 = vshrl.u32 %v2077_v22, 16  ;;  %v1849_v6 = vsel %vm5535_vm3, 0, %v1847_v58 }
 0x227   : > { %v5560_v48 = vsel %vm5535_vm3, %v6677_v18, %v1845_v56  ;;  %v1975_v25 = vadd.s32 536870912, %v1974_v35  ;;  %v2079_v57 = vand.u32 65535, %v5552_v46  ;;  %v5565_v51 = vadd.s32 1, %v3418_v5 }
 0x228   : > { %v1850_v17 = vmul.f32 %v5560_v48, %v5560_v48  ;;  %v2046_v23 = vshrl.u32 %v6616_v52, %v6697_v8  ;;  %v2080_v21 = vshrl.u32 %v5552_v46, 16  ;;  %vm6705_vm10 = vcmp.lt.s32.totalorder %v6698_v19, 4 }
 0x229   : > { %v5572_v7 = vshrl.u32 %v1975_v25, 30  ;;  %v2067_v59 = vsel %vm6705_vm10, %v2055_v32, 2102212464  ;;  %v2073_v37 = vsel %vm2063_vm9, %v2070_v47, %v2072_v26  ;;  %v5578_v60 = vmul.u32 %v2082_v61, %v2079_v57 }
 0x22a   : > { %v1851_v5 = vmul.f32 -0.001358992, %v1850_v17  ;;  %v1858_v10 = vmul.f32 -0.00019511016, %v1850_v17  ;;  %v5580_v55 = vand.u32 3, %v1849_v6  ;;  %v5582_v38 = vmul.u32 %v2081_v2, %v2080_v21 }
 0x22b   : > { %v1977_v8 = vshll.u32 %v5572_v7, 30  ;;  %v2066_v24 = vsel %vm2062_vm13, %v2046_v23, %v2049_v50  ;;  %v2083_v54 = vmul.u32 %v2081_v2, %v2079_v57  ;;  %v2087_v41 = vshll.u32 %v5578_v60, 16 }
 0x22c   : > { %v1852_v32 = vadd.f32 0.041655596, %v1851_v5  ;;  %v1859_v53 = vadd.f32 0.008332121, %v1858_v10  ;;  %v2068_v4 = vsel %vm2064_vm12, %v2052_v33, %v2067_v59  ;;  %v2104_v11 = vshrl.u32 %v2073_v37, 16 }
 0x22d   : > { %v5590_v28 = vsub.s32 %v1974_v35, %v1977_v8  ;;  %v2086_v15 = vmul.u32 %v2082_v61, %v2080_v21  ;;  %vm2091_vm6 = vc.u32 %v2083_v54, %v2087_v41  ;;  %v2093_v58 = vadd.s32 %v2087_v41, %v2083_v54 }
 0x22e   : > { %v1853_v16 = vmul.f32 %v1852_v32, %v1850_v17  ;;  %v1860_v47 = vmul.f32 %v1859_v53, %v1850_v17  ;;  %v2089_v22 = vshll.u32 %v5582_v38, 16  ;;  %v2092_v50 = vsel %vm2091_vm6, 1, %v6606_v31 }
 0x22f   : > { %vm1979_vm7 = vcmp.lt.s32.totalorder %v5590_v28, 0  ;;  %v1980_v56 = vsub.s32 0, %v5590_v28  ;;  %v2094_v30 = vadd.s32 %v2092_v50, %v2086_v15  ;;  %v2103_v26 = vand.u32 65535, %v2073_v37 }
 0x230   : > { %v1854_v2 = vadd.f32 -0.4999988, %v1853_v16  ;;  %v1861_v33 = vadd.f32 -0.16666654, %v1860_v47  ;;  %vm2095_vm14 = vc.u32 %v2093_v58, %v2089_v22  ;;  %v2106_v35 = vmul.u32 %v2104_v11, %v2079_v57 }
 0x231   : > { %vm1868_vm1 = vcmp.eq.s32.totalorder %v5580_v55, 0  ;;  %vm1871_vm2 = vcmp.eq.s32.totalorder %v5580_v55, 2  ;;  %v1970_v61 = vadd.s32 %v5506_v49, %v5498_v0  ;;  %v1981_v6 = vsel %vm1979_vm7, %v1980_v56, %v5590_v28 }
 0x232   : > { %v1855_v25 = vmul.f32 %v1854_v2, %v1850_v17  ;;  %v1862_v23 = vmul.f32 %v1861_v33, %v1850_v17  ;;  %vm1867_vm4 = vcmp.lt.s32.totalorder %v5580_v55, 2  ;;  %v1982_v59 = vclz %v1981_v6 }
 0x233   : > { %v2096_v37 = vsel %vm2095_vm14, 1, %v6606_v31  ;;  %vm1865_vm15 = vweird.f32 %v6677_v18  ;;  %v5606_v5 = vsel %vm2063_vm9, %v2066_v24, %v2068_v4  ;;  %v2105_v10 = vmul.u32 %v2103_v26, %v2079_v57  ;;  %v6707_v18 = vld [vmem:[#allocation52_spill] sm:$0xff] }
 0x234   : > { %v2107_v8 = vmul.u32 %v2103_v26, %v2080_v21  ;;  %v2109_v54 = vshll.u32 %v2106_v35, 16  ;;  %v1856_v41 = vadd.f32 1.0, %v1855_v25  ;;  %v1863_v0 = vadd.f32 1.0, %v1862_v23 }
 0x235   : > { %v3401_v49 = vadd.s32 4294967294, %v1982_v59  ;;  %v2098_v32 = vadd.s32 %v2096_v37, %v2094_v30  ;;  %vm1878_vm0 = vcmp.lt.s32.totalorder %v6688_v20, 0  ;;  %v2000_v17 = vsub.s32 4, %v5572_v7 }
 0x236   : > { %v2088_v53 = vshrl.u32 %v5578_v60, 16  ;;  %v2108_v15 = vmul.u32 %v2104_v11, %v2080_v21  ;;  %vm2113_vm12 = vc.u32 %v2105_v10, %v2109_v54  ;;  %v1864_v58 = vmul.f32 %v1863_v0, %v5560_v48  ;;  %v6706_v21 = vld [vmem:[#allocation38_spill] sm:$0xff] }
 0x237   : > { %v1872_v19 = vxor.u32 2147483648, %v1856_v41  ;;  %vm3402_vm13 = vcmp.lt.s32.totalorder %v3401_v49, 0  ;;  %v2114_v57 = vsel %vm2113_vm12, 1, %v6606_v31  ;;  %v2111_v4 = vshll.u32 %v2107_v8, 16 }
 0x238   : > { %v1985_v24 = vsel %vm3402_vm13, 0, %v3401_v49  ;;  %v2115_v16 = vadd.s32 %v2109_v54, %v2105_v10  ;;  %v2116_v47 = vadd.s32 %v2114_v57, %v2108_v15  ;;  %v1869_v22 = vxor.u32 2147483648, %v1864_v58 }
 0x239   : > { %v1986_v50 = vsub.s32 32, %v1985_v24  ;;  %v2090_v56 = vshrl.u32 %v5582_v38, 16  ;;  %v2099_v30 = vadd.s32 %v2098_v32, %v2088_v53  ;;  %v1990_v26 = vsub.s32 4294967266, %v1985_v24 }
 0x23a   : > { %v2110_v2 = vshrl.u32 %v2106_v35, 16  ;;  %vm2117_vm3 = vc.u32 %v2115_v16, %v2111_v4  ;;  %v2184_v60 = vand.u32 2147483647, %v6706_v21  ;;  %v1870_v48 = vsel %vm1868_vm1, %v1856_v41, %v1869_v22 }
 0x23b   : > { %v1873_v11 = vsel %vm1871_vm2, %v1872_v19, %v1864_v58  ;;  %v1988_v33 = vshrl.u32 %v1970_v61, %v1986_v50  ;;  %v2118_v6 = vsel %vm2117_vm3, 1, %v6606_v31  ;;  %v1987_v38 = vshll.u32 %v5590_v28, %v1985_v24  ;;  %v6709_v50 = vld [vmem:[#allocation51_spill] sm:$0xff] }
 0x23c   : > { %v1874_v25 = vsel %vm1867_vm4, %v1870_v48, %v1873_v11  ;;  %v1991_v23 = vadd.s32 127, %v1990_v26  ;;  %v2120_v59 = vadd.s32 %v2118_v6, %v2116_v47  ;;  %v5625_v37 = vadd.s32 %v2099_v30, %v2090_v56  ;;  %v6710_v26 = vld [vmem:[#allocation57_spill] sm:$0xff] }
 0x23d   : > { %v1875_v35 = vsel %vm1865_vm15, nan, %v1874_v25  ;;  %v2112_v10 = vshrl.u32 %v2107_v8, 16  ;;  %v2123_v54 = vmul.u32 %v5552_v46, %v5606_v5  ;;  %v1989_v61 = vor.u32 %v1988_v33, %v1987_v38  ;;  %v6708_v8 = vld [vmem:[#allocation48_spill] sm:$0xff] }
 0x23e   : > { %3014 = vmatmul.f32.gmra.mxu1 %v1875_v35  ;;  %v1992_v41 = vshll.u32 %v1991_v23, 23  ;;  %v2121_v0 = vadd.s32 %v2120_v59, %v2110_v2  ;;  %v2191_v55 = vand.u32 8388607, %v2184_v60  ;;  %v2001_v28 = vsel %vm1878_vm0, %v2000_v17, %v5572_v7  ;;  %v6711_v2 = vld [vmem:[#allocation54_spill] sm:$0xff] }
 0x23f   : > { %v5634_v49 = vadd.s32 %v2115_v16, %v2111_v4  ;;  %v2202_v32 = vshrl.u32 %v6617_v3, %v6707_v18  ;;  %v2204_v53 = vshll.u32 %v6617_v3, %v6708_v8  ;;  %vm2681_vm8 = vcmp.lt.s32.totalorder %v5232_v13, 4 }
 0x240   : > { %v1993_v46 = vor.u32 4788187, %v1992_v41  ;;  %v2122_v5 = vadd.s32 %v2121_v0, %v2112_v10  ;;  %v2192_v15 = vor.u32 8388608, %v2191_v55  ;;  %v2205_v58 = vshrl.u32 %v6618_v36, %v6707_v18 }
 0x241   : > { %vm2125_vm9 = vc.u32 %v5625_v37, %v5634_v49  ;;  %v2201_v7 = vshll.u32 %v6616_v52, %v6708_v8  ;;  %v2207_v17 = vshll.u32 %v6618_v36, %v6708_v8  ;;  %v2208_v19 = vshrl.u32 %v6584_v1, %v6707_v18 }
 0x242   : > { %v1994_v57 = vand.u32 2147483647, %v1993_v46  ;;  %v1996_v24 = vcvt.s32.f32 %v1989_v61  ;;  %v2126_v4 = vadd.s32 1, %v2122_v5  ;;  %v2206_v16 = vor.u32 %v2205_v58, %v2204_v53  ;;  %v6714_v61 = vld [vmem:[#allocation56_spill] sm:$0xff] }
 0x243   : > { %v2203_v47 = vor.u32 %v2202_v32, %v2201_v7  ;;  %v2209_v22 = vor.u32 %v2208_v19, %v2207_v17  ;;  %vm2216_vm10 = vcmp.lt.s32.totalorder %v6709_v50, 1  ;;  %vm2218_vm6 = vcmp.lt.s32.totalorder %v6709_v50, 3 }
 0x244   : > { %v1997_v56 = vmul.f32 %v1996_v24, %v1994_v57  ;;  %v2127_v30 = vsel %vm2125_vm9, %v2126_v4, %v2122_v5  ;;  %v2230_v48 = vsel %vm2218_vm6, %v6711_v2, %v6710_v26  ;;  %v5657_v11 = vshll.u32 %v2192_v15, 8 }
 0x245   : > { %v2677_v33 = vor.u32 %v5332_v12, %v5307_v44  ;;  %v2128_v6 = vadd.s32 %v2127_v30, %v2123_v54  ;;  %vm2217_vm7 = vcmp.lt.s32.totalorder %v6709_v50, 2  ;;  %v2228_v25 = vsel %vm2216_vm10, %v2206_v16, %v2209_v22 }
 0x246   : > { %vm2811_vm14 = vcmp.gt.s32.totalorder %v5565_v51, 0  ;;  %vm5667_vm1 = vcmp.le.f32.partialorder %v1876_v29, 0.7853982  ;;  %v1998_v23 = vxor.u32 2147483648, %v1997_v56  ;;  %v2231_v59 = vsel %vm2217_vm7, %v2228_v25, %v2230_v48 }
 0x247   : > { %v2003_v35 = vsel %vm5667_vm1, 0, %v2001_v28  ;;  %v2129_v10 = vadd.s32 536870912, %v2128_v6  ;;  %v2224_v54 = vsel %vm2216_vm10, %v2203_v47, %v2206_v16  ;;  %v2226_v41 = vsel %vm2218_vm6, %v2209_v22, %v6714_v61 }
 0x248   : > { %v1999_v29 = vsel %vm1878_vm0, %v1998_v23, %v1997_v56  ;;  %v2233_v0 = vand.u32 65535, %v5657_v11  ;;  %v2235_v55 = vand.u32 65535, %v2231_v59  ;;  %v2236_v32 = vshrl.u32 %v2231_v59, 16 }
 0x249   : > { %v5686_v8 = vsel %vm2681_vm8, %v5454_v63, 920167782  ;;  %v5691_v28 = vsel %vm5667_vm1, %v6688_v20, %v1999_v29  ;;  %v5693_v53 = vshrl.u32 %v2129_v10, 30  ;;  %v5696_v46 = vshrl.u32 %v5657_v11, 16 }
 0x24a   : > { %v5701_v5 = vsel %vm2811_vm14, %v5565_v51, 0  ;;  %v2004_v15 = vmul.f32 %v5691_v28, %v5691_v28  ;;  %v2227_v58 = vsel %vm2217_vm7, %v2224_v54, %v2226_v41  ;;  %v2238_v7 = vmul.u32 %v2236_v32, %v2233_v0 }
 0x24b   : > { %v5707_v17 = vand.u32 3, %v2003_v35  ;;  %v2131_v19 = vshll.u32 %v5693_v53, 30  ;;  %v2200_v57 = vshrl.u32 %v6616_v52, %v6707_v18  ;;  %v5713_v24 = vmul.u32 %v2235_v55, %v5696_v46 }
 0x24c   : > { %v2005_v4 = vmul.f32 -0.001358992, %v2004_v15  ;;  %v2012_v51 = vmul.f32 -0.00019511016, %v2004_v15  ;;  %v2237_v56 = vmul.u32 %v2235_v55, %v2233_v0  ;;  %v2241_v30 = vshll.u32 %v2238_v7, 16 }
 0x24d   : > { %v5715_v26 = vsub.s32 %v2128_v6, %v2131_v19  ;;  %vm6715_vm2 = vcmp.lt.s32.totalorder %v6709_v50, 4  ;;  %v2257_v48 = vand.u32 65535, %v2227_v58  ;;  %v2258_v25 = vshrl.u32 %v2227_v58, 16 }
 0x24e   : > { %v2221_v2 = vsel %vm6715_vm2, %v2209_v22, 2102212464  ;;  %v2006_v38 = vadd.f32 0.041655596, %v2005_v4  ;;  %v2013_v23 = vadd.f32 0.008332121, %v2012_v51  ;;  %v2240_v59 = vmul.u32 %v2236_v32, %v5696_v46 }
 0x24f   : > { %vm2245_vm4 = vc.u32 %v2237_v56, %v2241_v30  ;;  %vm2133_vm15 = vcmp.lt.s32.totalorder %v5715_v26, 0  ;;  %v2134_v18 = vsub.s32 0, %v5715_v26  ;;  %v2243_v35 = vshll.u32 %v5713_v24, 16 }
 0x250   : > { %v2246_v10 = vsel %vm2245_vm4, 1, %v6606_v31  ;;  %v2007_v6 = vmul.f32 %v2006_v38, %v2004_v15  ;;  %v2014_v54 = vmul.f32 %v2013_v23, %v2004_v15  ;;  %v2247_v61 = vadd.s32 %v2241_v30, %v2237_v56 }
 0x251   : > { %v2248_v41 = vadd.s32 %v2246_v10, %v2240_v59  ;;  %v5725_v22 = vand.u32 31, %v5701_v5  ;;  %v2135_v29 = vsel %vm2133_vm15, %v2134_v18, %v5715_v26  ;;  %v2220_v55 = vsel %vm2216_vm10, %v2200_v57, %v2203_v47 }
 0x252   : > { %v2222_v32 = vsel %vm2218_vm6, %v2206_v16, %v2221_v2  ;;  %v2008_v58 = vadd.f32 -0.4999988, %v2007_v6  ;;  %v2015_v19 = vadd.f32 -0.16666654, %v2014_v54  ;;  %v2136_v4 = vclz %v2135_v29 }
 0x253   : > { %vm2249_vm0 = vc.u32 %v2247_v61, %v2243_v35  ;;  %vm2022_vm12 = vcmp.eq.s32.totalorder %v5707_v17, 0  ;;  %vm2025_vm13 = vcmp.eq.s32.totalorder %v5707_v17, 2  ;;  %v2124_v51 = vadd.s32 %v5634_v49, %v5625_v37 }
 0x254   : > { %v2250_v56 = vsel %vm2249_vm0, 1, %v6606_v31  ;;  %v2260_v30 = vmul.u32 %v2258_v25, %v2233_v0  ;;  %v2261_v38 = vmul.u32 %v2257_v48, %v5696_v46  ;;  %v2009_v47 = vmul.f32 %v2008_v58, %v2004_v15 }
 0x255   : > { %v2016_v57 = vmul.f32 %v2015_v19, %v2004_v15  ;;  %vm2021_vm3 = vcmp.lt.s32.totalorder %v5707_v17, 2  ;;  %v3404_v16 = vadd.s32 4294967294, %v2136_v4  ;;  %v2252_v2 = vadd.s32 %v2250_v56, %v2248_v41 }
 0x256   : > { %vm2019_vm9 = vweird.f32 %v6688_v20  ;;  %v5742_v23 = vsel %vm2217_vm7, %v2220_v55, %v2222_v32  ;;  %v2242_v59 = vshrl.u32 %v2238_v7, 16  ;;  %v2259_v18 = vmul.u32 %v2257_v48, %v2233_v0 }
 0x257   : > { %v2263_v37 = vshll.u32 %v2260_v30, 16  ;;  %v2010_v49 = vadd.f32 1.0, %v2009_v47  ;;  %v2017_v35 = vadd.f32 1.0, %v2016_v57  ;;  %vm3405_vm10 = vcmp.lt.s32.totalorder %v3404_v16, 0  ;;  %v6716_v47 = vld [vmem:[#allocation46_spill] sm:$0xff] }
 0x258   : > { %v2265_v10 = vshll.u32 %v2261_v38, 16  ;;  %v2139_v6 = vsel %vm3405_vm10, 0, %v3404_v16  ;;  %v2253_v54 = vadd.s32 %v2252_v2, %v2242_v59  ;;  %v2262_v58 = vmul.u32 %v2258_v25, %v5696_v46 }
 0x259   : > { %vm2267_vm6 = vc.u32 %v2259_v18, %v2263_v37  ;;  %v2269_v15 = vadd.s32 %v2263_v37, %v2259_v18  ;;  %v2018_v61 = vmul.f32 %v2017_v35, %v5691_v28  ;;  %v2026_v41 = vxor.u32 2147483648, %v2010_v49 }
 0x25a   : > { %v2140_v29 = vsub.s32 32, %v2139_v6  ;;  %v2144_v50 = vsub.s32 4294967266, %v2139_v6  ;;  %v2244_v55 = vshrl.u32 %v5713_v24, 16  ;;  %v2268_v0 = vsel %vm2267_vm6, 1, %v6606_v31 }
 0x25b   : > { %vm2271_vm7 = vc.u32 %v2269_v15, %v2265_v10  ;;  %v2023_v7 = vxor.u32 2147483648, %v2018_v61  ;;  %v2141_v48 = vshll.u32 %v5715_v26, %v2139_v6  ;;  %v2270_v19 = vadd.s32 %v2268_v0, %v2262_v58 }
 0x25c   : > { %v2142_v32 = vshrl.u32 %v2124_v51, %v2140_v29  ;;  %v2145_v4 = vadd.s32 127, %v2144_v50  ;;  %v5749_v56 = vadd.s32 %v2253_v54, %v2244_v55  ;;  %v2272_v28 = vsel %vm2271_vm7, 1, %v6606_v31 }
 0x25d   : > { %v2338_v57 = vand.u32 2147483647, %v6716_v47  ;;  %v2024_v46 = vsel %vm2022_vm12, %v2010_v49, %v2023_v7  ;;  %v2027_v24 = vsel %vm2025_vm13, %v2026_v41, %v2018_v61  ;;  %v2264_v25 = vshrl.u32 %v2260_v30, 16  ;;  %v6717_v30 = vld [vmem:[#allocation55_spill] sm:$0xff] }
 0x25e   : > { %v2274_v16 = vadd.s32 %v2272_v28, %v2270_v19  ;;  %v2028_v26 = vsel %vm2021_vm3, %v2024_v46, %v2027_v24  ;;  %v2143_v51 = vor.u32 %v2142_v32, %v2141_v48  ;;  %v2146_v2 = vshll.u32 %v2145_v4, 23 }
 0x25f   : > { %v5759_v59 = vadd.s32 %v2269_v15, %v2265_v10  ;;  %v2029_v18 = vsel %vm2019_vm9, nan, %v2028_v26  ;;  %v2266_v37 = vshrl.u32 %v2261_v38, 16  ;;  %v2277_v49 = vmul.u32 %v5657_v11, %v5742_v23  ;;  %v6718_v15 = vld [vmem:[#allocation58_spill] sm:$0xff] }
 0x260   : > { %v2275_v35 = vadd.s32 %v2274_v16, %v2264_v25  ;;  %3017 = vmatmul.f32.gmra.mxu1 %v2029_v18  ;;  %v2147_v6 = vor.u32 4788187, %v2146_v2  ;;  %v2345_v17 = vand.u32 8388607, %v2338_v57  ;;  %v2355_v10 = vshll.u32 %v6616_v52, %v6717_v30 }
 0x261   : > { %vm2279_vm14 = vc.u32 %v5749_v56, %v5759_v59  ;;  %v2356_v20 = vshrl.u32 %v6617_v3, %v6718_v15  ;;  %v2358_v38 = vshll.u32 %v6617_v3, %v6717_v30  ;;  %v2359_v11 = vshrl.u32 %v6618_v36, %v6718_v15 }
 0x262   : > { %v2276_v54 = vadd.s32 %v2275_v35, %v2266_v37  ;;  %v2148_v23 = vand.u32 2147483647, %v2147_v6  ;;  %v2150_v61 = vcvt.s32.f32 %v2143_v51  ;;  %v2361_v41 = vshll.u32 %v6618_v36, %v6717_v30 }
 0x263   : > { %v2362_v29 = vshrl.u32 %v6584_v1, %v6718_v15  ;;  %v2346_v50 = vor.u32 8388608, %v2345_v17  ;;  %v5781_v55 = vor.u32 %v2356_v20, %v2355_v10  ;;  %v5783_v0 = vor.u32 %v2359_v11, %v2358_v38 }
 0x264   : > { %v2280_v58 = vadd.s32 1, %v2276_v54  ;;  %v2151_v7 = vmul.f32 %v2150_v61, %v2148_v23  ;;  %v2154_v48 = vsub.s32 4, %v5693_v53  ;;  %vm2372_vm1 = vcmp.lt.s32.totalorder %v4607_v27, 3 }
 0x265   : > { %v5786_v32 = vor.u32 %v2362_v29, %v2361_v41  ;;  %vm5791_vm2 = vcmp.le.f32.partialorder %v2030_v42, 0.7853982  ;;  %vm2032_vm4 = vcmp.lt.s32.totalorder %v6695_v40, 0  ;;  %v2384_v28 = vsel %vm2372_vm1, %v4670_v39, %v4725_v62 }
 0x266   : > { %v2281_v4 = vsel %vm2279_vm14, %v2280_v58, %v2276_v54  ;;  %v2152_v46 = vxor.u32 2147483648, %v2151_v7  ;;  %vm2370_vm15 = vcmp.lt.s32.totalorder %v4607_v27, 1  ;;  %vm2371_vm0 = vcmp.lt.s32.totalorder %v4607_v27, 2 }
 0x267   : > { %v2282_v24 = vadd.s32 %v2281_v4, %v2277_v49  ;;  %v2378_v42 = vsel %vm2370_vm15, %v5781_v55, %v5783_v0  ;;  %v2380_v25 = vsel %vm2372_vm1, %v5786_v32, %v4692_v43  ;;  %v2382_v39 = vsel %vm2370_vm15, %v5783_v0, %v5786_v32 }
 0x268   : > { %v5817_v62 = vshll.u32 %v2346_v50, 8  ;;  %v2153_v16 = vsel %vm2032_vm4, %v2152_v46, %v2151_v7  ;;  %v2155_v26 = vsel %vm2032_vm4, %v2154_v48, %v5693_v53  ;;  %v2385_v2 = vsel %vm2371_vm0, %v2382_v39, %v2384_v28 }
 0x269   : > { %v2283_v51 = vadd.s32 536870912, %v2282_v24  ;;  %v5827_v43 = vsel %vm2681_vm8, %v2677_v33, 1326507024  ;;  %v5830_v18 = vshrl.u32 %v5701_v5, 5  ;;  %v2156_v37 = vsel %vm5791_vm2, %v6695_v40, %v2153_v16 }
 0x26a   : > { %v2389_v35 = vand.u32 65535, %v2385_v2  ;;  %v2158_v53 = vmul.f32 %v2156_v37, %v2156_v37  ;;  %v2381_v6 = vsel %vm2371_vm0, %v2378_v42, %v2380_v25  ;;  %v2390_v17 = vshrl.u32 %v2385_v2, 16 }
 0x26b   : > { %v5835_v49 = vshrl.u32 %v2283_v51, 30  ;;  %v5840_v44 = vsub.s32 32, %v5725_v22  ;;  %v2157_v12 = vsel %vm5791_vm2, 0, %v2155_v26  ;;  %v2387_v33 = vand.u32 65535, %v5817_v62 }
 0x26c   : > { %v2388_v5 = vshrl.u32 %v5817_v62, 16  ;;  %v5848_v30 = vshll.u32 %v6584_v1, %v5725_v22  ;;  %v2159_v10 = vmul.f32 -0.001358992, %v2158_v53  ;;  %v2166_v54 = vmul.f32 -0.00019511016, %v2158_v53 }
 0x26d   : > { %v2285_v20 = vshll.u32 %v5835_v49, 30  ;;  %v5853_v38 = vshll.u32 %v6585_v9, %v5725_v22  ;;  %v2392_v11 = vmul.u32 %v2390_v17, %v2387_v33  ;;  %v2412_v61 = vshrl.u32 %v2381_v6, 16 }
 0x26e   : > { %v5855_v23 = vmul.u32 %v2389_v35, %v2388_v5  ;;  %v2160_v41 = vadd.f32 0.041655596, %v2159_v10  ;;  %v2167_v29 = vadd.f32 0.008332121, %v2166_v54  ;;  %v5857_v58 = vand.u32 3, %v2157_v12 }
 0x26f   : > { %v5859_v50 = vsub.s32 %v2282_v24, %v2285_v20  ;;  %v2391_v7 = vmul.u32 %v2389_v35, %v2387_v33  ;;  %v2394_v48 = vmul.u32 %v2390_v17, %v2388_v5  ;;  %v2395_v19 = vshll.u32 %v2392_v11, 16 }
 0x270   : > { %v2411_v4 = vand.u32 65535, %v2381_v6  ;;  %v2161_v28 = vmul.f32 %v2160_v41, %v2158_v53  ;;  %v2168_v46 = vmul.f32 %v2167_v29, %v2158_v53  ;;  %v2397_v25 = vshll.u32 %v5855_v23, 16 }
 0x271   : > { %vm2287_vm12 = vcmp.lt.s32.totalorder %v5859_v50, 0  ;;  %v2288_v42 = vsub.s32 0, %v5859_v50  ;;  %vm2399_vm13 = vc.u32 %v2391_v7, %v2395_v19  ;;  %v2401_v39 = vadd.s32 %v2395_v19, %v2391_v7 }
 0x272   : > { %v5864_v16 = vmul.u32 %v2412_v61, %v2387_v33  ;;  %v2162_v26 = vadd.f32 -0.4999988, %v2161_v28  ;;  %v2169_v51 = vadd.f32 -0.16666654, %v2168_v46  ;;  %v2400_v2 = vsel %vm2399_vm13, 1, %v6606_v31 }
 0x273   : > { %v2289_v24 = vsel %vm2287_vm12, %v2288_v42, %v5859_v50  ;;  %vm2176_vm3 = vcmp.eq.s32.totalorder %v5857_v58, 0  ;;  %vm2179_vm9 = vcmp.eq.s32.totalorder %v5857_v58, 2  ;;  %v2278_v35 = vadd.s32 %v5759_v59, %v5749_v56 }
 0x274   : > { %v2290_v6 = vclz %v2289_v24  ;;  %v2354_v17 = vshrl.u32 %v6616_v52, %v6718_v15  ;;  %v2375_v12 = vsel %vm2373_vm11, %v5786_v32, 2102212464  ;;  %v2163_v10 = vmul.f32 %v2162_v26, %v2158_v53 }
 0x275   : > { %v2170_v54 = vmul.f32 %v2169_v51, %v2158_v53  ;;  %vm2175_vm10 = vcmp.lt.s32.totalorder %v5857_v58, 2  ;;  %v2402_v20 = vadd.s32 %v2400_v2, %v2394_v48  ;;  %vm2403_vm6 = vc.u32 %v2401_v39, %v2397_v25 }
 0x276   : > { %vm2173_vm7 = vweird.f32 %v6695_v40  ;;  %v3407_v41 = vadd.s32 4294967294, %v2290_v6  ;;  %v2374_v56 = vsel %vm2370_vm15, %v2354_v17, %v5781_v55  ;;  %v2404_v59 = vsel %vm2403_vm6, 1, %v6606_v31 }
 0x277   : > { %v2415_v15 = vmul.u32 %v2411_v4, %v2388_v5  ;;  %v2164_v29 = vadd.f32 1.0, %v2163_v10  ;;  %v2171_v7 = vadd.f32 1.0, %v2170_v54  ;;  %v2406_v19 = vadd.s32 %v2404_v59, %v2402_v20 }
 0x278   : > { %v2417_v32 = vshll.u32 %v5864_v16, 16  ;;  %vm3408_vm11 = vcmp.lt.s32.totalorder %v3407_v41, 0  ;;  %v2376_v53 = vsel %vm2372_vm1, %v5783_v0, %v2375_v12  ;;  %v2396_v48 = vshrl.u32 %v2392_v11, 16  ;;  %v6721_v11 = vld [vmem:[#allocation53_spill] sm:$0xff] }
 0x279   : > { %v2413_v28 = vmul.u32 %v2411_v4, %v2387_v33  ;;  %v2172_v46 = vmul.f32 %v2171_v7, %v2156_v37  ;;  %v2180_v42 = vxor.u32 2147483648, %v2164_v29  ;;  %v2293_v25 = vsel %vm3408_vm11, 0, %v3407_v41 }
 0x27a   : > { %v2416_v39 = vmul.u32 %v2412_v61, %v2388_v5  ;;  %v2294_v55 = vsub.s32 32, %v2293_v25  ;;  %v2298_v26 = vsub.s32 4294967266, %v2293_v25  ;;  %v2419_v51 = vshll.u32 %v2415_v15, 16 }
 0x27b   : > { %vm2421_vm14 = vc.u32 %v2413_v28, %v2417_v32  ;;  %v2177_v24 = vxor.u32 2147483648, %v2172_v46  ;;  %v2295_v2 = vshll.u32 %v5859_v50, %v2293_v25  ;;  %v2407_v6 = vadd.s32 %v2406_v19, %v2396_v48 }
 0x27c   : > { %v2422_v17 = vsel %vm2421_vm14, 1, %v6606_v31  ;;  %v2296_v10 = vshrl.u32 %v2278_v35, %v2294_v55  ;;  %v2299_v54 = vadd.s32 127, %v2298_v26  ;;  %v2423_v20 = vadd.s32 %v2417_v32, %v2413_v28 }
 0x27d   : > { %v2424_v0 = vadd.s32 %v2422_v17, %v2416_v39  ;;  %v2178_v37 = vsel %vm2176_vm3, %v2164_v29, %v2177_v24  ;;  %v2181_v33 = vsel %vm2179_vm9, %v2180_v42, %v2172_v46  ;;  %v2398_v5 = vshrl.u32 %v5855_v23, 16 }
 0x27e   : > { %v2492_v61 = vand.u32 2147483647, %v6721_v11  ;;  %v2182_v50 = vsel %vm2175_vm10, %v2178_v37, %v2181_v33  ;;  %v2297_v4 = vor.u32 %v2296_v10, %v2295_v2  ;;  %v2300_v12 = vshll.u32 %v2299_v54, 23  ;;  %v6722_v2 = vld [vmem:[#allocation59_spill] sm:$0xff]  ;;  %v6723_v10 = vld [vmem:[#allocation14_spill] sm:$0xff]  ;;  %v6724_v54 = vld [vmem:[#allocation13_spill] sm:$0xff] }
 0x27f   : > { %vm2425_vm1 = vc.u32 %v2423_v20, %v2419_v51  ;;  %v2183_v35 = vsel %vm2173_vm7, nan, %v2182_v50  ;;  %vm2186_vm2 = vcmp.lt.s32.totalorder %v6706_v21, 0  ;;  %v2377_v41 = vsel %vm2371_vm0, %v2374_v56, %v2376_v53 }
 0x280   : > { %v2426_v59 = vsel %vm2425_vm1, 1, %v6606_v31  ;;  %3020 = vmatmul.f32.gmra.mxu1 %v2183_v35  ;;  %v2301_v23 = vor.u32 4788187, %v2300_v12  ;;  %v2408_v29 = vadd.s32 %v2407_v6, %v2398_v5  ;;  %v2418_v7 = vshrl.u32 %v5864_v16, 16 }
 0x281   : > { %v2428_v58 = vadd.s32 %v2426_v59, %v2424_v0  ;;  %v2308_v19 = vsub.s32 4, %v5835_v49  ;;  %v2420_v32 = vshrl.u32 %v2415_v15, 16  ;;  %v2427_v48 = vadd.s32 %v2423_v20, %v2419_v51 }
 0x282   : > { %v2499_v40 = vand.u32 8388607, %v2492_v61  ;;  %v2302_v28 = vand.u32 2147483647, %v2301_v23  ;;  %v2304_v46 = vcvt.s32.f32 %v2297_v4  ;;  %v2510_v27 = vshrl.u32 %v6617_v3, %v4765_v45 }
 0x283   : > { %v2429_v42 = vadd.s32 %v2428_v58, %v2418_v7  ;;  %v2512_v56 = vshll.u32 %v6617_v3, %v4729_v14  ;;  %v2513_v16 = vshrl.u32 %v6618_v36, %v4765_v45  ;;  %v2515_v53 = vshll.u32 %v6618_v36, %v4729_v14  ;;  %v6727_v58 = vld [vmem:[#allocation8_spill] sm:$0xff] }
 0x284   : > { %v2516_v15 = vshrl.u32 %v6584_v1, %v4765_v45  ;;  %v2305_v25 = vmul.f32 %v2304_v46, %v2302_v28  ;;  %vm2433_vm4 = vc.u32 %v2408_v29, %v2427_v48  ;;  %v2509_v55 = vshll.u32 %v6616_v52, %v4729_v14 }
 0x285   : > { %v2430_v39 = vadd.s32 %v2429_v42, %v2420_v32  ;;  %v2500_v26 = vor.u32 8388608, %v2499_v40  ;;  %v5919_v51 = vor.u32 %v2513_v16, %v2512_v56  ;;  %vm2526_vm15 = vcmp.lt.s32.totalorder %v6722_v2, 3 }
 0x286   : > { %v2517_v24 = vor.u32 %v2516_v15, %v2515_v53  ;;  %v2306_v6 = vxor.u32 2147483648, %v2305_v25  ;;  %vm2524_vm0 = vcmp.lt.s32.totalorder %v6722_v2, 1  ;;  %v2538_v20 = vsel %vm2526_vm15, %v6724_v54, %v6723_v10 }
 0x287   : > { %v2434_v17 = vadd.s32 1, %v2430_v39  ;;  %v2309_v0 = vsel %vm2186_vm2, %v2308_v19, %v5835_v49  ;;  %v2431_v14 = vmul.u32 %v5817_v62, %v2377_v41  ;;  %v2511_v37 = vor.u32 %v2510_v27, %v2509_v55 }
 0x288   : > { %v2536_v33 = vsel %vm2524_vm0, %v5919_v51, %v2517_v24  ;;  %vm5936_vm12 = vcmp.le.f32.partialorder %v2184_v60, 0.7853982  ;;  %v2307_v50 = vsel %vm2186_vm2, %v2306_v6, %v2305_v25  ;;  %vm2525_vm13 = vcmp.lt.s32.totalorder %v6722_v2, 2 }
 0x289   : > { %v2435_v4 = vsel %vm2433_vm4, %v2434_v17, %v2430_v39  ;;  %v2827_v62 = vshrl.u32 %v6585_v9, %v5840_v44  ;;  %v5949_v49 = vsel %vm5936_vm12, %v6706_v21, %v2307_v50  ;;  %v2539_v60 = vsel %vm2525_vm13, %v2536_v33, %v2538_v20 }
 0x28a   : > { %v2436_v12 = vadd.s32 %v2435_v4, %v2431_v14  ;;  %v2311_v35 = vsel %vm5936_vm12, 0, %v2309_v0  ;;  %v2312_v41 = vmul.f32 %v5949_v49, %v5949_v49  ;;  %v5957_v59 = vshll.u32 %v2500_v26, 8 }
 0x28b   : > { %v2544_v23 = vshrl.u32 %v2539_v60, 16  ;;  %v2532_v9 = vsel %vm2524_vm0, %v2511_v37, %v5919_v51  ;;  %v2534_v19 = vsel %vm2526_vm15, %v2517_v24, %v6727_v58  ;;  %v2543_v32 = vand.u32 65535, %v2539_v60 }
 0x28c   : > { %v2437_v7 = vadd.s32 536870912, %v2436_v12  ;;  %v6728_v40 = vmov 1326507024   ;;  %v2313_v46 = vmul.f32 -0.001358992, %v2312_v41  ;;  %v2541_v27 = vand.u32 65535, %v5957_v59 }
 0x28d   : > { %v5967_v28 = vshrl.u32 %v6728_v40, %v5840_v44  ;;  %v2320_v42 = vmul.f32 -0.00019511016, %v2312_v41  ;;  %v5971_v56 = vor.u32 %v2827_v62, %v5848_v30  ;;  %v5973_v16 = vand.u32 3, %v2311_v35 }
 0x28e   : > { %v5975_v53 = vshrl.u32 %v2437_v7, 30  ;;  %v2542_v15 = vshrl.u32 %v5957_v59, 16  ;;  %v2314_v25 = vadd.f32 0.041655596, %v2313_v46  ;;  %v2535_v55 = vsel %vm2525_vm13, %v2532_v9, %v2534_v19 }
 0x28f   : > { %v2321_v39 = vadd.f32 0.008332121, %v2320_v42  ;;  %v2546_v26 = vmul.u32 %v2544_v23, %v2541_v27  ;;  %v5980_v6 = vadd.s32 %v2427_v48, %v2408_v29  ;;  %v2508_v30 = vshrl.u32 %v6616_v52, %v4765_v45 }
 0x290   : > { %v2439_v17 = vshll.u32 %v5975_v53, 30  ;;  %v2547_v10 = vmul.u32 %v2543_v32, %v2542_v15  ;;  %v2315_v54 = vmul.f32 %v2314_v25, %v2312_v41  ;;  %v2545_v0 = vmul.u32 %v2543_v32, %v2541_v27  ;;  %v6729_v32 = vld [vmem:[#allocation18_spill] sm:$0xff] }
 0x291   : > { %v2322_v20 = vmul.f32 %v2321_v39, %v2312_v41  ;;  %v2549_v14 = vshll.u32 %v2546_v26, 16  ;;  %v2529_v5 = vsel %vm2527_vm5, %v2517_v24, 2102212464  ;;  %v2565_v50 = vand.u32 65535, %v2535_v55 }
 0x292   : > { %v5985_v33 = vsub.s32 %v2436_v12, %v2439_v17  ;;  %v2566_v4 = vshrl.u32 %v2535_v55, 16  ;;  %v2316_v62 = vadd.f32 -0.4999988, %v2315_v54  ;;  %vm2333_vm3 = vcmp.eq.s32.totalorder %v5973_v16, 2 }
 0x293   : > { %v2323_v29 = vadd.f32 -0.16666654, %v2322_v20  ;;  %v2548_v48 = vmul.u32 %v2544_v23, %v2542_v15  ;;  %vm2553_vm9 = vc.u32 %v2545_v0, %v2549_v14  ;;  %vm2330_vm10 = vcmp.eq.s32.totalorder %v5973_v16, 0 }
 0x294   : > { %vm2441_vm6 = vcmp.lt.s32.totalorder %v5985_v33, 0  ;;  %v2442_v45 = vsub.s32 0, %v5985_v33  ;;  %v2551_v60 = vshll.u32 %v2547_v10, 16  ;;  %v2554_v12 = vsel %vm2553_vm9, 1, %v6606_v31 }
 0x295   : > { %v2317_v35 = vmul.f32 %v2316_v62, %v2312_v41  ;;  %v2324_v7 = vmul.f32 %v2323_v29, %v2312_v41  ;;  %vm2329_vm5 = vcmp.lt.s32.totalorder %v5973_v16, 2  ;;  %v2555_v24 = vadd.s32 %v2549_v14, %v2545_v0 }
 0x296   : > { %v2556_v9 = vadd.s32 %v2554_v12, %v2548_v48  ;;  %vm2327_vm7 = vweird.f32 %v6706_v21  ;;  %v2443_v23 = vsel %vm2441_vm6, %v2442_v45, %v5985_v33  ;;  %v2528_v58 = vsel %vm2524_vm0, %v2508_v30, %v2511_v37 }
 0x297   : > { %v2530_v19 = vsel %vm2526_vm15, %v5919_v51, %v2529_v5  ;;  %v2646_v40 = vand.u32 2147483647, %v6729_v32  ;;  %v2318_v46 = vadd.f32 1.0, %v2317_v35  ;;  %v2325_v42 = vadd.f32 1.0, %v2324_v7 }
 0x298   : > { %v2444_v41 = vclz %v2443_v23  ;;  %vm2557_vm11 = vc.u32 %v2555_v24, %v2551_v60  ;;  %v2550_v25 = vshrl.u32 %v2546_v26, 16  ;;  %v2568_v55 = vmul.u32 %v2566_v4, %v2541_v27 }
 0x299   : > { %v2558_v39 = vsel %vm2557_vm11, 1, %v6606_v31  ;;  %v2569_v17 = vmul.u32 %v2565_v50, %v2542_v15  ;;  %v2326_v54 = vmul.f32 %v2325_v42, %v5949_v49  ;;  %v2334_v20 = vxor.u32 2147483648, %v2318_v46 }
 0x29a   : > { %v3410_v0 = vadd.s32 4294967294, %v2444_v41  ;;  %v2560_v37 = vadd.s32 %v2558_v39, %v2556_v9  ;;  %v2552_v30 = vshrl.u32 %v2547_v10, 16  ;;  %v2567_v14 = vmul.u32 %v2565_v50, %v2541_v27 }
 0x29b   : > { %v2570_v62 = vmul.u32 %v2566_v4, %v2542_v15  ;;  %v2571_v51 = vshll.u32 %v2568_v55, 16  ;;  %v2331_v5 = vxor.u32 2147483648, %v2326_v54  ;;  %v2573_v48 = vshll.u32 %v2569_v17, 16 }
 0x29c   : > { %vm3411_vm14 = vcmp.lt.s32.totalorder %v3410_v0, 0  ;;  %v2561_v29 = vadd.s32 %v2560_v37, %v2550_v25  ;;  %v2335_v26 = vsel %vm2333_vm3, %v2334_v20, %v2326_v54  ;;  %v2831_v23 = vor.u32 %v5967_v28, %v5853_v38 }
 0x29d   : > { %v2447_v45 = vsel %vm3411_vm14, 0, %v3410_v0  ;;  %vm2575_vm1 = vc.u32 %v2567_v14, %v2571_v51  ;;  %v2577_v60 = vadd.s32 %v2571_v51, %v2567_v14  ;;  %v2332_v49 = vsel %vm2330_vm10, %v2318_v46, %v2331_v5  ;;  %v6731_v0 = vld [vmem:[#allocation16_spill] sm:$0xff] }
 0x29e   : > { %v2448_v12 = vsub.s32 32, %v2447_v45  ;;  %v2449_v35 = vshll.u32 %v5985_v33, %v2447_v45  ;;  %v2452_v10 = vsub.s32 4294967266, %v2447_v45  ;;  %v2336_v27 = vsel %vm2329_vm5, %v2332_v49, %v2335_v26 }
 0x29f   : > { %v6012_v15 = vadd.s32 %v2561_v29, %v2552_v30  ;;  %v2576_v50 = vsel %vm2575_vm1, 1, %v6606_v31  ;;  %vm2579_vm2 = vc.u32 %v2577_v60, %v2573_v48  ;;  %v2337_v4 = vsel %vm2327_vm7, nan, %v2336_v27 }
 0x2a0   : > { %v2450_v7 = vshrl.u32 %v5980_v6, %v2448_v12  ;;  %v2453_v24 = vadd.s32 127, %v2452_v10  ;;  %v2578_v9 = vadd.s32 %v2576_v50, %v2570_v62  ;;  %3023 = vmatmul.f32.gmra.mxu1 %v2337_v4  ;;  %v2572_v33 = vshrl.u32 %v2568_v55, 16  ;;  %v6730_v55 = vld [vmem:[#allocation12_spill] sm:$0xff] }
 0x2a1   : > { %v2580_v16 = vsel %vm2579_vm2, 1, %v6606_v31  ;;  %v6021_v46 = vadd.s32 %v2577_v60, %v2573_v48  ;;  %v2653_v21 = vand.u32 8388607, %v2646_v40  ;;  %v2462_v39 = vsub.s32 4, %v5975_v53 }
 0x2a2   : > { %v2451_v42 = vor.u32 %v2450_v7, %v2449_v35  ;;  %v2454_v41 = vshll.u32 %v2453_v24, 23  ;;  %v2582_v25 = vadd.s32 %v2580_v16, %v2578_v9  ;;  %v2531_v6 = vsel %vm2525_vm13, %v2528_v58, %v2530_v19 }
 0x2a3   : > { %v2574_v54 = vshrl.u32 %v2569_v17, 16  ;;  %vm2587_vm4 = vc.u32 %v6012_v15, %v6021_v46  ;;  %v2663_v20 = vshll.u32 %v6616_v52, %v6730_v55  ;;  %v2664_v37 = vshrl.u32 %v6617_v3, %v6731_v0 }
 0x2a4   : > { %v2455_v38 = vor.u32 4788187, %v2454_v41  ;;  %v2583_v28 = vadd.s32 %v2582_v25, %v2572_v33  ;;  %vm2835_vm15 = vcmp.lt.s32.totalorder %v5830_v18, 4  ;;  %v2666_v30 = vshll.u32 %v6617_v3, %v6730_v55 }
 0x2a5   : > { %v2667_v2 = vshrl.u32 %v6618_v36, %v6731_v0  ;;  %v2669_v58 = vshll.u32 %v6618_v36, %v6730_v55  ;;  %v2670_v19 = vshrl.u32 %v6584_v1, %v6731_v0  ;;  %v2458_v14 = vcvt.s32.f32 %v2451_v42 }
 0x2a6   : > { %v2456_v17 = vand.u32 2147483647, %v2455_v38  ;;  %v2584_v62 = vadd.s32 %v2583_v28, %v2574_v54  ;;  %v2654_v51 = vor.u32 8388608, %v2653_v21  ;;  %v6043_v5 = vor.u32 %v2664_v37, %v2663_v20 }
 0x2a7   : > { %v6045_v29 = vor.u32 %v2667_v2, %v2666_v30  ;;  %v2671_v48 = vor.u32 %v2670_v19, %v2669_v58  ;;  %vm2680_vm0 = vcmp.lt.s32.totalorder %v5232_v13, 3  ;;  %vm2678_vm12 = vcmp.lt.s32.totalorder %v5232_v13, 1 }
 0x2a8   : > { %v2459_v26 = vmul.f32 %v2458_v14, %v2456_v17  ;;  %v2588_v45 = vadd.s32 1, %v2584_v62  ;;  %v2692_v60 = vsel %vm2680_vm0, %v5454_v63, %v5827_v43  ;;  %vm6055_vm13 = vcmp.le.f32.partialorder %v2338_v57, 0.7853982 }
 0x2a9   : > { %vm2340_vm3 = vcmp.lt.s32.totalorder %v6716_v47, 0  ;;  %v2585_v12 = vmul.u32 %v5957_v59, %v2531_v6  ;;  %v2690_v35 = vsel %vm2678_vm12, %v6045_v29, %v2671_v48  ;;  %vm2679_vm9 = vcmp.lt.s32.totalorder %v5232_v13, 2 }
 0x2aa   : > { %v2460_v10 = vxor.u32 2147483648, %v2459_v26  ;;  %v2463_v27 = vsel %vm2340_vm3, %v2462_v39, %v5975_v53  ;;  %v2589_v63 = vsel %vm2587_vm4, %v2588_v45, %v2584_v62  ;;  %v2686_v43 = vsel %vm2678_vm12, %v6043_v5, %v6045_v29 }
 0x2ab   : > { %v2590_v57 = vadd.s32 %v2589_v63, %v2585_v12  ;;  %v2693_v59 = vsel %vm2679_vm9, %v2690_v35, %v2692_v60  ;;  %v6075_v50 = vshll.u32 %v2654_v51, 8  ;;  %v2688_v53 = vsel %vm2680_vm0, %v2671_v48, %v5686_v8 }
 0x2ac   : > { %v2461_v4 = vsel %vm2340_vm3, %v2460_v10, %v2459_v26  ;;  %v2697_v7 = vand.u32 65535, %v2693_v59  ;;  %v2698_v24 = vshrl.u32 %v2693_v59, 16  ;;  %v2465_v33 = vsel %vm6055_vm13, 0, %v2463_v27 }
 0x2ad   : > { %v2464_v9 = vsel %vm6055_vm13, %v6716_v47, %v2461_v4  ;;  %v2591_v16 = vadd.s32 536870912, %v2590_v57  ;;  %v2695_v42 = vand.u32 65535, %v6075_v50  ;;  %v6089_v41 = vsel %vm2835_vm15, %v5971_v56, 920167782 }
 0x2ae   : > { %v2466_v25 = vmul.f32 %v2464_v9, %v2464_v9  ;;  %v2696_v8 = vshrl.u32 %v6075_v50, 16  ;;  %v6094_v21 = vsel %vm2835_vm15, %v2831_v23, 1326507024  ;;  %v2689_v6 = vsel %vm2679_vm9, %v2686_v43, %v2688_v53 }
 0x2af   : > { %v6096_v39 = vshrl.u32 %v2591_v16, 30  ;;  %v6100_v54 = vmul.u32 %v2698_v24, %v2695_v42  ;;  %v6102_v55 = vand.u32 3, %v2465_v33  ;;  %v2683_v30 = vsel %vm2681_vm8, %v2671_v48, 2102212464 }
 0x2b0   : > { %v2467_v38 = vmul.f32 -0.001358992, %v2466_v25  ;;  %v2474_v28 = vmul.f32 -0.00019511016, %v2466_v25  ;;  %v6104_v20 = vmul.u32 %v2697_v7, %v2696_v8  ;;  %v2699_v23 = vmul.u32 %v2697_v7, %v2695_v42 }
 0x2b1   : > { %v2593_v37 = vshll.u32 %v6096_v39, 30  ;;  %v2703_v2 = vshll.u32 %v6100_v54, 16  ;;  %v2662_v17 = vshrl.u32 %v6616_v52, %v6731_v0  ;;  %v2720_v14 = vshrl.u32 %v2689_v6, 16 }
 0x2b2   : > { %v2468_v58 = vadd.f32 0.041655596, %v2467_v38  ;;  %v2475_v19 = vadd.f32 0.008332121, %v2474_v28  ;;  %v2702_v51 = vmul.u32 %v2698_v24, %v2696_v8  ;;  %v2705_v49 = vshll.u32 %v6104_v20, 16 }
 0x2b3   : > { %v6112_v62 = vsub.s32 %v2590_v57, %v2593_v37  ;;  %vm2707_vm10 = vc.u32 %v2699_v23, %v2703_v2  ;;  %v2709_v26 = vadd.s32 %v2703_v2, %v2699_v23  ;;  %v2719_v10 = vand.u32 65535, %v2689_v6 }
 0x2b4   : > { %v2469_v45 = vmul.f32 %v2468_v58, %v2466_v25  ;;  %v2476_v60 = vmul.f32 %v2475_v19, %v2466_v25  ;;  %v2708_v48 = vsel %vm2707_vm10, 1, %v6606_v31  ;;  %v2722_v63 = vmul.u32 %v2720_v14, %v2695_v42 }
 0x2b5   : > { %vm2595_vm8 = vcmp.lt.s32.totalorder %v6112_v62, 0  ;;  %v2596_v12 = vsub.s32 0, %v6112_v62  ;;  %v2710_v35 = vadd.s32 %v2708_v48, %v2702_v51  ;;  %vm2711_vm6 = vc.u32 %v2709_v26, %v2705_v49 }
 0x2b6   : > { %v2470_v27 = vadd.f32 -0.4999988, %v2469_v45  ;;  %v2477_v0 = vadd.f32 -0.16666654, %v2476_v60  ;;  %vm2484_vm5 = vcmp.eq.s32.totalorder %v6102_v55, 0  ;;  %vm2487_vm7 = vcmp.eq.s32.totalorder %v6102_v55, 2 }
 0x2b7   : > { %v2597_v57 = vsel %vm2595_vm8, %v2596_v12, %v6112_v62  ;;  %v2682_v43 = vsel %vm2678_vm12, %v2662_v17, %v6043_v5  ;;  %v2684_v59 = vsel %vm2680_vm0, %v6045_v29, %v2683_v30  ;;  %vm2483_vm11 = vcmp.lt.s32.totalorder %v6102_v55, 2 }
 0x2b8   : > { %v2471_v4 = vmul.f32 %v2470_v27, %v2466_v25  ;;  %v2478_v53 = vmul.f32 %v2477_v0, %v2466_v25  ;;  %v2598_v7 = vclz %v2597_v57  ;;  %v2712_v24 = vsel %vm2711_vm6, 1, %v6606_v31 }
 0x2b9   : > { %vm2481_vm14 = vweird.f32 %v6716_v47  ;;  %v2586_v33 = vadd.s32 %v6021_v46, %v6012_v15  ;;  %v2721_v16 = vmul.u32 %v2719_v10, %v2695_v42  ;;  %v2723_v6 = vmul.u32 %v2719_v10, %v2696_v8  ;;  %v3070_v47 = vld [vmem:[%s6459_s5 + $0x78] sm:$0xff] }
 0x2ba   : > { %v2725_v38 = vshll.u32 %v2722_v63, 16  ;;  %v2472_v5 = vadd.f32 1.0, %v2471_v4  ;;  %v2479_v28 = vadd.f32 1.0, %v2478_v53  ;;  %v3413_v37 = vadd.s32 4294967294, %v2598_v7  ;;  %v3069_v53 = vld [vmem:[%s6459_s5 + $0x70] sm:$0xff]  ;;  %3075 = vmatpush.msra.mxu2 %v3070_v47 }
 0x2bb   : > { %v2714_v23 = vadd.s32 %v2712_v24, %v2710_v35  ;;  %v6134_v29 = vsel %vm2679_vm9, %v2682_v43, %v2684_v59  ;;  %v2704_v25 = vshrl.u32 %v6100_v54, 16  ;;  %v2724_v30 = vmul.u32 %v2720_v14, %v2696_v8 }
 0x2bc   : > { %vm2729_vm1 = vc.u32 %v2721_v16, %v2725_v38  ;;  %v2480_v2 = vmul.f32 %v2479_v28, %v2464_v9  ;;  %v2488_v58 = vxor.u32 2147483648, %v2472_v5  ;;  %vm3414_vm2 = vcmp.lt.s32.totalorder %v3413_v37, 0  ;;  %3076 = vmatpush.msra.mxu2 %v3069_v53 }
 0x2bd   : > { %v2730_v15 = vsel %vm2729_vm1, 1, %v6606_v31  ;;  %v2601_v46 = vsel %vm3414_vm2, 0, %v3413_v37  ;;  %v2727_v42 = vshll.u32 %v2723_v6, 16  ;;  %v2731_v19 = vadd.s32 %v2725_v38, %v2721_v16 }
 0x2be   : > { %v2732_v17 = vadd.s32 %v2730_v15, %v2724_v30  ;;  %v2485_v51 = vxor.u32 2147483648, %v2480_v2  ;;  %v2602_v26 = vsub.s32 32, %v2601_v46  ;;  %v2706_v45 = vshrl.u32 %v6104_v20, 16 }
 0x2bf   : > { %v2715_v13 = vadd.s32 %v2714_v23, %v2704_v25  ;;  %v2606_v60 = vsub.s32 4294967266, %v2601_v46  ;;  %v2726_v49 = vshrl.u32 %v2722_v63, 16  ;;  %vm2733_vm4 = vc.u32 %v2731_v19, %v2727_v42 }
 0x2c0   : > { %v2800_v8 = vand.u32 2147483647, %v5338_v34  ;;  %v2486_v9 = vsel %vm2484_vm5, %v2472_v5, %v2485_v51  ;;  %v2489_v54 = vsel %vm2487_vm7, %v2488_v58, %v2480_v2  ;;  %v2604_v14 = vshrl.u32 %v2586_v33, %v2602_v26  ;;  %v3068_v5 = vld [vmem:[%s6459_s5 + $0x68] sm:$0xff]  ;;  %v3067_v2 = vld [vmem:[%s6459_s5 + $0x60] sm:$0xff] }
 0x2c1   : > { %v2734_v48 = vsel %vm2733_vm4, 1, %v6606_v31  ;;  %v2490_v12 = vsel %vm2483_vm11, %v2486_v9, %v2489_v54  ;;  %v2603_v20 = vshll.u32 %v6112_v62, %v2601_v46  ;;  %v2607_v35 = vadd.s32 127, %v2606_v60  ;;  %3077 = vmatpush.msra.mxu2 %v3068_v5 }
 0x2c2   : > { %v2736_v10 = vadd.s32 %v2734_v48, %v2732_v17  ;;  %v2491_v27 = vsel %vm2481_vm14, nan, %v2490_v12  ;;  %v6150_v0 = vadd.s32 %v2715_v13, %v2706_v45  ;;  %v2728_v63 = vshrl.u32 %v2723_v6, 16 }
 0x2c3   : > { %v2739_v57 = vmul.u32 %v6075_v50, %v6134_v29  ;;  %3026 = vmatmul.f32.gmra.mxu1 %v2491_v27  ;;  %v2605_v43 = vor.u32 %v2604_v14, %v2603_v20  ;;  %v2608_v59 = vshll.u32 %v2607_v35, 23  ;;  %v2807_v55 = vand.u32 8388607, %v2800_v8  ;;  %3078 = vmatpush.msra.mxu2 %v3067_v2 }
 0x2c4   : > { %v2737_v4 = vadd.s32 %v2736_v10, %v2726_v49  ;;  %v2616_v62 = vsub.s32 4, %v6096_v39  ;;  %v6163_v7 = vadd.s32 %v2731_v19, %v2727_v42  ;;  %v2818_v50 = vshrl.u32 %v6617_v3, %v5840_v44 }
 0x2c5   : > { %v2820_v24 = vshll.u32 %v6617_v3, %v5725_v22  ;;  %v2609_v33 = vor.u32 4788187, %v2608_v59  ;;  %v2808_v6 = vor.u32 8388608, %v2807_v55  ;;  %v2821_v38 = vshrl.u32 %v6618_v36, %v5840_v44 }
 0x2c6   : > { %v2738_v16 = vadd.s32 %v2737_v4, %v2728_v63  ;;  %vm2741_vm0 = vc.u32 %v6150_v0, %v6163_v7  ;;  %v2817_v28 = vshll.u32 %v6616_v52, %v5725_v22  ;;  %v2823_v3 = vshll.u32 %v6618_v36, %v5725_v22 }
 0x2c7   : > { %v2824_v37 = vshrl.u32 %v6584_v1, %v5840_v44  ;;  %v2610_v23 = vand.u32 2147483647, %v2609_v33  ;;  %v2612_v29 = vcvt.s32.f32 %v2605_v43  ;;  %v6182_v30 = vor.u32 %v2821_v38, %v2820_v24 }
 0x2c8   : > { %v2742_v25 = vadd.s32 1, %v2738_v16  ;;  %v6187_v58 = vor.u32 %v2818_v50, %v2817_v28  ;;  %vm2832_vm12 = vcmp.lt.s32.totalorder %v5830_v18, 1  ;;  %vm2834_vm13 = vcmp.lt.s32.totalorder %v5830_v18, 3 }
 0x2c9   : > { %v6189_v15 = vor.u32 %v2824_v37, %v2823_v3  ;;  %v2613_v36 = vmul.f32 %v2612_v29, %v2610_v23  ;;  %v2846_v22 = vsel %vm2834_vm13, %v5971_v56, %v6094_v21  ;;  %v6200_v46 = vshll.u32 %v2808_v6, 8 }
 0x2ca   : > { %v2743_v1 = vsel %vm2741_vm0, %v2742_v25, %v2738_v16  ;;  %vm2494_vm3 = vcmp.lt.s32.totalorder %v6721_v11, 0  ;;  %vm2833_vm9 = vcmp.lt.s32.totalorder %v5830_v18, 2  ;;  %vm6213_vm10 = vcmp.le.f32.partialorder %v2492_v61, 0.7853982 }
 0x2cb   : > { %v2744_v42 = vadd.s32 %v2743_v1, %v2739_v57  ;;  %v2844_v19 = vsel %vm2832_vm12, %v6182_v30, %v6189_v15  ;;  %v2614_v17 = vxor.u32 2147483648, %v2613_v36  ;;  %v2617_v51 = vsel %vm2494_vm3, %v2616_v62, %v6096_v39 }
 0x2cc   : > { %v2847_v26 = vsel %vm2833_vm9, %v2844_v19, %v2846_v22  ;;  %v2840_v45 = vsel %vm2832_vm12, %v6187_v58, %v6182_v30  ;;  %v2842_v39 = vsel %vm2834_vm13, %v6189_v15, %v6089_v41  ;;  %v2849_v60 = vand.u32 65535, %v6200_v46 }
 0x2cd   : > { %v2745_v21 = vadd.s32 536870912, %v2744_v42  ;;  %v2615_v13 = vsel %vm2494_vm3, %v2614_v17, %v2613_v36  ;;  %v2851_v49 = vand.u32 65535, %v2847_v26  ;;  %v2852_v9 = vshrl.u32 %v2847_v26, 16 }
 0x2ce   : > { %v2618_v61 = vsel %vm6213_vm10, %v6721_v11, %v2615_v13  ;;  %v2619_v54 = vsel %vm6213_vm10, 0, %v2617_v51  ;;  %v2843_v12 = vsel %vm2833_vm9, %v2840_v45, %v2842_v39  ;;  %v2850_v41 = vshrl.u32 %v6200_v46, 16 }
 0x2cf   : > { %v6231_v14 = vshrl.u32 %v2745_v21, 30  ;;  %v2620_v48 = vmul.f32 %v2618_v61, %v2618_v61  ;;  %v2854_v20 = vmul.u32 %v2852_v9, %v2849_v60  ;;  %v2853_v10 = vmul.u32 %v2851_v49, %v2849_v60 }
 0x2d0   : > { %v6237_v57 = vmul.u32 %v2851_v49, %v2850_v41  ;;  %v6239_v59 = vand.u32 3, %v2619_v54  ;;  %v2873_v55 = vand.u32 65535, %v2843_v12  ;;  %v2874_v53 = vshrl.u32 %v2843_v12, 16 }
 0x2d1   : > { %v2747_v35 = vshll.u32 %v6231_v14, 30  ;;  %v2621_v27 = vmul.f32 -0.001358992, %v2620_v48  ;;  %v2628_v63 = vmul.f32 -0.00019511016, %v2620_v48  ;;  %v2857_v43 = vshll.u32 %v2854_v20, 16 }
 0x2d2   : > { %v2856_v24 = vmul.u32 %v2852_v9, %v2850_v41  ;;  %v2859_v38 = vshll.u32 %v6237_v57, 16  ;;  %v2816_v3 = vshrl.u32 %v6616_v52, %v5840_v44  ;;  %vm2638_vm7 = vcmp.eq.s32.totalorder %v6239_v59, 0 }
 0x2d3   : > { %v6241_v4 = vsub.s32 %v2744_v42, %v2747_v35  ;;  %v2622_v62 = vadd.f32 0.041655596, %v2621_v27  ;;  %v2629_v47 = vadd.f32 0.008332121, %v2628_v63  ;;  %vm2861_vm8 = vc.u32 %v2853_v10, %v2857_v43 }
 0x2d4   : > { %v2862_v33 = vsel %vm2861_vm8, 1, %v6606_v31  ;;  %v2863_v5 = vadd.s32 %v2857_v43, %v2853_v10  ;;  %vm2641_vm11 = vcmp.eq.s32.totalorder %v6239_v59, 2  ;;  %v2740_v2 = vadd.s32 %v6163_v7, %v6150_v0 }
 0x2d5   : > { %vm2749_vm6 = vcmp.lt.s32.totalorder %v6241_v4, 0  ;;  %v2750_v50 = vsub.s32 0, %v6241_v4  ;;  %v2623_v16 = vmul.f32 %v2622_v62, %v2620_v48  ;;  %v2630_v6 = vmul.f32 %v2629_v47, %v2620_v48 }
 0x2d6   : > { %v2864_v37 = vadd.s32 %v2862_v33, %v2856_v24  ;;  %vm2865_vm5 = vc.u32 %v2863_v5, %v2859_v38  ;;  %v2876_v1 = vmul.u32 %v2874_v53, %v2849_v60  ;;  %v2877_v22 = vmul.u32 %v2873_v55, %v2850_v41  ;;  %v3064_v38 = vld [vmem:[%s6459_s5 + $0x48] sm:$0xff] }
 0x2d7   : > { %v2751_v28 = vsel %vm2749_vm6, %v2750_v50, %v6241_v4  ;;  %v2624_v23 = vadd.f32 -0.4999988, %v2623_v16  ;;  %v2631_v29 = vadd.f32 -0.16666654, %v2630_v6  ;;  %v2866_v36 = vsel %vm2865_vm5, 1, %v6606_v31 }
 0x2d8   : > { %v2752_v25 = vclz %v2751_v28  ;;  %vm2637_vm14 = vcmp.lt.s32.totalorder %v6239_v59, 2  ;;  %v2836_v44 = vsel %vm2832_vm12, %v2816_v3, %v6187_v58  ;;  %vm2635_vm1 = vweird.f32 %v6721_v11 }
 0x2d9   : > { %v2625_v42 = vmul.f32 %v2624_v23, %v2620_v48  ;;  %v2632_v19 = vmul.f32 %v2631_v29, %v2620_v48  ;;  %v2837_v17 = vsel %vm2835_vm15, %v6189_v15, 2102212464  ;;  %v2868_v0 = vadd.s32 %v2866_v36, %v2864_v37  ;;  %v3063_v37 = vld [vmem:[%s6459_s5 + $0x40] sm:$0xff] }
 0x2da   : > { %v3416_v52 = vadd.s32 4294967294, %v2752_v25  ;;  %v2875_v7 = vmul.u32 %v2873_v55, %v2849_v60  ;;  %v2879_v51 = vshll.u32 %v2876_v1, 16  ;;  %v2858_v21 = vshrl.u32 %v2854_v20, 16 }
 0x2db   : > { %v2626_v26 = vadd.f32 1.0, %v2625_v42  ;;  %v2633_v56 = vadd.f32 1.0, %v2632_v19  ;;  %v2881_v39 = vshll.u32 %v2877_v22, 16  ;;  %v2878_v54 = vmul.u32 %v2874_v53, %v2850_v41 }
 0x2dc   : > { %vm3417_vm2 = vcmp.lt.s32.totalorder %v3416_v52, 0  ;;  %vm2883_vm4 = vc.u32 %v2875_v7, %v2879_v51  ;;  %v2885_v13 = vadd.s32 %v2879_v51, %v2875_v7  ;;  %v2869_v12 = vadd.s32 %v2868_v0, %v2858_v21 }
 0x2dd   : > { %v2755_v45 = vsel %vm3417_vm2, 0, %v3416_v52  ;;  %v2634_v49 = vmul.f32 %v2633_v56, %v2618_v61  ;;  %v2642_v9 = vxor.u32 2147483648, %v2626_v26  ;;  %v2884_v35 = vsel %vm2883_vm4, 1, %v6606_v31 }
 0x2de   : > { %v2756_v58 = vsub.s32 32, %v2755_v45  ;;  %v2760_v48 = vsub.s32 4294967266, %v2755_v45  ;;  %vm2887_vm15 = vc.u32 %v2885_v13, %v2881_v39  ;;  %v2838_v10 = vsel %vm2834_vm13, %v6182_v30, %v2837_v17 }
 0x2df   : > { %v2639_v15 = vxor.u32 2147483648, %v2634_v49  ;;  %v2886_v20 = vadd.s32 %v2884_v35, %v2878_v54  ;;  %v2757_v27 = vshll.u32 %v6241_v4, %v2755_v45  ;;  %v2860_v61 = vshrl.u32 %v6237_v57, 16  ;;  %v3065_v57 = vld [vmem:[%s6459_s5 + $0x50] sm:$0xff] }
 0x2e0   : > { %v2758_v60 = vshrl.u32 %v2740_v2, %v2756_v58  ;;  %v2761_v63 = vadd.s32 127, %v2760_v48  ;;  %v2888_v43 = vsel %vm2887_vm15, 1, %v6606_v31  ;;  %v2643_v55 = vsel %vm2641_vm11, %v2642_v9, %v2634_v49  ;;  %v3066_v31 = vld [vmem:[%s6459_s5 + $0x58] sm:$0xff] }
 0x2e1   : > { %v2640_v41 = vsel %vm2638_vm7, %v2626_v26, %v2639_v15  ;;  %v2880_v62 = vshrl.u32 %v2876_v1, 16  ;;  %v2890_v47 = vadd.s32 %v2888_v43, %v2886_v20  ;;  %v2870_v24 = vadd.s32 %v2869_v12, %v2860_v61  ;;  %3079 = vmatpush.msra.mxu2 %v3066_v31 }
 0x2e2   : > { %v2644_v53 = vsel %vm2637_vm14, %v2640_v41, %v2643_v55  ;;  %v2759_v30 = vor.u32 %v2758_v60, %v2757_v27  ;;  %v2762_v50 = vshll.u32 %v2761_v63, 23  ;;  %v2882_v33 = vshrl.u32 %v2877_v22, 16 }
 0x2e3   : > { %v2645_v4 = vsel %vm2635_vm1, nan, %v2644_v53  ;;  %v2891_v16 = vadd.s32 %v2890_v47, %v2880_v62  ;;  %v2889_v59 = vadd.s32 %v2885_v13, %v2881_v39  ;;  %v2839_v11 = vsel %vm2833_vm9, %v2836_v44, %v2838_v10  ;;  %3080 = vmatpush.msra.mxu2 %v3065_v57 }
 0x2e4   : > { %3029 = vmatmul.f32.gmra.mxu1 %v2645_v4  ;;  %v2763_v6 = vor.u32 4788187, %v2762_v50  ;;  %v2766_v3 = vcvt.s32.f32 %v2759_v30  ;;  %v2893_v25 = vmul.u32 %v6200_v46, %v2839_v11  ;;  %vm2648_vm12 = vcmp.lt.s32.totalorder %v6729_v32, 0 }
 0x2e5   : > { %v2892_v5 = vadd.s32 %v2891_v16, %v2882_v33  ;;  %vm2895_vm0 = vc.u32 %v2870_v24, %v2889_v59  ;;  %3081 = vmatpush.msra.mxu2 %v3064_v38  ;;  %vm6296_vm13 = vcmp.le.f32.partialorder %v2646_v40, 0.7853982  ;;  %v2770_v44 = vsub.s32 4, %v6231_v14  ;;  %v3061_v33 = vld [vmem:[%s6459_s5 + $0x30] sm:$0xff]  ;;  %v2991_v16 = vpop.f32.mrf.mxu0  ;;  %v3060_v38 = vld [vmem:[%s6459_s5 + $0x28] sm:$0xff] }
 0x2e6   : > { %v2764_v28 = vand.u32 2147483647, %v2763_v6  ;;  %v2894_v63 = vadd.s32 %v2889_v59, %v2870_v24  ;;  %vm2789_vm5 = vweird.f32 %v6729_v32  ;;  %v3062_v24 = vld [vmem:[%s6459_s5 + $0x38] sm:$0xff]  ;;  %v2994_v6 = vpop.f32.mrf.mxu1  ;;  %vm2802_vm7 = vcmp.lt.s32.totalorder %v5338_v34, 0 }
 0x2e7   : > { %v2896_v23 = vadd.s32 1, %v2892_v5  ;;  %3082 = vmatpush.msra.mxu2 %v3063_v37  ;;  %v2771_v56 = vsel %vm2648_vm12, %v2770_v44, %v6231_v14  ;;  %vm6338_vm11 = vcmp.le.f32.partialorder %v2800_v8, 0.7853982  ;;  %v3055_v8 = vld [vmem:[%s6459_s5] sm:$0xff]  ;;  %vm2943_vm4 = vweird.f32 %v5338_v34 }
 0x2e8   : > { %v2767_v29 = vmul.f32 %v2766_v3, %v2764_v28  ;;  %v2773_v58 = vsel %vm6296_vm13, 0, %v2771_v56  ;;  %v3059_v3 = vld [vmem:[%s6459_s5 + $0x20] sm:$0xff] }
 0x2e9   : > { %v2897_v2 = vsel %vm2895_vm0, %v2896_v23, %v2892_v5  ;;  %v2790_v10 = vand.u32 3, %v2773_v58  ;;  %3083 = vmatpush.msra.mxu2 %v3062_v24  ;;  %v3058_v23 = vld [vmem:[%s6459_s5 + $0x18] sm:$0xff] }
 0x2ea   : > { %v2768_v36 = vxor.u32 2147483648, %v2767_v29  ;;  %v2898_v1 = vadd.s32 %v2897_v2, %v2893_v25  ;;  %v3057_v25 = vld [vmem:[%s6459_s5 + $0x10] sm:$0xff] }
 0x2eb   : > { %vm2792_vm10 = vcmp.eq.s32.totalorder %v2790_v10, 0  ;;  %vm2795_vm8 = vcmp.eq.s32.totalorder %v2790_v10, 2  ;;  %vm2791_vm6 = vcmp.lt.s32.totalorder %v2790_v10, 2  ;;  %3084 = vmatpush.msra.mxu2 %v3061_v33 }
 0x2ec   : > { %v2769_v22 = vsel %vm2648_vm12, %v2768_v36, %v2767_v29  ;;  %v2899_v42 = vadd.s32 536870912, %v2898_v1 }
 0x2ed   : > { %v2772_v19 = vsel %vm6296_vm13, %v6729_v32, %v2769_v22  ;;  %v6320_v32 = vld [vmem:[%s6458_s4] ss:$0 sm:$0xff]  ;;  %3085 = vmatpush.msra.mxu2 %v3060_v38  ;;  %v3056_v22 = vld [vmem:[%s6459_s5 + $0x8] sm:$0xff] }
 0x2ee   : > { %v2774_v52 = vmul.f32 %v2772_v19, %v2772_v19  ;;  %v6303_v46 = vshrl.u32 %v2899_v42, 30  ;;  %v2992_v28 = vadd.f32 %v6320_v32, %v2991_v16  ;;  %v2997_v2 = vpop.f32.mrf.mxu1 }
 0x2ef   : > { %3086 = vmatpush.msra.mxu2 %v3059_v3 }
 0x2f0   : > { %v2775_v17 = vmul.f32 -0.001358992, %v2774_v52  ;;  %v2782_v0 = vmul.f32 -0.00019511016, %v2774_v52  ;;  %v2901_v7 = vshll.u32 %v6303_v46, 30  ;;  %3508 = vtanh.f32 %v2992_v28 }
 0x2f1   : > { %3087 = vmatpush.msra.mxu2 %v3058_v23 }
 0x2f2   : > { %v2776_v51 = vadd.f32 0.041655596, %v2775_v17  ;;  %v2783_v40 = vadd.f32 0.008332121, %v2782_v0  ;;  %v2902_v26 = vsub.s32 %v2898_v1, %v2901_v7  ;;  %v2924_v0 = vsub.s32 4, %v6303_v46 }
 0x2f3   : > { %3088 = vmatpush.msra.mxu2 %v3057_v25 }
 0x2f4   : > { %v2777_v21 = vmul.f32 %v2776_v51, %v2774_v52  ;;  %v2784_v45 = vmul.f32 %v2783_v40, %v2774_v52  ;;  %vm2903_vm3 = vcmp.lt.s32.totalorder %v2902_v26, 0  ;;  %v2904_v39 = vsub.s32 0, %v2902_v26 }
 0x2f5   : > { %3089 = vmatpush.msra.mxu2 %v3056_v22 }
 0x2f6   : > { %v2778_v13 = vadd.f32 -0.4999988, %v2777_v21  ;;  %v2785_v49 = vadd.f32 -0.16666654, %v2784_v45  ;;  %v2905_v9 = vsel %vm2903_vm3, %v2904_v39, %v2902_v26  ;;  %v3000_v40 = vpop.f32.mrf.mxu1  ;;  %v2925_v21 = vsel %vm2802_vm7, %v2924_v0, %v6303_v46  ;;  %v3167_v0 = vld [vmem:[#allocation2 + $0x58] sm:$0xff] }
 0x2f7   : > { %v2906_v54 = vclz %v2905_v9  ;;  %3090 = vmatpush.msra.mxu2 %v3055_v8  ;;  %v2927_v9 = vsel %vm6338_vm11, 0, %v2925_v21  ;;  %v3001_v46 = vadd.f32 %v6320_v32, %v3000_v40  ;;  %v3171_v8 = vld [vmem:[#allocation2 + $0x78] sm:$0xff]  ;;  %v3165_v40 = vld [vmem:[#allocation2 + $0x48] sm:$0xff]  ;;  %v3162_v21 = vld [vmem:[#allocation2 + $0x30] sm:$0xff] }
 0x2f8   : > { %v2779_v48 = vmul.f32 %v2778_v13, %v2774_v52  ;;  %v2786_v12 = vmul.f32 %v2785_v49, %v2774_v52  ;;  %v3509_v52 = vpop.eup %3508  ;;  %v2998_v13 = vadd.f32 %v6320_v32, %v2997_v2  ;;  %3176 = vmatpush.msra.mxu3 %v3171_v8 }
 0x2f9   : > { %v3419_v35 = vadd.s32 4294967294, %v2906_v54  ;;  %3091 = vmatmul.f32.vlgmr.msra.gmra.mxu2 %v3509_v52  ;;  %v3170_v52 = vld [vmem:[#allocation2 + $0x70] sm:$0xff] }
 0x2fa   : > { %v2780_v15 = vadd.f32 1.0, %v2779_v48  ;;  %v2787_v60 = vadd.f32 1.0, %v2786_v12  ;;  %3177 = vmatpush.msra.mxu3 %v3170_v52 }
 0x2fb   : > { %vm3420_vm9 = vcmp.lt.s32.totalorder %v3419_v35, 0 }
 0x2fc   : > { %v2788_v20 = vmul.f32 %v2787_v60, %v2772_v19  ;;  %v2796_v14 = vxor.u32 2147483648, %v2780_v15  ;;  %v2909_v27 = vsel %vm3420_vm9, 0, %v3419_v35  ;;  %v2995_v19 = vadd.f32 %v6320_v32, %v2994_v6 }
 0x2fd   : > { %v2910_v61 = vsub.s32 32, %v2909_v27  ;;  %v2914_v43 = vsub.s32 4294967266, %v2909_v27  ;;  %v2911_v55 = vshll.u32 %v2902_v26, %v2909_v27  ;;  %v2944_v35 = vand.u32 3, %v2927_v9  ;;  %v3160_v9 = vld [vmem:[#allocation2 + $0x20] sm:$0xff] }
 0x2fe   : > { %v2793_v41 = vxor.u32 2147483648, %v2788_v20  ;;  %v2797_v30 = vsel %vm2795_vm8, %v2796_v14, %v2788_v20  ;;  %3510 = vtanh.f32 %v2995_v19 }
 0x2ff   : > { %v2912_v62 = vshrl.u32 %v2894_v63, %v2910_v61  ;;  %v2915_v47 = vadd.s32 127, %v2914_v43  ;;  %3512 = vtanh.f32 %v2998_v13  ;;  %vm2946_vm14 = vcmp.eq.s32.totalorder %v2944_v35, 0 }
 0x300   : > { %v2794_v53 = vsel %vm2792_vm10, %v2780_v15, %v2793_v41  ;;  %v3003_v15 = vpop.f32.mrf.mxu1  ;;  %vm2949_vm1 = vcmp.eq.s32.totalorder %v2944_v35, 2  ;;  %vm2945_vm2 = vcmp.lt.s32.totalorder %v2944_v35, 2  ;;  %3514 = vtanh.f32 %v3001_v46 }
 0x301   : > { %v2798_v50 = vsel %vm2791_vm6, %v2794_v53, %v2797_v30  ;;  %v2913_v4 = vor.u32 %v2912_v62, %v2911_v55  ;;  %v2916_v31 = vshll.u32 %v2915_v47, 23  ;;  %v3004_v55 = vadd.f32 %v6320_v32, %v3003_v15  ;;  %v3156_v15 = vld [vmem:[#allocation2] sm:$0xff] }
 0x302   : > { %v2799_v57 = vsel %vm2789_vm5, nan, %v2798_v50 }
 0x303   : > { %3032 = vmatmul.f32.gmra.mxu1 %v2799_v57  ;;  %v2917_v59 = vor.u32 4788187, %v2916_v31  ;;  %v2920_v5 = vcvt.s32.f32 %v2913_v4  ;;  %3516 = vtanh.f32 %v3004_v55 }
 0x304   : > { %v3511_v49 = vpop.eup %3510 }
 0x305   : > { %v2918_v11 = vand.u32 2147483647, %v2917_v59  ;;  %3094 = vmatmul.f32.gmra.mxu2 %v3511_v49  ;;  %v3513_v14 = vpop.eup %3512 }
 0x306   : > { %v3515_v62 = vpop.eup %3514 }
 0x307   : > { %v2921_v37 = vmul.f32 %v2920_v5, %v2918_v11 }
 0x308   : > { %v3006_v41 = vpop.f32.mrf.mxu1 }
 0x309   : > { %v2922_v29 = vxor.u32 2147483648, %v2921_v37  ;;  %v3007_v53 = vadd.f32 %v6320_v32, %v3006_v41  ;;  %v3517_v30 = vpop.eup %3516 }
 0x30b   : > { %v2923_v1 = vsel %vm2802_vm7, %v2922_v29, %v2921_v37  ;;  %3518 = vtanh.f32 %v3007_v53 }
 0x30c   : > { %v2926_v18 = vsel %vm6338_vm11, %v5338_v34, %v2923_v1 }
 0x30d   : > { %v2928_v42 = vmul.f32 %v2926_v18, %v2926_v18  ;;  %3097 = vmatmul.f32.gmra.mxu2 %v3513_v14 }
 0x30f   : > { %v2929_v44 = vmul.f32 -0.001358992, %v2928_v42  ;;  %v2936_v17 = vmul.f32 -0.00019511016, %v2928_v42 }
 0x310   : > { %v3009_v47 = vpop.f32.mrf.mxu1 }
 0x311   : > { %v2930_v7 = vadd.f32 0.041655596, %v2929_v44  ;;  %v2937_v51 = vadd.f32 0.008332121, %v2936_v17  ;;  %v3010_v34 = vadd.f32 %v6320_v32, %v3009_v47  ;;  %v3519_v4 = vpop.eup %3518  ;;  %v3169_v44 = vld [vmem:[#allocation2 + $0x68] sm:$0xff]  ;;  %v3168_v17 = vld [vmem:[#allocation2 + $0x60] sm:$0xff] }
 0x312   : > { %3178 = vmatpush.msra.mxu3 %v3169_v44  ;;  %v3507_v44 = vld [vmem:[%s6462_s8] ss:$0 sm:$0xff] }
 0x313   : > { %v2931_v26 = vmul.f32 %v2930_v7, %v2928_v42  ;;  %v2938_v56 = vmul.f32 %v2937_v51, %v2928_v42  ;;  %3520 = vtanh.f32 %v3010_v34  ;;  %v3166_v51 = vld [vmem:[#allocation2 + $0x50] sm:$0xff] }
 0x314   : > { %3179 = vmatpush.msra.mxu3 %v3168_v17 }
 0x315   : > { %v2932_v45 = vadd.f32 -0.4999988, %v2931_v26  ;;  %v2939_v39 = vadd.f32 -0.16666654, %v2938_v56  ;;  %3100 = vmatmul.f32.gmra.mxu2 %v3515_v62  ;;  %v3164_v26 = vld [vmem:[#allocation2 + $0x40] sm:$0xff]  ;;  %v3163_v56 = vld [vmem:[#allocation2 + $0x38] sm:$0xff] }
 0x316   : > { %3180 = vmatpush.msra.mxu3 %v3167_v0 }
 0x317   : > { %v2933_v58 = vmul.f32 %v2932_v45, %v2928_v42  ;;  %v2940_v54 = vmul.f32 %v2939_v39, %v2928_v42  ;;  %v6377_v45 = vld [vmem:[%s6460_s6] ss:$0 sm:$0xff]  ;;  %v3161_v39 = vld [vmem:[#allocation2 + $0x28] sm:$0xff] }
 0x318   : > { %v3012_v50 = vpop.f32.mrf.mxu1  ;;  %3181 = vmatpush.msra.mxu3 %v3166_v51 }
 0x319   : > { %v2934_v48 = vadd.f32 1.0, %v2933_v58  ;;  %v2941_v12 = vadd.f32 1.0, %v2940_v54  ;;  %v3013_v57 = vadd.f32 %v6320_v32, %v3012_v50  ;;  %v3521_v24 = vpop.eup %3520  ;;  %v3159_v58 = vld [vmem:[#allocation2 + $0x18] sm:$0xff]  ;;  %v3158_v54 = vld [vmem:[#allocation2 + $0x10] sm:$0xff] }
 0x31a   : > { %3182 = vmatpush.msra.mxu3 %v3165_v40 }
 0x31b   : > { %v2942_v60 = vmul.f32 %v2941_v12, %v2926_v18  ;;  %v2950_v10 = vxor.u32 2147483648, %v2934_v48  ;;  %3522 = vtanh.f32 %v3013_v57 }
 0x31c   : > { %3183 = vmatpush.msra.mxu3 %v3164_v26 }
 0x31d   : > { %v2947_v20 = vxor.u32 2147483648, %v2942_v60  ;;  %v2951_v63 = vsel %vm2949_vm1, %v2950_v10, %v2942_v60  ;;  %3103 = vmatmul.f32.gmra.mxu2 %v3517_v30 }
 0x31e   : > { %3184 = vmatpush.msra.mxu3 %v3163_v56 }
 0x31f   : > { %v2948_v27 = vsel %vm2946_vm14, %v2934_v48, %v2947_v20  ;;  %v3157_v48 = vld [vmem:[#allocation2 + $0x8] sm:$0xff] }
 0x320   : > { %v2952_v61 = vsel %vm2945_vm2, %v2948_v27, %v2951_v63  ;;  %v3015_v31 = vpop.f32.mrf.mxu1  ;;  %3185 = vmatpush.msra.mxu3 %v3162_v21 }
 0x321   : > { %v2953_v43 = vsel %vm2943_vm4, nan, %v2952_v61  ;;  %v3016_v16 = vadd.f32 %v6320_v32, %v3015_v31  ;;  %v3523_v6 = vpop.eup %3522 }
 0x322   : > { %3035 = vmatmul.f32.gmra.mxu1 %v2953_v43  ;;  %3186 = vmatpush.msra.mxu3 %v3161_v39 }
 0x323   : > { %3524 = vtanh.f32 %v3016_v16 }
 0x324   : > { %3187 = vmatpush.msra.mxu3 %v3160_v9 }
 0x325   : > { %3106 = vmatmul.f32.gmra.mxu2 %v3519_v4 }
 0x326   : > { %3188 = vmatpush.msra.mxu3 %v3159_v58 }
 0x328   : > { %v3018_v33 = vpop.f32.mrf.mxu1  ;;  %3189 = vmatpush.msra.mxu3 %v3158_v54 }
 0x329   : > { %v3019_v38 = vadd.f32 %v6320_v32, %v3018_v33  ;;  %v3525_v11 = vpop.eup %3524 }
 0x32a   : > { %3190 = vmatpush.msra.mxu3 %v3157_v48 }
 0x32b   : > { %3526 = vtanh.f32 %v3019_v38 }
 0x32c   : > { %3191 = vmatpush.msra.mxu3 %v3156_v15 }
 0x32d   : > { %3109 = vmatmul.f32.gmra.mxu2 %v3521_v24 }
 0x330   : > { %v3021_v59 = vpop.f32.mrf.mxu1 }
 0x331   : > { %v3022_v5 = vadd.f32 %v6320_v32, %v3021_v59  ;;  %v3527_v3 = vpop.eup %3526 }
 0x333   : > { %3528 = vtanh.f32 %v3022_v5 }
 0x335   : > { %3112 = vmatmul.f32.gmra.mxu2 %v3523_v6 }
 0x338   : > { %v3024_v28 = vpop.f32.mrf.mxu1 }
 0x339   : > { %v3025_v37 = vadd.f32 %v6320_v32, %v3024_v28  ;;  %v3529_v23 = vpop.eup %3528 }
 0x33b   : > { %3530 = vtanh.f32 %v3025_v37 }
 0x33d   : > { %3115 = vmatmul.f32.gmra.mxu2 %v3525_v11 }
 0x340   : > { %v3027_v29 = vpop.f32.mrf.mxu1 }
 0x341   : > { %v3028_v25 = vadd.f32 %v6320_v32, %v3027_v29  ;;  %v3531_v2 = vpop.eup %3530 }
 0x343   : > { %3532 = vtanh.f32 %v3028_v25 }
 0x345   : > { %3118 = vmatmul.f32.gmra.mxu2 %v3527_v3 }
 0x349   : > { %v3533_v18 = vpop.eup %3532 }
 0x34d   : > { %3121 = vmatmul.f32.gmra.mxu2 %v3529_v23 }
 0x355   : > { %3124 = vmatmul.f32.gmra.mxu2 %v3531_v2 }
 0x35d   : > { %3127 = vmatmul.f32.gmra.mxu2 %v3533_v18 }
 0x361   : > { %v3030_v36 = vpop.f32.mrf.mxu1 }
 0x362   : > { %v3031_v1 = vadd.f32 %v6320_v32, %v3030_v36 }
 0x364   : > { %3534 = vtanh.f32 %v3031_v1 }
 0x36a   : > { %v3535_v22 = vpop.eup %3534 }
 0x36b   : > { %3130 = vmatmul.f32.gmra.mxu2 %v3535_v22 }
 0x37c   : > { %v3092_v13 = vpop.f32.mrf.mxu2 }
 0x37d   : > { %v3093_v49 = vadd.f32 %v6377_v45, %v3092_v13 }
 0x380   : > { %v3033_v42 = vpop.f32.mrf.mxu1 }
 0x381   : > { %v3034_v19 = vadd.f32 %v6320_v32, %v3033_v42 }
 0x383   : > { %3536 = vtanh.f32 %v3034_v19 }
 0x384   : > { %3538 = vtanh.f32 %v3093_v49 }
 0x388   : > { %v3095_v12 = vpop.f32.mrf.mxu2 }
 0x389   : > { %v3537_v7 = vpop.eup %3536  ;;  %v3096_v35 = vadd.f32 %v6377_v45, %v3095_v12 }
 0x38a   : > { %3133 = vmatmul.f32.gmra.mxu2 %v3537_v7  ;;  %v3539_v60 = vpop.eup %3538 }
 0x38b   : > { %3540 = vtanh.f32 %v3096_v35  ;;  %3192 = vmatmul.f32.vlgmr.msra.gmra.mxu3 %v3539_v60 }
 0x390   : > { %v3098_v46 = vpop.f32.mrf.mxu2 }
 0x391   : > { %v3099_v14 = vadd.f32 %v6377_v45, %v3098_v46  ;;  %v3541_v27 = vpop.eup %3540 }
 0x393   : > { %3195 = vmatmul.f32.gmra.mxu3 %v3541_v27 }
 0x398   : > { %v3101_v61 = vpop.f32.mrf.mxu2 }
 0x399   : > { %v3102_v43 = vadd.f32 %v6377_v45, %v3101_v61 }
 0x39f   : > { %v3036_v10 = vpop.f32.mrf.mxu1 }
 0x3a0   : > { %v3037_v20 = vadd.f32 %v6320_v32, %v3036_v10  ;;  %v3104_v55 = vpop.f32.mrf.mxu2 }
 0x3a1   : > { %v3105_v32 = vadd.f32 %v6377_v45, %v3104_v55 }
 0x3a2   : > { %3542 = vtanh.f32 %v3037_v20 }
 0x3a3   : > { %3544 = vtanh.f32 %v3099_v14 }
 0x3a4   : > { %3546 = vtanh.f32 %v3102_v43 }
 0x3a5   : > { %3548 = vtanh.f32 %v3105_v32 }
 0x3a8   : > { %v3543_v63 = vpop.eup %3542  ;;  %v3107_v47 = vpop.f32.mrf.mxu2 }
 0x3a9   : > { %3136 = vmatmul.f32.gmra.mxu2 %v3543_v63  ;;  %v3545_v41 = vpop.eup %3544  ;;  %v3108_v53 = vadd.f32 %v6377_v45, %v3107_v47 }
 0x3aa   : > { %3198 = vmatmul.f32.gmra.mxu3 %v3545_v41  ;;  %v3547_v62 = vpop.eup %3546 }
 0x3ab   : > { %v3549_v30 = vpop.eup %3548  ;;  %3550 = vtanh.f32 %v3108_v53 }
 0x3b0   : > { %v3110_v50 = vpop.f32.mrf.mxu2 }
 0x3b1   : > { %v3111_v34 = vadd.f32 %v6377_v45, %v3110_v50  ;;  %v3551_v4 = vpop.eup %3550 }
 0x3b2   : > { %3201 = vmatmul.f32.gmra.mxu3 %v3547_v62 }
 0x3b3   : > { %3552 = vtanh.f32 %v3111_v34 }
 0x3b8   : > { %v3113_v31 = vpop.f32.mrf.mxu2 }
 0x3b9   : > { %v3114_v57 = vadd.f32 %v6377_v45, %v3113_v31  ;;  %v3553_v24 = vpop.eup %3552 }
 0x3ba   : > { %3204 = vmatmul.f32.gmra.mxu3 %v3549_v30 }
 0x3bb   : > { %3554 = vtanh.f32 %v3114_v57 }
 0x3c0   : > { %v3116_v33 = vpop.f32.mrf.mxu2 }
 0x3c1   : > { %v3117_v16 = vadd.f32 %v6377_v45, %v3116_v33  ;;  %v3555_v6 = vpop.eup %3554 }
 0x3c2   : > { %3207 = vmatmul.f32.gmra.mxu3 %v3551_v4 }
 0x3c3   : > { %3556 = vtanh.f32 %v3117_v16 }
 0x3c8   : > { %v3119_v59 = vpop.f32.mrf.mxu2 }
 0x3c9   : > { %v3120_v38 = vadd.f32 %v6377_v45, %v3119_v59  ;;  %v3557_v11 = vpop.eup %3556 }
 0x3ca   : > { %3210 = vmatmul.f32.gmra.mxu3 %v3553_v24 }
 0x3cb   : > { %3558 = vtanh.f32 %v3120_v38 }
 0x3d0   : > { %v3122_v5 = vpop.f32.mrf.mxu2 }
 0x3d1   : > { %v3123_v28 = vadd.f32 %v6377_v45, %v3122_v5  ;;  %v3559_v3 = vpop.eup %3558 }
 0x3d2   : > { %3213 = vmatmul.f32.gmra.mxu3 %v3555_v6 }
 0x3d3   : > { %3560 = vtanh.f32 %v3123_v28 }
 0x3d8   : > { %v3125_v37 = vpop.f32.mrf.mxu2 }
 0x3d9   : > { %v3126_v23 = vadd.f32 %v6377_v45, %v3125_v37  ;;  %v3561_v29 = vpop.eup %3560 }
 0x3da   : > { %3216 = vmatmul.f32.gmra.mxu3 %v3557_v11 }
 0x3db   : > { %3562 = vtanh.f32 %v3126_v23 }
 0x3e0   : > { %v3128_v25 = vpop.f32.mrf.mxu2 }
 0x3e1   : > { %v3129_v2 = vadd.f32 %v6377_v45, %v3128_v25  ;;  %v3563_v36 = vpop.eup %3562 }
 0x3e2   : > { %3219 = vmatmul.f32.gmra.mxu3 %v3559_v3 }
 0x3e3   : > { %3564 = vtanh.f32 %v3129_v2 }
 0x3e9   : > { %v3565_v22 = vpop.eup %3564 }
 0x3ea   : > { %3222 = vmatmul.f32.gmra.mxu3 %v3561_v29 }
 0x3ee   : > { %v3131_v1 = vpop.f32.mrf.mxu2 }
 0x3ef   : > { %v3132_v18 = vadd.f32 %v6377_v45, %v3131_v1 }
 0x3f1   : > { %3566 = vtanh.f32 %v3132_v18 }
 0x3f2   : > { %3225 = vmatmul.f32.gmra.mxu3 %v3563_v36 }
 0x3f7   : > { %v3567_v42 = vpop.eup %3566 }
 0x3fa   : > { %3228 = vmatmul.f32.gmra.mxu3 %v3565_v22 }
 0x402   : > { %3231 = vmatmul.f32.gmra.mxu3 %v3567_v42 }
 0x40d   : > { %v3134_v19 = vpop.f32.mrf.mxu2 }
 0x40e   : > { %v3135_v8 = vadd.f32 %v6377_v45, %v3134_v19  ;;  %v3193_v17 = vpop.f32.mrf.mxu3 }
 0x40f   : > { %v3194_v0 = vadd.f32 %v3507_v44, %v3193_v17 }
 0x410   : > { %3568 = vtanh.f32 %v3135_v8 }
 0x411   : > { %3241 = vst [vmem:[%s6401_s29] sm:$0xff] %v3194_v0 }
 0x416   : > { %v3569_v52 = vpop.eup %3568  ;;  %v3196_v40 = vpop.f32.mrf.mxu3 }
 0x417   : > { %3234 = vmatmul.f32.gmra.mxu3 %v3569_v52  ;;  %v3197_v26 = vadd.f32 %v3507_v44, %v3196_v40 }
 0x419   : > { %3242 = vst [vmem:[%s6401_s29 + $0x8] sm:$0xff] %v3197_v26 }
 0x42c   : > { %v3137_v7 = vpop.f32.mrf.mxu2 }
 0x42d   : > { %v3138_v51 = vadd.f32 %v6377_v45, %v3137_v7  ;;  %v3199_v21 = vpop.f32.mrf.mxu3 }
 0x42e   : > { %v3200_v39 = vadd.f32 %v3507_v44, %v3199_v21 }
 0x42f   : > { %3570 = vtanh.f32 %v3138_v51 }
 0x430   : > { %3243 = vst [vmem:[%s6401_s29 + $0x10] sm:$0xff] %v3200_v39 }
 0x435   : > { %v3571_v56 = vpop.eup %3570  ;;  %v3202_v13 = vpop.f32.mrf.mxu3 }
 0x436   : > { %3237 = vmatmul.f32.gmra.mxu3 %v3571_v56  ;;  %v3203_v49 = vadd.f32 %v3507_v44, %v3202_v13 }
 0x438   : > { %3244 = vst [vmem:[%s6401_s29 + $0x18] sm:$0xff] %v3203_v49 }
 0x43d   : > { %v3205_v9 = vpop.f32.mrf.mxu3 }
 0x43e   : > { %v3206_v58 = vadd.f32 %v3507_v44, %v3205_v9 }
 0x440   : > { %3245 = vst [vmem:[%s6401_s29 + $0x20] sm:$0xff] %v3206_v58 }
 0x445   : > { %v3208_v45 = vpop.f32.mrf.mxu3 }
 0x446   : > { %v3209_v54 = vadd.f32 %v3507_v44, %v3208_v45 }
 0x448   : > { %3246 = vst [vmem:[%s6401_s29 + $0x28] sm:$0xff] %v3209_v54 }
 0x44d   : > { %v3211_v48 = vpop.f32.mrf.mxu3 }
 0x44e   : > { %v3212_v12 = vadd.f32 %v3507_v44, %v3211_v48 }
 0x450   : > { %3247 = vst [vmem:[%s6401_s29 + $0x30] sm:$0xff] %v3212_v12 }
 0x455   : > { %v3214_v35 = vpop.f32.mrf.mxu3 }
 0x456   : > { %v3215_v15 = vadd.f32 %v3507_v44, %v3214_v35 }
 0x458   : > { %3248 = vst [vmem:[%s6401_s29 + $0x38] sm:$0xff] %v3215_v15 }
 0x45d   : > { %v3217_v60 = vpop.f32.mrf.mxu3 }
 0x45e   : > { %v3218_v10 = vadd.f32 %v3507_v44, %v3217_v60 }
 0x460   : > { %3249 = vst [vmem:[%s6401_s29 + $0x40] sm:$0xff] %v3218_v10 }
 0x465   : > { %v3220_v20 = vpop.f32.mrf.mxu3 }
 0x466   : > { %v3221_v46 = vadd.f32 %v3507_v44, %v3220_v20 }
 0x468   : > { %3250 = vst [vmem:[%s6401_s29 + $0x48] sm:$0xff] %v3221_v46 }
 0x46d   : > { %v3223_v14 = vpop.f32.mrf.mxu3 }
 0x46e   : > { %v3224_v27 = vadd.f32 %v3507_v44, %v3223_v14 }
 0x470   : > { %3251 = vst [vmem:[%s6401_s29 + $0x50] sm:$0xff] %v3224_v27 }
 0x475   : > { %v3226_v63 = vpop.f32.mrf.mxu3 }
 0x476   : > { %v3227_v61 = vadd.f32 %v3507_v44, %v3226_v63 }
 0x478   : > { %3252 = vst [vmem:[%s6401_s29 + $0x58] sm:$0xff] %v3227_v61 }
 0x47d   : > { %v3229_v43 = vpop.f32.mrf.mxu3 }
 0x47e   : > { %v3230_v41 = vadd.f32 %v3507_v44, %v3229_v43 }
 0x480   : > { %3253 = vst [vmem:[%s6401_s29 + $0x60] sm:$0xff] %v3230_v41 }
 0x485   : > { %v3232_v55 = vpop.f32.mrf.mxu3 }
 0x486   : > { %v3233_v32 = vadd.f32 %v3507_v44, %v3232_v55 }
 0x488   : > { %3254 = vst [vmem:[%s6401_s29 + $0x68] sm:$0xff] %v3233_v32 }
 0x49a   : > { %v3235_v62 = vpop.f32.mrf.mxu3 }
 0x49b   : > { %v3236_v47 = vadd.f32 %v3507_v44, %v3235_v62 }
 0x49d   : > { %3255 = vst [vmem:[%s6401_s29 + $0x70] sm:$0xff] %v3236_v47 }
 0x4b9   : > { %v3238_v53 = vpop.f32.mrf.mxu3 }
 0x4ba   : > { %v3239_v30 = vadd.f32 %v3507_v44, %v3238_v53 }
 0x4bc   : > { %3256 = vst [vmem:[%s6401_s29 + $0x78] sm:$0xff] %v3239_v30 }
 0x4bd   : > { %3631 = shalt.err (!%p3628_p8)
}
 0x4be   : > { %s3682_s17 = smov 128   ;;  %s3683_s29 = smov 8  }
 0x4bf   : > { %3447 = dma.vmem_to_hbm [thread:$0]  (%p3772_p5), %s3271_s23, 2048, %s3273_s24, %s3258_s25, %s3682_s17, %s3682_s17, %s3683_s29  }
 0x4c0 PF: > { %p3459_p9 = scmp.ge.s32.totalorder %s3670_s12, 2  ;;  %s3287_s22 = sand.u32 1, %s3658_s30  }
 0x4c1   : > { %s3288_s13 = scalar_lea.sflag [#allocation4], %s3287_s22 }
 0x4c2   : > { %p3454_p10 = pnand %p3459_p9, %p3776_p6 }
 0x4c4   : > { %p3455_p11 = pneg %p3454_p10 }
 0x4c6   : > { %3653 = dma.done.wait (%p3455_p11), %s3288_s13, 2048  }
 0x4c7   : > { %3655 = vsyncadd (%p3455_p11), %s3288_s13, 4294965248  ;;  %p20_p12 = scmp.ge.s32.totalorder %s3759_s15, 4   ;;  %s6740_s30 = smov %s3662_s10 }
 0x4c8   : > { %s6741_s10 = smov %s3666_s11  ;;  %s6742_s11 = smov %s3770_s18 }
 0x4c9   : > { %s6743_s12 = smov %s3759_s15  ;;  %22 = sbr.rel (!%p20_p12) target bundleno = 4 (0x4), region = 96 }
 0x4ce   :  { %3294 = vsyncpa [#allocation3], 1 }
 0x4cf   :  { %3296 = vsyncpa [#allocation3 + $0x1], 1 }
 0x4d0   :  { %3297 = vsyncpa [#allocation4], 1 }
 0x4d1   :  { %3299 = vsyncpa [#allocation4 + $0x1], 1 }

</bundles_post_ra>
